<compile_context>
chip_gen: v7x
topology: tpu7x:2x2x1
jax: 0.10.0
libtpu: 0.0.40
codegen_flags: <defaults>
</compile_context>

<pallas_src>
import jax
import jax.numpy as jnp
from jax.experimental import pallas as pl
from jax.experimental.pallas import tpu as pltpu

# ----------------------------- model constants ------------------------------
NUM_CHANNELS = 1
NUM_CLASSES = 10
B = 2
L = 384
C_OUT = 128
K_CONV = 3
T_CONV = L - K_CONV + 1            # 382
T_POOL = T_CONV // 2               # 191
T_POOL_PAD = 192                   # pad t to a multiple of 8; the extra row is
                                   # junk but is multiplied by zero fc1-weight rows
FC1_IN = C_OUT * T_POOL            # 24448
FC1_OUT = 256
K_PAD = C_OUT * T_POOL_PAD         # 24576
TK = 12288                         # fc1 contraction tile -> 2 K grid steps
NK = K_PAD // TK                   # 2
N_SPLIT = 2                        # FC1_OUT column split (megacore on v7x)
TN = FC1_OUT // N_SPLIT            # 128


# ------------- kernel 1: Conv1d + ReLU + MaxPool as im2col matmul ------------
def conv_relu_pool_kernel(cols_ref, w_ref, b_ref, out_ref):
    """cols: (B*T_POOL_PAD, 8) im2col windows [x[2t],x[2t+1],x[2t+2],x[2t+3],0..]
       w   : (8, 256) packed conv taps; cols 0..127 -> conv at 2t, 128..255 -> 2t+1
       b   : (1, 256) conv bias tiled twice
       out : (B*T_POOL_PAD, 128) bf16 = maxpool(relu(conv)) in (b, t)-row order."""
    y = jnp.dot(cols_ref[...], w_ref[...], preferred_element_type=jnp.float32)
    y = jnp.maximum(y + b_ref[...], 0.0)
    out_ref[...] = jnp.maximum(y[:, :C_OUT], y[:, C_OUT:]).astype(out_ref.dtype)


# ------------------------ kernel 2: fc1 + ReLU + fc2 -------------------------
def mlp_kernel(flat_ref, w1_ref, b1_ref, w2_ref, out_ref, acc_ref):
    """Linear(24448->256) tiled over K (bf16 in, f32 acc) + ReLU + Linear(256->NC).
    Grid = (N_SPLIT, NK): j = FC1_OUT column block ("parallel"), k = K tile."""
    k = pl.program_id(1)

    @pl.when(k == 0)
    def _():
        acc_ref[...] = jnp.zeros_like(acc_ref)

    acc_ref[...] += jnp.dot(flat_ref[...], w1_ref[...],
                            preferred_element_type=jnp.float32)

    @pl.when(k == pl.num_programs(1) - 1)
    def _():
        h = jnp.maximum(acc_ref[...] + b1_ref[...], 0.0)          # (B, TN)
        part = jnp.dot(h, w2_ref[...], preferred_element_type=jnp.float32)
        out_ref[...] = part[None, :, :].astype(out_ref.dtype)     # (1, B, NC)


# ------------------ one-time parameter packing (NOT in the jit) --------------
def pack_params(conv_w, conv_b, fc1_w, fc1_b, fc2_w, fc2_b):
    # conv: (8, 256) tap matrix for the im2col matmul.
    w = conv_w[:, 0, :]                                   # (C_OUT, 3)
    w_even = jnp.zeros((8, C_OUT), jnp.float32).at[0:3, :].set(w.T)
    w_odd = jnp.zeros((8, C_OUT), jnp.float32).at[1:4, :].set(w.T)
    conv_wp = jnp.concatenate([w_even, w_odd], axis=1)    # (8, 256)
    conv_bp = jnp.concatenate([conv_b, conv_b]).reshape(1, 2 * C_OUT)

    # fc1: permute columns from PyTorch's channel-major flatten (c*T_POOL + t)
    # to the kernel's (t, c) layout, pad t to 192 with zero rows, cast to bf16.
    w1t = jnp.transpose(fc1_w.reshape(FC1_OUT, C_OUT, T_POOL), (2, 1, 0))
    w1t = jnp.pad(w1t, ((0, T_POOL_PAD - T_POOL), (0, 0), (0, 0)))
    w1p = w1t.reshape(K_PAD, FC1_OUT).astype(jnp.bfloat16)

    b1p = fc1_b.reshape(1, FC1_OUT).astype(jnp.float32)
    w2p = fc2_w.T.astype(jnp.float32)                     # (FC1_OUT, NUM_CLASSES)
    b2p = fc2_b.astype(jnp.float32)                       # (NUM_CLASSES,)
    return conv_wp, conv_bp, w1p, b1p, w2p, b2p


# --------------------------------- forward -----------------------------------
def cnn_model_forward(x, conv_wp, conv_bp, w1p, b1p, w2p, b2p):
    # im2col: 4-sample windows at even positions, padded to 8 taps (tiny XLA glue).
    x_p = jnp.pad(x, ((0, 0), (0, 4)))                            # (B, 388)
    cols = jnp.stack([x_p[:, j:j + 2 * T_POOL_PAD:2] for j in range(4)], axis=-1)
    cols = jnp.pad(cols, ((0, 0), (0, 0), (0, 4)))                # (B, 192, 8)
    cols2 = cols.reshape(B * T_POOL_PAD, 8)                       # (384, 8)

    vmem = pl.BlockSpec(memory_space=pltpu.MemorySpace.VMEM)
    pooled = pl.pallas_call(
        conv_relu_pool_kernel,
        out_shape=jax.ShapeDtypeStruct((B * T_POOL_PAD, C_OUT), jnp.bfloat16),
        in_specs=[vmem, vmem, vmem],
        out_specs=vmem,
    )(cols2, conv_wp, conv_bp)                                    # (384, 128) bf16

    # Row order is (b, t), lane dim is c -> row-major reshape IS the flatten+pad.
    flat_p = pooled.reshape(B, K_PAD)                             # (2, 24576) bf16

    grid_spec = pltpu.PrefetchScalarGridSpec(
        num_scalar_prefetch=0,
        grid=(N_SPLIT, NK),
        in_specs=[
            pl.BlockSpec((B, TK), lambda j, k: (0, k)),           # flat (bf16)
            pl.BlockSpec((TK, TN), lambda j, k: (k, j)),          # fc1 W (bf16)
            pl.BlockSpec((1, TN), lambda j, k: (0, j)),           # fc1 b
            pl.BlockSpec((TN, NUM_CLASSES), lambda j, k: (j, 0)), # fc2 W rows
        ],
        out_specs=pl.BlockSpec((1, B, NUM_CLASSES), lambda j, k: (j, 0, 0)),
        scratch_shapes=[pltpu.VMEM((B, TN), jnp.float32)],
    )
    partial = pl.pallas_call(
        mlp_kernel,
        out_shape=jax.ShapeDtypeStruct((N_SPLIT, B, NUM_CLASSES), jnp.float32),
        grid_spec=grid_spec,
        compiler_params=pltpu.CompilerParams(
            dimension_semantics=("parallel", "arbitrary"),
            vmem_limit_bytes=32 * 1024 * 1024,
        ),
    )(flat_p, w1p, b1p, w2p)                                      # (2, B, NC)

    return partial.sum(axis=0) + b2p                              # (B, NC)


# ------------------------- pure-JAX reference (check) ------------------------
def reference_forward(x, conv_w, conv_b, fc1_w, fc1_b, fc2_w, fc2_b):
    wc2 = conv_w[:, 0, :]                                            # (C_OUT, 3)
    cols = jnp.stack([x[:, k:k + T_CONV] for k in range(K_CONV)], axis=-1)
    y = jnp.einsum('btk,ck->bct', cols, wc2) + conv_b[None, :, None]
    y = jnp.maximum(y, 0.0)
    y = y[:, :, :2 * T_POOL].reshape(B, C_OUT, T_POOL, 2).max(axis=-1)
    flat = y.reshape(B, FC1_IN)                                      # channel-major
    h = jnp.maximum(flat @ fc1_w.T + fc1_b, 0.0)
    return h @ fc2_w.T + fc2_b


if __name__ == "__main__":
    key = jax.random.PRNGKey(0)
    ks = jax.random.split(key, 7)
    conv_w = jax.random.normal(ks[0], (C_OUT, NUM_CHANNELS, K_CONV), jnp.float32) * 0.2
    conv_b = jax.random.normal(ks[1], (C_OUT,), jnp.float32) * 0.1
    fc1_w = jax.random.normal(ks[2], (FC1_OUT, FC1_IN), jnp.float32) * 0.01
    fc1_b = jax.random.normal(ks[3], (FC1_OUT,), jnp.float32) * 0.1
    fc2_w = jax.random.normal(ks[4], (NUM_CLASSES, FC1_OUT), jnp.float32) * 0.05
    fc2_b = jax.random.normal(ks[5], (NUM_CLASSES,), jnp.float32) * 0.1
    x = jax.random.normal(ks[6], (B, L), jnp.float32)

    # One-time weight packing (kept out of the jitted hot path).
    packed = pack_params(conv_w, conv_b, fc1_w, fc1_b, fc2_w, fc2_b)
    packed = jax.block_until_ready(packed)

    fwd = jax.jit(cnn_model_forward)
    logits = jax.block_until_ready(fwd(x, *packed))

    ref = reference_forward(x, conv_w, conv_b, fc1_w, fc1_b, fc2_w, fc2_b)
    # bf16 weight/activation stream for fc1 -> compare with a looser tolerance.
    if logits.shape != (B, NUM_CLASSES) or not jnp.allclose(logits, ref, rtol=2e-2, atol=2e-2):
        raise AssertionError(f"Pallas result mismatch: max abs err "
                             f"{float(jnp.max(jnp.abs(logits - ref)))}")
    print("KERNEL_OK")
</pallas_src>

<mosaic_0001>
module attributes {stable_mosaic.version = 11 : i64} {
  func.func @conv_relu_pool_kernel(%arg0: memref<384x8xf32, #tpu.memory_space<vmem>>, %arg1: memref<8x256xf32, #tpu.memory_space<vmem>>, %arg2: memref<1x256xf32, #tpu.memory_space<vmem>>, %arg3: memref<384x128xbf16, #tpu.memory_space<vmem>>) attributes {dimension_semantics = [], scalar_prefetch = 0 : i64, scratch_operands = 0 : i64, tpu.core_type = #tpu.core_type<tc>} {
    %c0 = arith.constant 0 : index
    %c0_0 = arith.constant 0 : index
    %0 = vector.load %arg0[%c0, %c0_0] : memref<384x8xf32, #tpu.memory_space<vmem>>, vector<384x8xf32>
    %c0_1 = arith.constant 0 : index
    %c0_2 = arith.constant 0 : index
    %1 = vector.load %arg1[%c0_1, %c0_2] : memref<8x256xf32, #tpu.memory_space<vmem>>, vector<8x256xf32>
    %cst = arith.constant dense<0.000000e+00> : vector<384x256xf32>
    %2 = tpu.matmul %0, %1, %cst {dimension_numbers = #tpu.dot_dimension_numbers<[1], [0], [0], [1], [0, 0, 1, 1], [], []>} : vector<384x8xf32>, vector<8x256xf32>, vector<384x256xf32> -> vector<384x256xf32>
    %c0_3 = arith.constant 0 : index
    %c0_4 = arith.constant 0 : index
    %3 = vector.load %arg2[%c0_3, %c0_4] : memref<1x256xf32, #tpu.memory_space<vmem>>, vector<1x256xf32>
    %4 = vector.broadcast %3 : vector<1x256xf32> to vector<384x256xf32>
    %5 = arith.addf %2, %4 : vector<384x256xf32>
    %cst_5 = arith.constant 0.000000e+00 : f32
    %6 = vector.broadcast %cst_5 : f32 to vector<384x256xf32>
    %7 = arith.maximumf %5, %6 : vector<384x256xf32>
    %8 = vector.extract_strided_slice %7 {offsets = [0, 0], sizes = [384, 128], strides = [1, 1]} : vector<384x256xf32> to vector<384x128xf32>
    %9 = vector.extract_strided_slice %7 {offsets = [0, 128], sizes = [384, 128], strides = [1, 1]} : vector<384x256xf32> to vector<384x128xf32>
    %10 = arith.maximumf %8, %9 : vector<384x128xf32>
    %11 = arith.truncf %10 : vector<384x128xf32> to vector<384x128xbf16>
    %c0_6 = arith.constant 0 : index
    %c0_7 = arith.constant 0 : index
    %12 = vector.load %arg3[%c0_6, %c0_7] : memref<384x128xbf16, #tpu.memory_space<vmem>>, vector<384x128xbf16>
    tpu.vector_store %arg3[%c0_6, %c0_7], %11 {strides = array<i32>} : memref<384x128xbf16, #tpu.memory_space<vmem>>, vector<384x128xbf16>,
    return
  }
}

module attributes {stable_mosaic.version = 11 : i64} {
  func.func @mlp_kernel(%arg0: i32, %arg1: i32, %arg2: memref<2x12288xbf16, #tpu.memory_space<vmem>>, %arg3: memref<12288x128xbf16, #tpu.memory_space<vmem>>, %arg4: memref<1x128xf32, #tpu.memory_space<vmem>>, %arg5: memref<128x10xf32, #tpu.memory_space<vmem>>, %arg6: memref<1x2x10xf32, #tpu.memory_space<vmem>>, %arg7: memref<2x128xf32, #tpu.memory_space<vmem>>) attributes {dimension_semantics = [#tpu.dimension_semantics<parallel>, #tpu.dimension_semantics<arbitrary>], iteration_bounds = array<i64: 2, 2>, scalar_prefetch = 0 : i64, scratch_operands = 1 : i64, tpu.core_type = #tpu.core_type<tc>, window_params = [{transform_indices = @transform_0, window_bounds = array<i64: 2, 12288>}, {transform_indices = @transform_1, window_bounds = array<i64: 12288, 128>}, {transform_indices = @transform_2, window_bounds = array<i64: 1, 128>}, {transform_indices = @transform_3, window_bounds = array<i64: 128, 10>}, {transform_indices = @transform_4, window_bounds = array<i64: 1, 2, 10>}]} {
    %c0_i32 = arith.constant 0 : i32
    %0 = arith.cmpi eq, %arg1, %c0_i32 : i32
    %1 = arith.extui %0 : i1 to i32
    %c0_i32_0 = arith.constant 0 : i32
    %2 = arith.cmpi ne, %1, %c0_i32_0 : i32
    scf.if %2 {
      %cst_9 = arith.constant 0.000000e+00 : f32
      %12 = vector.broadcast %cst_9 : f32 to vector<2x128xf32>
      %c0_10 = arith.constant 0 : index
      %c0_11 = arith.constant 0 : index
      %13 = vector.load %arg7[%c0_10, %c0_11] : memref<2x128xf32, #tpu.memory_space<vmem>>, vector<2x128xf32>
      tpu.vector_store %arg7[%c0_10, %c0_11], %12 {strides = array<i32>} : memref<2x128xf32, #tpu.memory_space<vmem>>, vector<2x128xf32>,
    } else {
    }
    %c0 = arith.constant 0 : index
    %c0_1 = arith.constant 0 : index
    %3 = vector.load %arg7[%c0, %c0_1] : memref<2x128xf32, #tpu.memory_space<vmem>>, vector<2x128xf32>
    %c0_2 = arith.constant 0 : index
    %c0_3 = arith.constant 0 : index
    %4 = vector.load %arg2[%c0_2, %c0_3] : memref<2x12288xbf16, #tpu.memory_space<vmem>>, vector<2x12288xbf16>
    %c0_4 = arith.constant 0 : index
    %c0_5 = arith.constant 0 : index
    %5 = vector.load %arg3[%c0_4, %c0_5] : memref<12288x128xbf16, #tpu.memory_space<vmem>>, vector<12288x128xbf16>
    %cst = arith.constant dense<0.000000e+00> : vector<2x128xf32>
    %6 = tpu.matmul %4, %5, %cst {dimension_numbers = #tpu.dot_dimension_numbers<[1], [0], [0], [1], [0, 0, 1, 1], [], []>} : vector<2x12288xbf16>, vector<12288x128xbf16>, vector<2x128xf32> -> vector<2x128xf32>
    %7 = arith.addf %3, %6 : vector<2x128xf32>
    %c0_6 = arith.constant 0 : index
    %c0_7 = arith.constant 0 : index
    %8 = vector.load %arg7[%c0_6, %c0_7] : memref<2x128xf32, #tpu.memory_space<vmem>>, vector<2x128xf32>
    tpu.vector_store %arg7[%c0_6, %c0_7], %7 {strides = array<i32>} : memref<2x128xf32, #tpu.memory_space<vmem>>, vector<2x128xf32>,
    %c1_i32 = arith.constant 1 : i32
    %9 = arith.cmpi eq, %arg1, %c1_i32 : i32
    %10 = arith.extui %9 : i1 to i32
    %c0_i32_8 = arith.constant 0 : i32
    %11 = arith.cmpi ne, %10, %c0_i32_8 : i32
    scf.if %11 {
      %c0_9 = arith.constant 0 : index
      %c0_10 = arith.constant 0 : index
      %12 = vector.load %arg7[%c0_9, %c0_10] : memref<2x128xf32, #tpu.memory_space<vmem>>, vector<2x128xf32>
      %c0_11 = arith.constant 0 : index
      %c0_12 = arith.constant 0 : index
      %13 = vector.load %arg4[%c0_11, %c0_12] : memref<1x128xf32, #tpu.memory_space<vmem>>, vector<1x128xf32>
      %14 = vector.broadcast %13 : vector<1x128xf32> to vector<2x128xf32>
      %15 = arith.addf %12, %14 : vector<2x128xf32>
      %cst_13 = arith.constant 0.000000e+00 : f32
      %16 = vector.broadcast %cst_13 : f32 to vector<2x128xf32>
      %17 = arith.maximumf %15, %16 : vector<2x128xf32>
      %c0_14 = arith.constant 0 : index
      %c0_15 = arith.constant 0 : index
      %18 = vector.load %arg5[%c0_14, %c0_15] : memref<128x10xf32, #tpu.memory_space<vmem>>, vector<128x10xf32>
      %cst_16 = arith.constant dense<0.000000e+00> : vector<2x10xf32>
      %19 = tpu.matmul %17, %18, %cst_16 {dimension_numbers = #tpu.dot_dimension_numbers<[1], [0], [0], [1], [0, 0, 1, 1], [], []>} : vector<2x128xf32>, vector<128x10xf32>, vector<2x10xf32> -> vector<2x10xf32>
      %20 = vector.shape_cast %19 : vector<2x10xf32> to vector<1x2x10xf32>
      %c0_17 = arith.constant 0 : index
      %c0_18 = arith.constant 0 : index
      %c0_19 = arith.constant 0 : index
      %21 = vector.load %arg6[%c0_17, %c0_18, %c0_19] : memref<1x2x10xf32, #tpu.memory_space<vmem>>, vector<1x2x10xf32>
      tpu.vector_store %arg6[%c0_17, %c0_18, %c0_19], %20 {strides = array<i32>} : memref<1x2x10xf32, #tpu.memory_space<vmem>>, vector<1x2x10xf32>,
    } else {
    }
    return
  }
  func.func @transform_0(%arg0: i32, %arg1: i32) -> (i32, i32) {
    %c0_i32 = arith.constant 0 : i32
    %c0_i32_0 = arith.constant 0 : i32
    return %c0_i32, %arg1 : i32, i32
  }
  func.func @transform_1(%arg0: i32, %arg1: i32) -> (i32, i32) {
    %c0_i32 = arith.constant 0 : i32
    return %arg1, %arg0 : i32, i32
  }
  func.func @transform_2(%arg0: i32, %arg1: i32) -> (i32, i32) {
    %c0_i32 = arith.constant 0 : i32
    %c0_i32_0 = arith.constant 0 : i32
    return %c0_i32, %arg0 : i32, i32
  }
  func.func @transform_3(%arg0: i32, %arg1: i32) -> (i32, i32) {
    %c0_i32 = arith.constant 0 : i32
    %c0_i32_0 = arith.constant 0 : i32
    return %arg0, %c0_i32 : i32, i32
  }
  func.func @transform_4(%arg0: i32, %arg1: i32) -> (i32, i32, i32) {
    %c0_i32 = arith.constant 0 : i32
    %c0_i32_0 = arith.constant 0 : i32
    %c0_i32_1 = arith.constant 0 : i32
    return %arg0, %c0_i32, %c0_i32_0 : i32, i32, i32
  }
}

</mosaic_0001>

<bundles_post_ra>
// kernel: cnn_model_forward.2
= control target key start
LH: loop header
LB: loop body
LE: loop exit
PB: predicated region body
PF: predicated region fallthrough
CT: control target
= control target key end

     0   :  { %8 = vsyncpa [#allocation3], 0  ;;  %s1787_s0 = inlined_call_operand.vmem [shape: f32[384,8], index: 0, kind: input, shape index: {}]   ;;  %s1788_s1 = inlined_call_operand.hbm [shape: f32[8,256], index: 1, kind: input, shape index: {}]   ;;  %s1789_s2 = inlined_call_operand.hbm [shape: f32[1,256], index: 2, kind: input, shape index: {}]   ;;  %s1790_s3 = inlined_call_operand.vmem [shape: bf16[384,128], index: 3, kind: output, shape index: {}]  }
   0x1   :  { %9 = vsyncpa [#allocation5], 0  ;;  %s1328_s12 = smov [#allocation2]   ;;  %s1329_s14 = smov [#allocation4]  }
   0x2   :  { %s18_s13 = sshll.u32 %s1328_s12, 4  ;;  %s28_s15 = sshll.u32 %s1329_s14, 4  ;;  %s19_s13 = int_to_ptr.vmem [resolvable:$true] %s18_s13  ;;  %s29_s15 = int_to_ptr.vmem [resolvable:$true] %s28_s15 }
   0x3   :  { %s1280_s18 = scalar_lea.hbm %s1788_s1, 256 }
   0x4   :  { %p1281_p0 = scmp.ne.s32.totalorder %s1788_s1, %s1280_s18  ;;  %p1284_p1 = scmp.lt.u32.totalorder %s1280_s18, %s1788_s1 }
   0x6   :  { %p1286_p2 = pnand %p1284_p1, %p1281_p0 }
   0x8   :  { %1289 = shalt.err (!%p1286_p2)
}
   0x9   :  { %s1290_s23 = scalar_lea.vmem %s19_s13, 256  ;;  %p1295_p4 = scmp.lt.s32.totalorder %s19_s13, %s19_s13 }
   0xa   :  { %p1291_p3 = scmp.ne.s32.totalorder %s19_s13, %s1290_s23  ;;  %p1296_p5 = scmp.lt.s32.totalorder %s1290_s23, %s1290_s23 }
   0xc   :  { %p1297_p6 = por %p1296_p5, %p1295_p4 }
   0xe   :  { %p1298_p7 = pnand %p1297_p6, %p1291_p3 }
  0x10   :  { %1301 = shalt.err (!%p1298_p7)
}
  0x11   :  { %21 = dma.hbm_to_vmem [thread:$0]  %s1788_s1, 256, %s19_s13, [#allocation3]  }
  0x12   :  { %s1302_s28 = scalar_lea.hbm %s1789_s2, 32 }
  0x13   :  { %p1303_p8 = scmp.ne.s32.totalorder %s1789_s2, %s1302_s28  ;;  %p1306_p9 = scmp.lt.u32.totalorder %s1302_s28, %s1789_s2 }
  0x15   :  { %p1308_p10 = pnand %p1306_p9, %p1303_p8 }
  0x17   :  { %1311 = shalt.err (!%p1308_p10)
}
  0x18   :  { %s1312_s6 = scalar_lea.vmem %s29_s15, 32  ;;  %p1317_p12 = scmp.lt.s32.totalorder %s29_s15, %s29_s15 }
  0x19   :  { %p1313_p11 = scmp.ne.s32.totalorder %s29_s15, %s1312_s6  ;;  %p1318_p13 = scmp.lt.s32.totalorder %s1312_s6, %s1312_s6 }
  0x1b   :  { %p1319_p0 = por %p1318_p13, %p1317_p12 }
  0x1d   :  { %p1320_p1 = pnand %p1319_p0, %p1313_p11 }
  0x1f   :  { %1323 = shalt.err (!%p1320_p1)
}
  0x20   :  { %31 = dma.hbm_to_vmem [thread:$0]  %s1789_s2, 32, %s29_s15, [#allocation5]  }
  0x21   :  { %1324 = dma.done.wait [#allocation3], 256  }
  0x22   :  { %1325 = vsyncadd [#allocation3], 4294967040 }
  0x23   :  { %1326 = dma.done.wait [#allocation5], 32  }
  0x24   :  { %1327 = vsyncadd [#allocation5], 4294967264  ;;  %v1330_v0 = vmov 0.0   ;;  %v87_v1 = vld [vmem:[#allocation2 + $0x8] sm:$0xff]  ;;  %v86_v2 = vld [vmem:[#allocation2] sm:$0xff]  ;;  %vm100_vm0 = vcmask 64512   ;;  %v90_v51 = vlaneseq }
  0x25   :  { %309 = vmatprep.mubr.f32.mxu0 %v1330_v0  ;;  %453 = vmatprep.mubr.f32.mxu1 %v1330_v0  ;;  %v38_v3 = vld [vmem:[%s1787_s0] sm:$0xff]  ;;  %v39_v5 = vld [vmem:[%s1787_s0 + $0x8] sm:$0xff]  ;;  %v40_v7 = vld [vmem:[%s1787_s0 + $0x10] sm:$0xff] }
  0x26   :  { %245 = vmatprep.subr.mxu0 %v87_v1  ;;  %1275 = vmatprep.subr.mxu1 %v87_v1  ;;  %v62_v4 = vld [vmem:[%s1787_s0 + $0xc0] sm:$0xff]  ;;  %v63_v6 = vld [vmem:[%s1787_s0 + $0xc8] sm:$0xff]  ;;  %v64_v8 = vld [vmem:[%s1787_s0 + $0xd0] sm:$0xff]  ;;  %v91_v52 = vshrl.u32 %v90_v51, 7 }
  0x27   :  { %246 = vmatpush1.msra.mxu0 %v86_v2  ;;  %1276 = vmatpush1.msra.mxu1 %v86_v2  ;;  %v41_v9 = vld [vmem:[%s1787_s0 + $0x18] sm:$0xff]  ;;  %v42_v11 = vld [vmem:[%s1787_s0 + $0x20] sm:$0xff]  ;;  %v43_v13 = vld [vmem:[%s1787_s0 + $0x28] sm:$0xff] }
  0x28   :  { %988 = vmatmul.mubr.msk.f32.vlgmr.msra.gmra.mrb[0].mxu0 %vm100_vm0, %v38_v3  ;;  %1012 = vmatmul.mubr.msk.f32.vlgmr.msra.gmra.mrb[0].mxu1 %vm100_vm0, %v62_v4  ;;  %v65_v10 = vld [vmem:[%s1787_s0 + $0xd8] sm:$0xff]  ;;  %v66_v12 = vld [vmem:[%s1787_s0 + $0xe0] sm:$0xff]  ;;  %v67_v14 = vld [vmem:[%s1787_s0 + $0xe8] sm:$0xff]  ;;  %v92_v53 = vsub.s32 0, %v91_v52  ;;  %v96_v55 = vsub.s32 1, %v91_v52 }
  0x29   :  { %315 = vmatprep.mubr.f32.mxu0 %v1330_v0  ;;  %459 = vmatprep.mubr.f32.mxu1 %v1330_v0  ;;  %v44_v15 = vld [vmem:[%s1787_s0 + $0x30] sm:$0xff]  ;;  %v45_v17 = vld [vmem:[%s1787_s0 + $0x38] sm:$0xff]  ;;  %v46_v19 = vld [vmem:[%s1787_s0 + $0x40] sm:$0xff] }
  0x2a   :  { %v68_v16 = vld [vmem:[%s1787_s0 + $0xf0] sm:$0xff]  ;;  %v69_v18 = vld [vmem:[%s1787_s0 + $0xf8] sm:$0xff]  ;;  %v70_v20 = vld [vmem:[%s1787_s0 + $0x100] sm:$0xff] }
  0x2b   :  { %v47_v21 = vld [vmem:[%s1787_s0 + $0x48] sm:$0xff]  ;;  %v48_v23 = vld [vmem:[%s1787_s0 + $0x50] sm:$0xff]  ;;  %v49_v25 = vld [vmem:[%s1787_s0 + $0x58] sm:$0xff] }
  0x2c   :  { %989 = vmatmul.mubr.msk.f32.gmra.mrb[2].mxu0 %vm100_vm0, %v39_v5  ;;  %1013 = vmatmul.mubr.msk.f32.gmra.mrb[2].mxu1 %vm100_vm0, %v63_v6  ;;  %v71_v22 = vld [vmem:[%s1787_s0 + $0x108] sm:$0xff]  ;;  %v72_v24 = vld [vmem:[%s1787_s0 + $0x110] sm:$0xff]  ;;  %v73_v26 = vld [vmem:[%s1787_s0 + $0x118] sm:$0xff] }
  0x2d   :  { %321 = vmatprep.mubr.f32.mxu0 %v1330_v0  ;;  %465 = vmatprep.mubr.f32.mxu1 %v1330_v0  ;;  %v50_v27 = vld [vmem:[%s1787_s0 + $0x60] sm:$0xff]  ;;  %v51_v29 = vld [vmem:[%s1787_s0 + $0x68] sm:$0xff]  ;;  %v52_v31 = vld [vmem:[%s1787_s0 + $0x70] sm:$0xff] }
  0x2e   :  { %v74_v28 = vld [vmem:[%s1787_s0 + $0x120] sm:$0xff]  ;;  %v75_v30 = vld [vmem:[%s1787_s0 + $0x128] sm:$0xff]  ;;  %v76_v32 = vld [vmem:[%s1787_s0 + $0x130] sm:$0xff] }
  0x2f   :  { %v53_v33 = vld [vmem:[%s1787_s0 + $0x78] sm:$0xff]  ;;  %v54_v35 = vld [vmem:[%s1787_s0 + $0x80] sm:$0xff]  ;;  %v55_v37 = vld [vmem:[%s1787_s0 + $0x88] sm:$0xff] }
  0x30   :  { %990 = vmatmul.mubr.msk.f32.gmra.mrb[4].mxu0 %vm100_vm0, %v40_v7  ;;  %1014 = vmatmul.mubr.msk.f32.gmra.mrb[4].mxu1 %vm100_vm0, %v64_v8  ;;  %v77_v34 = vld [vmem:[%s1787_s0 + $0x138] sm:$0xff]  ;;  %v78_v36 = vld [vmem:[%s1787_s0 + $0x140] sm:$0xff]  ;;  %v79_v38 = vld [vmem:[%s1787_s0 + $0x148] sm:$0xff] }
  0x31   :  { %327 = vmatprep.mubr.f32.mxu0 %v1330_v0  ;;  %471 = vmatprep.mubr.f32.mxu1 %v1330_v0  ;;  %v56_v39 = vld [vmem:[%s1787_s0 + $0x90] sm:$0xff]  ;;  %v57_v41 = vld [vmem:[%s1787_s0 + $0x98] sm:$0xff]  ;;  %v58_v43 = vld [vmem:[%s1787_s0 + $0xa0] sm:$0xff] }
  0x32   :  { %v80_v40 = vld [vmem:[%s1787_s0 + $0x150] sm:$0xff]  ;;  %v81_v42 = vld [vmem:[%s1787_s0 + $0x158] sm:$0xff]  ;;  %v82_v44 = vld [vmem:[%s1787_s0 + $0x160] sm:$0xff] }
  0x33   :  { %v59_v45 = vld [vmem:[%s1787_s0 + $0xa8] sm:$0xff]  ;;  %v60_v47 = vld [vmem:[%s1787_s0 + $0xb0] sm:$0xff]  ;;  %v61_v49 = vld [vmem:[%s1787_s0 + $0xb8] sm:$0xff] }
  0x34   :  { %991 = vmatmul.mubr.msk.f32.gmra.mrb[6].mxu0 %vm100_vm0, %v41_v9  ;;  %1015 = vmatmul.mubr.msk.f32.gmra.mrb[6].mxu1 %vm100_vm0, %v65_v10  ;;  %v83_v46 = vld [vmem:[%s1787_s0 + $0x168] sm:$0xff]  ;;  %v84_v48 = vld [vmem:[%s1787_s0 + $0x170] sm:$0xff]  ;;  %v85_v50 = vld [vmem:[%s1787_s0 + $0x178] sm:$0xff] }
  0x35   :  { %333 = vmatprep.mubr.f32.mxu0 %v1330_v0  ;;  %477 = vmatprep.mubr.f32.mxu1 %v1330_v0  ;;  %v88_v54 = vld [vmem:[#allocation4] sm:$0x3] }
  0x36   :  { %v1615_v56 = vrot.slane %v88_v54, %v92_v53  ;;  %v1617_v57 = vrot.slane %v88_v54, %v96_v55 }
  0x38   :  { %992 = vmatmul.mubr.msk.f32.gmra.mrb[8].mxu0 %vm100_vm0, %v42_v11  ;;  %1016 = vmatmul.mubr.msk.f32.gmra.mrb[8].mxu1 %vm100_vm0, %v66_v12 }
  0x39   :  { %339 = vmatprep.mubr.f32.mxu0 %v1330_v0  ;;  %483 = vmatprep.mubr.f32.mxu1 %v1330_v0 }
  0x3c   :  { %993 = vmatmul.mubr.msk.f32.gmra.mrb[10].mxu0 %vm100_vm0, %v43_v13  ;;  %1017 = vmatmul.mubr.msk.f32.gmra.mrb[10].mxu1 %vm100_vm0, %v67_v14 }
  0x3d   :  { %345 = vmatprep.mubr.f32.mxu0 %v1330_v0  ;;  %489 = vmatprep.mubr.f32.mxu1 %v1330_v0 }
  0x40   :  { %994 = vmatmul.mubr.msk.f32.gmra.mrb[12].mxu0 %vm100_vm0, %v44_v15  ;;  %1018 = vmatmul.mubr.msk.f32.gmra.mrb[12].mxu1 %vm100_vm0, %v68_v16 }
  0x41   :  { %351 = vmatprep.mubr.f32.mxu0 %v1330_v0  ;;  %495 = vmatprep.mubr.f32.mxu1 %v1330_v0 }
  0x44   :  { %995 = vmatmul.mubr.msk.f32.gmra.mrb[14].mxu0 %vm100_vm0, %v45_v17  ;;  %1019 = vmatmul.mubr.msk.f32.gmra.mrb[14].mxu1 %vm100_vm0, %v69_v18 }
  0x45   :  { %357 = vmatprep.mubr.f32.mxu0 %v1330_v0  ;;  %501 = vmatprep.mubr.f32.mxu1 %v1330_v0 }
  0x48   :  { %996 = vmatmul.mubr.msk.f32.gmra.mrb[16].mxu0 %vm100_vm0, %v46_v19  ;;  %1020 = vmatmul.mubr.msk.f32.gmra.mrb[16].mxu1 %vm100_vm0, %v70_v20 }
  0x49   :  { %363 = vmatprep.mubr.f32.mxu0 %v1330_v0  ;;  %507 = vmatprep.mubr.f32.mxu1 %v1330_v0 }
  0x4c   :  { %997 = vmatmul.mubr.msk.f32.gmra.mrb[18].mxu0 %vm100_vm0, %v47_v21  ;;  %1021 = vmatmul.mubr.msk.f32.gmra.mrb[18].mxu1 %vm100_vm0, %v71_v22 }
  0x4d   :  { %369 = vmatprep.mubr.f32.mxu0 %v1330_v0  ;;  %513 = vmatprep.mubr.f32.mxu1 %v1330_v0 }
  0x50   :  { %998 = vmatmul.mubr.msk.f32.gmra.mrb[20].mxu0 %vm100_vm0, %v48_v23  ;;  %1022 = vmatmul.mubr.msk.f32.gmra.mrb[20].mxu1 %vm100_vm0, %v72_v24 }
  0x51   :  { %375 = vmatprep.mubr.f32.mxu0 %v1330_v0  ;;  %519 = vmatprep.mubr.f32.mxu1 %v1330_v0 }
  0x54   :  { %999 = vmatmul.mubr.msk.f32.gmra.mrb[22].mxu0 %vm100_vm0, %v49_v25  ;;  %1023 = vmatmul.mubr.msk.f32.gmra.mrb[22].mxu1 %vm100_vm0, %v73_v26 }
  0x55   :  { %381 = vmatprep.mubr.f32.mxu0 %v1330_v0  ;;  %525 = vmatprep.mubr.f32.mxu1 %v1330_v0 }
  0x58   :  { %1000 = vmatmul.mubr.msk.f32.gmra.mrb[24].mxu0 %vm100_vm0, %v50_v27  ;;  %1024 = vmatmul.mubr.msk.f32.gmra.mrb[24].mxu1 %vm100_vm0, %v74_v28 }
  0x59   :  { %387 = vmatprep.mubr.f32.mxu0 %v1330_v0  ;;  %531 = vmatprep.mubr.f32.mxu1 %v1330_v0 }
  0x5c   :  { %1001 = vmatmul.mubr.msk.f32.gmra.mrb[26].mxu0 %vm100_vm0, %v51_v29  ;;  %1025 = vmatmul.mubr.msk.f32.gmra.mrb[26].mxu1 %vm100_vm0, %v75_v30 }
  0x5d   :  { %393 = vmatprep.mubr.f32.mxu0 %v1330_v0  ;;  %537 = vmatprep.mubr.f32.mxu1 %v1330_v0 }
  0x60   :  { %1002 = vmatmul.mubr.msk.f32.gmra.mrb[28].mxu0 %vm100_vm0, %v52_v31  ;;  %1026 = vmatmul.mubr.msk.f32.gmra.mrb[28].mxu1 %vm100_vm0, %v76_v32 }
  0x61   :  { %399 = vmatprep.mubr.f32.mxu0 %v1330_v0  ;;  %543 = vmatprep.mubr.f32.mxu1 %v1330_v0 }
  0x64   :  { %1003 = vmatmul.mubr.msk.f32.gmra.mrb[30].mxu0 %vm100_vm0, %v53_v33  ;;  %1027 = vmatmul.mubr.msk.f32.gmra.mrb[30].mxu1 %vm100_vm0, %v77_v34 }
  0x65   :  { %405 = vmatprep.mubr.f32.mxu0 %v1330_v0  ;;  %549 = vmatprep.mubr.f32.mxu1 %v1330_v0 }
  0x68   :  { %1004 = vmatmul.mubr.msk.f32.gmra.mrb[32].mxu0 %vm100_vm0, %v54_v35  ;;  %1028 = vmatmul.mubr.msk.f32.gmra.mrb[32].mxu1 %vm100_vm0, %v78_v36 }
  0x69   :  { %411 = vmatprep.mubr.f32.mxu0 %v1330_v0  ;;  %555 = vmatprep.mubr.f32.mxu1 %v1330_v0 }
  0x6c   :  { %1005 = vmatmul.mubr.msk.f32.gmra.mrb[34].mxu0 %vm100_vm0, %v55_v37  ;;  %1029 = vmatmul.mubr.msk.f32.gmra.mrb[34].mxu1 %vm100_vm0, %v79_v38 }
  0x6d   :  { %417 = vmatprep.mubr.f32.mxu0 %v1330_v0  ;;  %561 = vmatprep.mubr.f32.mxu1 %v1330_v0 }
  0x70   :  { %1006 = vmatmul.mubr.msk.f32.gmra.mrb[36].mxu0 %vm100_vm0, %v56_v39  ;;  %1030 = vmatmul.mubr.msk.f32.gmra.mrb[36].mxu1 %vm100_vm0, %v80_v40 }
  0x71   :  { %423 = vmatprep.mubr.f32.mxu0 %v1330_v0  ;;  %567 = vmatprep.mubr.f32.mxu1 %v1330_v0 }
  0x74   :  { %1007 = vmatmul.mubr.msk.f32.gmra.mrb[38].mxu0 %vm100_vm0, %v57_v41  ;;  %1031 = vmatmul.mubr.msk.f32.gmra.mrb[38].mxu1 %vm100_vm0, %v81_v42 }
  0x75   :  { %429 = vmatprep.mubr.f32.mxu0 %v1330_v0  ;;  %573 = vmatprep.mubr.f32.mxu1 %v1330_v0 }
  0x78   :  { %1008 = vmatmul.mubr.msk.f32.gmra.mrb[40].mxu0 %vm100_vm0, %v58_v43  ;;  %1032 = vmatmul.mubr.msk.f32.gmra.mrb[40].mxu1 %vm100_vm0, %v82_v44 }
  0x79   :  { %435 = vmatprep.mubr.f32.mxu0 %v1330_v0  ;;  %579 = vmatprep.mubr.f32.mxu1 %v1330_v0 }
  0x7c   :  { %1009 = vmatmul.mubr.msk.f32.gmra.mrb[42].mxu0 %vm100_vm0, %v59_v45  ;;  %1033 = vmatmul.mubr.msk.f32.gmra.mrb[42].mxu1 %vm100_vm0, %v83_v46 }
  0x7d   :  { %441 = vmatprep.mubr.f32.mxu0 %v1330_v0  ;;  %585 = vmatprep.mubr.f32.mxu1 %v1330_v0 }
  0x80   :  { %1010 = vmatmul.mubr.msk.f32.gmra.mrb[44].mxu0 %vm100_vm0, %v60_v47  ;;  %1034 = vmatmul.mubr.msk.f32.gmra.mrb[44].mxu1 %vm100_vm0, %v84_v48 }
  0x81   :  { %447 = vmatprep.mubr.f32.mxu0 %v1330_v0  ;;  %591 = vmatprep.mubr.f32.mxu1 %v1330_v0 }
  0x84   :  { %1011 = vmatmul.mubr.msk.f32.gmra.mrb[46].mxu0 %vm100_vm0, %v61_v49  ;;  %1035 = vmatmul.mubr.msk.f32.gmra.mrb[46].mxu1 %vm100_vm0, %v85_v50 }
  0xfb   :  { %v311_v58 = vpop.f32.mrb[0].mxu0  ;;  %v455_v59 = vpop.f32.mrb[0].mxu1 }
  0xfc   :  { %v312_v60 = vadd.f32 %v311_v58, %v1615_v56  ;;  %v456_v61 = vadd.f32 %v455_v59, %v1615_v56  ;;  %v313_v62 = vpop.f32.mrb[1].mxu0  ;;  %v457_v63 = vpop.f32.mrb[1].mxu1 }
  0xfd   :  { %v314_v0 = vadd.f32 %v313_v62, %v1617_v57  ;;  %v458_v1 = vadd.f32 %v457_v63, %v1617_v57 }
  0xfe   :  { %v598_v2 = vmax.f32 %v312_v60, 0.0  ;;  %v646_v3 = vmax.f32 %v456_v61, 0.0 }
  0xff   :  { %v599_v4 = vmax.f32 %v314_v0, 0.0  ;;  %v647_v5 = vmax.f32 %v458_v1, 0.0  ;;  %v317_v6 = vpop.f32.mrb[2].mxu0  ;;  %v461_v7 = vpop.f32.mrb[2].mxu1 }
 0x100   :  { %v318_v8 = vadd.f32 %v317_v6, %v1615_v56  ;;  %v462_v9 = vadd.f32 %v461_v7, %v1615_v56  ;;  %v319_v10 = vpop.f32.mrb[3].mxu0  ;;  %v463_v11 = vpop.f32.mrb[3].mxu1 }
 0x101   :  { %v694_v12 = vmax.f32 %v598_v2, %v599_v4  ;;  %v718_v13 = vmax.f32 %v646_v3, %v647_v5  ;;  %v320_v14 = vadd.f32 %v319_v10, %v1617_v57  ;;  %v464_v15 = vadd.f32 %v463_v11, %v1617_v57 }
 0x102   :  { %v600_v16 = vmax.f32 %v318_v8, 0.0  ;;  %v648_v17 = vmax.f32 %v462_v9, 0.0 }
 0x103   :  { %v601_v18 = vmax.f32 %v320_v14, 0.0  ;;  %v649_v19 = vmax.f32 %v464_v15, 0.0  ;;  %v323_v20 = vpop.f32.mrb[4].mxu0  ;;  %v467_v21 = vpop.f32.mrb[4].mxu1 }
 0x104   :  { %v324_v22 = vadd.f32 %v323_v20, %v1615_v56  ;;  %v468_v23 = vadd.f32 %v467_v21, %v1615_v56  ;;  %v325_v24 = vpop.f32.mrb[5].mxu0  ;;  %v469_v25 = vpop.f32.mrb[5].mxu1 }
 0x105   :  { %v695_v26 = vmax.f32 %v600_v16, %v601_v18  ;;  %v719_v27 = vmax.f32 %v648_v17, %v649_v19  ;;  %v326_v28 = vadd.f32 %v325_v24, %v1617_v57  ;;  %v470_v29 = vadd.f32 %v469_v25, %v1617_v57 }
 0x106   :  { %v602_v30 = vmax.f32 %v324_v22, 0.0  ;;  %v650_v31 = vmax.f32 %v468_v23, 0.0 }
 0x107   :  { %v1135_v32 = vpack.c.bf16 %v695_v26, %v694_v12  ;;  %v1195_v33 = vpack.c.bf16 %v719_v27, %v718_v13  ;;  %v603_v34 = vmax.f32 %v326_v28, 0.0  ;;  %v651_v35 = vmax.f32 %v470_v29, 0.0  ;;  %v329_v36 = vpop.f32.mrb[6].mxu0  ;;  %v473_v37 = vpop.f32.mrb[6].mxu1 }
 0x108   :  { %v330_v38 = vadd.f32 %v329_v36, %v1615_v56  ;;  %v474_v39 = vadd.f32 %v473_v37, %v1615_v56  ;;  %v331_v40 = vpop.f32.mrb[7].mxu0  ;;  %v475_v41 = vpop.f32.mrb[7].mxu1 }
 0x109   :  { %1136 = vst [vmem:[%s1790_s3] sm:$0xff] %v1135_v32   ;;  %1263 = vst [vmem:[%s1790_s3 + $0x60] sm:$0xff] %v1195_v33   ;;  %v696_v42 = vmax.f32 %v602_v30, %v603_v34  ;;  %v720_v43 = vmax.f32 %v650_v31, %v651_v35  ;;  %v332_v44 = vadd.f32 %v331_v40, %v1617_v57 }
 0x10a   :  { %v476_v45 = vadd.f32 %v475_v41, %v1617_v57  ;;  %v604_v46 = vmax.f32 %v330_v38, 0.0  ;;  %v652_v47 = vmax.f32 %v474_v39, 0.0 }
 0x10b   :  { %v605_v48 = vmax.f32 %v332_v44, 0.0  ;;  %v335_v50 = vpop.f32.mrb[8].mxu0  ;;  %v479_v51 = vpop.f32.mrb[8].mxu1 }
 0x10c   :  { %v653_v49 = vmax.f32 %v476_v45, 0.0  ;;  %v336_v52 = vadd.f32 %v335_v50, %v1615_v56  ;;  %v480_v53 = vadd.f32 %v479_v51, %v1615_v56  ;;  %v337_v54 = vpop.f32.mrb[9].mxu0  ;;  %v481_v55 = vpop.f32.mrb[9].mxu1 }
 0x10d   :  { %v697_v58 = vmax.f32 %v604_v46, %v605_v48  ;;  %v338_v60 = vadd.f32 %v337_v54, %v1617_v57  ;;  %v482_v61 = vadd.f32 %v481_v55, %v1617_v57 }
 0x10e   :  { %v721_v59 = vmax.f32 %v652_v47, %v653_v49  ;;  %v606_v62 = vmax.f32 %v336_v52, 0.0  ;;  %v654_v63 = vmax.f32 %v480_v53, 0.0 }
 0x10f   :  { %v1140_v0 = vpack.c.bf16 %v697_v58, %v696_v42  ;;  %v607_v2 = vmax.f32 %v338_v60, 0.0  ;;  %v655_v3 = vmax.f32 %v482_v61, 0.0  ;;  %v341_v4 = vpop.f32.mrb[10].mxu0  ;;  %v485_v5 = vpop.f32.mrb[10].mxu1 }
 0x110   :  { %v1200_v1 = vpack.c.bf16 %v721_v59, %v720_v43  ;;  %v342_v6 = vadd.f32 %v341_v4, %v1615_v56  ;;  %v486_v7 = vadd.f32 %v485_v5, %v1615_v56  ;;  %v343_v8 = vpop.f32.mrb[11].mxu0  ;;  %v487_v9 = vpop.f32.mrb[11].mxu1 }
 0x111   :  { %1252 = vst [vmem:[%s1790_s3 + $0x8] sm:$0xff] %v1140_v0   ;;  %v698_v10 = vmax.f32 %v606_v62, %v607_v2  ;;  %v722_v11 = vmax.f32 %v654_v63, %v655_v3  ;;  %v344_v12 = vadd.f32 %v343_v8, %v1617_v57  ;;  %v488_v13 = vadd.f32 %v487_v9, %v1617_v57 }
 0x112   :  { %1264 = vst [vmem:[%s1790_s3 + $0x68] sm:$0xff] %v1200_v1   ;;  %v608_v14 = vmax.f32 %v342_v6, 0.0  ;;  %v656_v15 = vmax.f32 %v486_v7, 0.0 }
 0x113   :  { %v609_v16 = vmax.f32 %v344_v12, 0.0  ;;  %v657_v17 = vmax.f32 %v488_v13, 0.0  ;;  %v347_v18 = vpop.f32.mrb[12].mxu0  ;;  %v491_v19 = vpop.f32.mrb[12].mxu1 }
 0x114   :  { %v348_v20 = vadd.f32 %v347_v18, %v1615_v56  ;;  %v492_v21 = vadd.f32 %v491_v19, %v1615_v56  ;;  %v349_v22 = vpop.f32.mrb[13].mxu0  ;;  %v493_v23 = vpop.f32.mrb[13].mxu1 }
 0x115   :  { %v699_v24 = vmax.f32 %v608_v14, %v609_v16  ;;  %v723_v25 = vmax.f32 %v656_v15, %v657_v17  ;;  %v350_v26 = vadd.f32 %v349_v22, %v1617_v57  ;;  %v494_v27 = vadd.f32 %v493_v23, %v1617_v57 }
 0x116   :  { %v610_v28 = vmax.f32 %v348_v20, 0.0  ;;  %v658_v29 = vmax.f32 %v492_v21, 0.0 }
 0x117   :  { %v1145_v30 = vpack.c.bf16 %v699_v24, %v698_v10  ;;  %v1205_v31 = vpack.c.bf16 %v723_v25, %v722_v11  ;;  %v611_v32 = vmax.f32 %v350_v26, 0.0  ;;  %v659_v33 = vmax.f32 %v494_v27, 0.0  ;;  %v353_v34 = vpop.f32.mrb[14].mxu0  ;;  %v497_v35 = vpop.f32.mrb[14].mxu1 }
 0x118   :  { %v354_v36 = vadd.f32 %v353_v34, %v1615_v56  ;;  %v498_v37 = vadd.f32 %v497_v35, %v1615_v56  ;;  %v355_v38 = vpop.f32.mrb[15].mxu0  ;;  %v499_v39 = vpop.f32.mrb[15].mxu1 }
 0x119   :  { %1253 = vst [vmem:[%s1790_s3 + $0x10] sm:$0xff] %v1145_v30   ;;  %1265 = vst [vmem:[%s1790_s3 + $0x70] sm:$0xff] %v1205_v31   ;;  %v700_v40 = vmax.f32 %v610_v28, %v611_v32  ;;  %v724_v41 = vmax.f32 %v658_v29, %v659_v33  ;;  %v356_v42 = vadd.f32 %v355_v38, %v1617_v57 }
 0x11a   :  { %v500_v43 = vadd.f32 %v499_v39, %v1617_v57  ;;  %v612_v44 = vmax.f32 %v354_v36, 0.0  ;;  %v660_v45 = vmax.f32 %v498_v37, 0.0 }
 0x11b   :  { %v613_v46 = vmax.f32 %v356_v42, 0.0  ;;  %v359_v48 = vpop.f32.mrb[16].mxu0  ;;  %v503_v49 = vpop.f32.mrb[16].mxu1 }
 0x11c   :  { %v661_v47 = vmax.f32 %v500_v43, 0.0  ;;  %v360_v50 = vadd.f32 %v359_v48, %v1615_v56  ;;  %v504_v51 = vadd.f32 %v503_v49, %v1615_v56  ;;  %v361_v52 = vpop.f32.mrb[17].mxu0  ;;  %v505_v53 = vpop.f32.mrb[17].mxu1 }
 0x11d   :  { %v701_v54 = vmax.f32 %v612_v44, %v613_v46  ;;  %v362_v58 = vadd.f32 %v361_v52, %v1617_v57  ;;  %v506_v59 = vadd.f32 %v505_v53, %v1617_v57 }
 0x11e   :  { %v725_v55 = vmax.f32 %v660_v45, %v661_v47  ;;  %v614_v60 = vmax.f32 %v360_v50, 0.0  ;;  %v662_v61 = vmax.f32 %v504_v51, 0.0 }
 0x11f   :  { %v1150_v62 = vpack.c.bf16 %v701_v54, %v700_v40  ;;  %v615_v0 = vmax.f32 %v362_v58, 0.0  ;;  %v663_v1 = vmax.f32 %v506_v59, 0.0  ;;  %v365_v2 = vpop.f32.mrb[18].mxu0  ;;  %v509_v3 = vpop.f32.mrb[18].mxu1 }
 0x120   :  { %v1210_v63 = vpack.c.bf16 %v725_v55, %v724_v41  ;;  %v366_v4 = vadd.f32 %v365_v2, %v1615_v56  ;;  %v510_v5 = vadd.f32 %v509_v3, %v1615_v56  ;;  %v367_v6 = vpop.f32.mrb[19].mxu0  ;;  %v511_v7 = vpop.f32.mrb[19].mxu1 }
 0x121   :  { %1254 = vst [vmem:[%s1790_s3 + $0x18] sm:$0xff] %v1150_v62   ;;  %v702_v8 = vmax.f32 %v614_v60, %v615_v0  ;;  %v726_v9 = vmax.f32 %v662_v61, %v663_v1  ;;  %v368_v10 = vadd.f32 %v367_v6, %v1617_v57  ;;  %v512_v11 = vadd.f32 %v511_v7, %v1617_v57 }
 0x122   :  { %1266 = vst [vmem:[%s1790_s3 + $0x78] sm:$0xff] %v1210_v63   ;;  %v616_v12 = vmax.f32 %v366_v4, 0.0  ;;  %v664_v13 = vmax.f32 %v510_v5, 0.0 }
 0x123   :  { %v617_v14 = vmax.f32 %v368_v10, 0.0  ;;  %v665_v15 = vmax.f32 %v512_v11, 0.0  ;;  %v371_v16 = vpop.f32.mrb[20].mxu0  ;;  %v515_v17 = vpop.f32.mrb[20].mxu1 }
 0x124   :  { %v372_v18 = vadd.f32 %v371_v16, %v1615_v56  ;;  %v516_v19 = vadd.f32 %v515_v17, %v1615_v56  ;;  %v373_v20 = vpop.f32.mrb[21].mxu0  ;;  %v517_v21 = vpop.f32.mrb[21].mxu1 }
 0x125   :  { %v703_v22 = vmax.f32 %v616_v12, %v617_v14  ;;  %v727_v23 = vmax.f32 %v664_v13, %v665_v15  ;;  %v374_v24 = vadd.f32 %v373_v20, %v1617_v57  ;;  %v518_v25 = vadd.f32 %v517_v21, %v1617_v57 }
 0x126   :  { %v618_v26 = vmax.f32 %v372_v18, 0.0  ;;  %v666_v27 = vmax.f32 %v516_v19, 0.0 }
 0x127   :  { %v1155_v28 = vpack.c.bf16 %v703_v22, %v702_v8  ;;  %v1215_v29 = vpack.c.bf16 %v727_v23, %v726_v9  ;;  %v619_v30 = vmax.f32 %v374_v24, 0.0  ;;  %v667_v31 = vmax.f32 %v518_v25, 0.0  ;;  %v377_v32 = vpop.f32.mrb[22].mxu0  ;;  %v521_v33 = vpop.f32.mrb[22].mxu1 }
 0x128   :  { %v378_v34 = vadd.f32 %v377_v32, %v1615_v56  ;;  %v522_v35 = vadd.f32 %v521_v33, %v1615_v56  ;;  %v379_v36 = vpop.f32.mrb[23].mxu0  ;;  %v523_v37 = vpop.f32.mrb[23].mxu1 }
 0x129   :  { %1255 = vst [vmem:[%s1790_s3 + $0x20] sm:$0xff] %v1155_v28   ;;  %1267 = vst [vmem:[%s1790_s3 + $0x80] sm:$0xff] %v1215_v29   ;;  %v704_v38 = vmax.f32 %v618_v26, %v619_v30  ;;  %v728_v39 = vmax.f32 %v666_v27, %v667_v31  ;;  %v380_v40 = vadd.f32 %v379_v36, %v1617_v57 }
 0x12a   :  { %v524_v41 = vadd.f32 %v523_v37, %v1617_v57  ;;  %v620_v42 = vmax.f32 %v378_v34, 0.0  ;;  %v668_v43 = vmax.f32 %v522_v35, 0.0 }
 0x12b   :  { %v621_v44 = vmax.f32 %v380_v40, 0.0  ;;  %v383_v46 = vpop.f32.mrb[24].mxu0  ;;  %v527_v47 = vpop.f32.mrb[24].mxu1 }
 0x12c   :  { %v669_v45 = vmax.f32 %v524_v41, 0.0  ;;  %v384_v48 = vadd.f32 %v383_v46, %v1615_v56  ;;  %v528_v49 = vadd.f32 %v527_v47, %v1615_v56  ;;  %v385_v50 = vpop.f32.mrb[25].mxu0  ;;  %v529_v51 = vpop.f32.mrb[25].mxu1 }
 0x12d   :  { %v705_v52 = vmax.f32 %v620_v42, %v621_v44  ;;  %v386_v54 = vadd.f32 %v385_v50, %v1617_v57  ;;  %v530_v55 = vadd.f32 %v529_v51, %v1617_v57 }
 0x12e   :  { %v729_v53 = vmax.f32 %v668_v43, %v669_v45  ;;  %v622_v58 = vmax.f32 %v384_v48, 0.0  ;;  %v670_v59 = vmax.f32 %v528_v49, 0.0 }
 0x12f   :  { %v1160_v60 = vpack.c.bf16 %v705_v52, %v704_v38  ;;  %v623_v62 = vmax.f32 %v386_v54, 0.0  ;;  %v671_v63 = vmax.f32 %v530_v55, 0.0  ;;  %v389_v0 = vpop.f32.mrb[26].mxu0  ;;  %v533_v1 = vpop.f32.mrb[26].mxu1 }
 0x130   :  { %v1220_v61 = vpack.c.bf16 %v729_v53, %v728_v39  ;;  %v390_v2 = vadd.f32 %v389_v0, %v1615_v56  ;;  %v534_v3 = vadd.f32 %v533_v1, %v1615_v56  ;;  %v391_v4 = vpop.f32.mrb[27].mxu0  ;;  %v535_v5 = vpop.f32.mrb[27].mxu1 }
 0x131   :  { %1256 = vst [vmem:[%s1790_s3 + $0x28] sm:$0xff] %v1160_v60   ;;  %v706_v6 = vmax.f32 %v622_v58, %v623_v62  ;;  %v730_v7 = vmax.f32 %v670_v59, %v671_v63  ;;  %v392_v8 = vadd.f32 %v391_v4, %v1617_v57  ;;  %v536_v9 = vadd.f32 %v535_v5, %v1617_v57 }
 0x132   :  { %1268 = vst [vmem:[%s1790_s3 + $0x88] sm:$0xff] %v1220_v61   ;;  %v624_v10 = vmax.f32 %v390_v2, 0.0  ;;  %v672_v11 = vmax.f32 %v534_v3, 0.0 }
 0x133   :  { %v625_v12 = vmax.f32 %v392_v8, 0.0  ;;  %v673_v13 = vmax.f32 %v536_v9, 0.0  ;;  %v395_v14 = vpop.f32.mrb[28].mxu0  ;;  %v539_v15 = vpop.f32.mrb[28].mxu1 }
 0x134   :  { %v396_v16 = vadd.f32 %v395_v14, %v1615_v56  ;;  %v540_v17 = vadd.f32 %v539_v15, %v1615_v56  ;;  %v397_v18 = vpop.f32.mrb[29].mxu0  ;;  %v541_v19 = vpop.f32.mrb[29].mxu1 }
 0x135   :  { %v707_v20 = vmax.f32 %v624_v10, %v625_v12  ;;  %v731_v21 = vmax.f32 %v672_v11, %v673_v13  ;;  %v398_v22 = vadd.f32 %v397_v18, %v1617_v57  ;;  %v542_v23 = vadd.f32 %v541_v19, %v1617_v57 }
 0x136   :  { %v626_v24 = vmax.f32 %v396_v16, 0.0  ;;  %v674_v25 = vmax.f32 %v540_v17, 0.0 }
 0x137   :  { %v1165_v26 = vpack.c.bf16 %v707_v20, %v706_v6  ;;  %v1225_v27 = vpack.c.bf16 %v731_v21, %v730_v7  ;;  %v627_v28 = vmax.f32 %v398_v22, 0.0  ;;  %v675_v29 = vmax.f32 %v542_v23, 0.0  ;;  %v401_v30 = vpop.f32.mrb[30].mxu0  ;;  %v545_v31 = vpop.f32.mrb[30].mxu1 }
 0x138   :  { %v402_v32 = vadd.f32 %v401_v30, %v1615_v56  ;;  %v546_v33 = vadd.f32 %v545_v31, %v1615_v56  ;;  %v403_v34 = vpop.f32.mrb[31].mxu0  ;;  %v547_v35 = vpop.f32.mrb[31].mxu1 }
 0x139   :  { %1257 = vst [vmem:[%s1790_s3 + $0x30] sm:$0xff] %v1165_v26   ;;  %1269 = vst [vmem:[%s1790_s3 + $0x90] sm:$0xff] %v1225_v27   ;;  %v708_v36 = vmax.f32 %v626_v24, %v627_v28  ;;  %v732_v37 = vmax.f32 %v674_v25, %v675_v29  ;;  %v404_v38 = vadd.f32 %v403_v34, %v1617_v57 }
 0x13a   :  { %v548_v39 = vadd.f32 %v547_v35, %v1617_v57  ;;  %v628_v40 = vmax.f32 %v402_v32, 0.0  ;;  %v676_v41 = vmax.f32 %v546_v33, 0.0 }
 0x13b   :  { %v629_v42 = vmax.f32 %v404_v38, 0.0  ;;  %v407_v44 = vpop.f32.mrb[32].mxu0  ;;  %v551_v45 = vpop.f32.mrb[32].mxu1 }
 0x13c   :  { %v677_v43 = vmax.f32 %v548_v39, 0.0  ;;  %v408_v46 = vadd.f32 %v407_v44, %v1615_v56  ;;  %v552_v47 = vadd.f32 %v551_v45, %v1615_v56  ;;  %v409_v48 = vpop.f32.mrb[33].mxu0  ;;  %v553_v49 = vpop.f32.mrb[33].mxu1 }
 0x13d   :  { %v709_v50 = vmax.f32 %v628_v40, %v629_v42  ;;  %v410_v52 = vadd.f32 %v409_v48, %v1617_v57  ;;  %v554_v53 = vadd.f32 %v553_v49, %v1617_v57 }
 0x13e   :  { %v733_v51 = vmax.f32 %v676_v41, %v677_v43  ;;  %v630_v54 = vmax.f32 %v408_v46, 0.0  ;;  %v678_v55 = vmax.f32 %v552_v47, 0.0 }
 0x13f   :  { %v1170_v58 = vpack.c.bf16 %v709_v50, %v708_v36  ;;  %v631_v60 = vmax.f32 %v410_v52, 0.0  ;;  %v679_v61 = vmax.f32 %v554_v53, 0.0  ;;  %v413_v62 = vpop.f32.mrb[34].mxu0  ;;  %v557_v63 = vpop.f32.mrb[34].mxu1 }
 0x140   :  { %v1230_v59 = vpack.c.bf16 %v733_v51, %v732_v37  ;;  %v414_v0 = vadd.f32 %v413_v62, %v1615_v56  ;;  %v558_v1 = vadd.f32 %v557_v63, %v1615_v56  ;;  %v415_v2 = vpop.f32.mrb[35].mxu0  ;;  %v559_v3 = vpop.f32.mrb[35].mxu1 }
 0x141   :  { %1258 = vst [vmem:[%s1790_s3 + $0x38] sm:$0xff] %v1170_v58   ;;  %v710_v4 = vmax.f32 %v630_v54, %v631_v60  ;;  %v734_v5 = vmax.f32 %v678_v55, %v679_v61  ;;  %v416_v6 = vadd.f32 %v415_v2, %v1617_v57  ;;  %v560_v7 = vadd.f32 %v559_v3, %v1617_v57 }
 0x142   :  { %1270 = vst [vmem:[%s1790_s3 + $0x98] sm:$0xff] %v1230_v59   ;;  %v632_v8 = vmax.f32 %v414_v0, 0.0  ;;  %v680_v9 = vmax.f32 %v558_v1, 0.0 }
 0x143   :  { %v633_v10 = vmax.f32 %v416_v6, 0.0  ;;  %v681_v11 = vmax.f32 %v560_v7, 0.0  ;;  %v419_v12 = vpop.f32.mrb[36].mxu0  ;;  %v563_v13 = vpop.f32.mrb[36].mxu1 }
 0x144   :  { %v420_v14 = vadd.f32 %v419_v12, %v1615_v56  ;;  %v564_v15 = vadd.f32 %v563_v13, %v1615_v56  ;;  %v421_v16 = vpop.f32.mrb[37].mxu0  ;;  %v565_v17 = vpop.f32.mrb[37].mxu1 }
 0x145   :  { %v711_v18 = vmax.f32 %v632_v8, %v633_v10  ;;  %v735_v19 = vmax.f32 %v680_v9, %v681_v11  ;;  %v422_v20 = vadd.f32 %v421_v16, %v1617_v57  ;;  %v566_v21 = vadd.f32 %v565_v17, %v1617_v57 }
 0x146   :  { %v634_v22 = vmax.f32 %v420_v14, 0.0  ;;  %v682_v23 = vmax.f32 %v564_v15, 0.0 }
 0x147   :  { %v1175_v24 = vpack.c.bf16 %v711_v18, %v710_v4  ;;  %v1235_v25 = vpack.c.bf16 %v735_v19, %v734_v5  ;;  %v635_v26 = vmax.f32 %v422_v20, 0.0  ;;  %v683_v27 = vmax.f32 %v566_v21, 0.0  ;;  %v425_v28 = vpop.f32.mrb[38].mxu0  ;;  %v569_v29 = vpop.f32.mrb[38].mxu1 }
 0x148   :  { %v426_v30 = vadd.f32 %v425_v28, %v1615_v56  ;;  %v570_v31 = vadd.f32 %v569_v29, %v1615_v56  ;;  %v427_v32 = vpop.f32.mrb[39].mxu0  ;;  %v571_v33 = vpop.f32.mrb[39].mxu1 }
 0x149   :  { %1259 = vst [vmem:[%s1790_s3 + $0x40] sm:$0xff] %v1175_v24   ;;  %1271 = vst [vmem:[%s1790_s3 + $0xa0] sm:$0xff] %v1235_v25   ;;  %v712_v34 = vmax.f32 %v634_v22, %v635_v26  ;;  %v736_v35 = vmax.f32 %v682_v23, %v683_v27  ;;  %v428_v36 = vadd.f32 %v427_v32, %v1617_v57 }
 0x14a   :  { %v572_v37 = vadd.f32 %v571_v33, %v1617_v57  ;;  %v636_v38 = vmax.f32 %v426_v30, 0.0  ;;  %v684_v39 = vmax.f32 %v570_v31, 0.0 }
 0x14b   :  { %v637_v40 = vmax.f32 %v428_v36, 0.0  ;;  %v431_v42 = vpop.f32.mrb[40].mxu0  ;;  %v575_v43 = vpop.f32.mrb[40].mxu1 }
 0x14c   :  { %v685_v41 = vmax.f32 %v572_v37, 0.0  ;;  %v432_v44 = vadd.f32 %v431_v42, %v1615_v56  ;;  %v576_v45 = vadd.f32 %v575_v43, %v1615_v56  ;;  %v433_v46 = vpop.f32.mrb[41].mxu0  ;;  %v577_v47 = vpop.f32.mrb[41].mxu1 }
 0x14d   :  { %v713_v48 = vmax.f32 %v636_v38, %v637_v40  ;;  %v434_v50 = vadd.f32 %v433_v46, %v1617_v57  ;;  %v578_v51 = vadd.f32 %v577_v47, %v1617_v57 }
 0x14e   :  { %v737_v49 = vmax.f32 %v684_v39, %v685_v41  ;;  %v638_v52 = vmax.f32 %v432_v44, 0.0  ;;  %v686_v53 = vmax.f32 %v576_v45, 0.0 }
 0x14f   :  { %v1180_v54 = vpack.c.bf16 %v713_v48, %v712_v34  ;;  %v639_v58 = vmax.f32 %v434_v50, 0.0  ;;  %v687_v59 = vmax.f32 %v578_v51, 0.0  ;;  %v437_v60 = vpop.f32.mrb[42].mxu0  ;;  %v581_v61 = vpop.f32.mrb[42].mxu1 }
 0x150   :  { %v1240_v55 = vpack.c.bf16 %v737_v49, %v736_v35  ;;  %v438_v62 = vadd.f32 %v437_v60, %v1615_v56  ;;  %v582_v63 = vadd.f32 %v581_v61, %v1615_v56  ;;  %v439_v0 = vpop.f32.mrb[43].mxu0  ;;  %v583_v1 = vpop.f32.mrb[43].mxu1 }
 0x151   :  { %1260 = vst [vmem:[%s1790_s3 + $0x48] sm:$0xff] %v1180_v54   ;;  %v714_v2 = vmax.f32 %v638_v52, %v639_v58  ;;  %v738_v3 = vmax.f32 %v686_v53, %v687_v59  ;;  %v440_v4 = vadd.f32 %v439_v0, %v1617_v57  ;;  %v584_v5 = vadd.f32 %v583_v1, %v1617_v57 }
 0x152   :  { %1272 = vst [vmem:[%s1790_s3 + $0xa8] sm:$0xff] %v1240_v55   ;;  %v640_v6 = vmax.f32 %v438_v62, 0.0  ;;  %v688_v7 = vmax.f32 %v582_v63, 0.0 }
 0x153   :  { %v641_v8 = vmax.f32 %v440_v4, 0.0  ;;  %v689_v9 = vmax.f32 %v584_v5, 0.0  ;;  %v443_v10 = vpop.f32.mrb[44].mxu0  ;;  %v587_v11 = vpop.f32.mrb[44].mxu1 }
 0x154   :  { %v444_v12 = vadd.f32 %v443_v10, %v1615_v56  ;;  %v588_v13 = vadd.f32 %v587_v11, %v1615_v56  ;;  %v445_v14 = vpop.f32.mrb[45].mxu0  ;;  %v589_v15 = vpop.f32.mrb[45].mxu1 }
 0x155   :  { %v715_v16 = vmax.f32 %v640_v6, %v641_v8  ;;  %v739_v17 = vmax.f32 %v688_v7, %v689_v9  ;;  %v446_v18 = vadd.f32 %v445_v14, %v1617_v57  ;;  %v590_v19 = vadd.f32 %v589_v15, %v1617_v57 }
 0x156   :  { %v642_v20 = vmax.f32 %v444_v12, 0.0  ;;  %v690_v21 = vmax.f32 %v588_v13, 0.0 }
 0x157   :  { %v1185_v22 = vpack.c.bf16 %v715_v16, %v714_v2  ;;  %v1245_v23 = vpack.c.bf16 %v739_v17, %v738_v3  ;;  %v643_v24 = vmax.f32 %v446_v18, 0.0  ;;  %v691_v25 = vmax.f32 %v590_v19, 0.0  ;;  %v449_v26 = vpop.f32.mrb[46].mxu0  ;;  %v593_v27 = vpop.f32.mrb[46].mxu1 }
 0x158   :  { %v450_v28 = vadd.f32 %v449_v26, %v1615_v56  ;;  %v594_v29 = vadd.f32 %v593_v27, %v1615_v56  ;;  %v451_v30 = vpop.f32.mrb[47].mxu0  ;;  %v595_v31 = vpop.f32.mrb[47].mxu1 }
 0x159   :  { %1261 = vst [vmem:[%s1790_s3 + $0x50] sm:$0xff] %v1185_v22   ;;  %1273 = vst [vmem:[%s1790_s3 + $0xb0] sm:$0xff] %v1245_v23   ;;  %v716_v32 = vmax.f32 %v642_v20, %v643_v24  ;;  %v740_v33 = vmax.f32 %v690_v21, %v691_v25  ;;  %v452_v34 = vadd.f32 %v451_v30, %v1617_v57 }
 0x15a   :  { %v596_v35 = vadd.f32 %v595_v31, %v1617_v57  ;;  %v644_v36 = vmax.f32 %v450_v28, 0.0  ;;  %v692_v37 = vmax.f32 %v594_v29, 0.0 }
 0x15b   :  { %v645_v38 = vmax.f32 %v452_v34, 0.0 }
 0x15c   :  { %v693_v56 = vmax.f32 %v596_v35, 0.0 }
 0x15d   :  { %v717_v39 = vmax.f32 %v644_v36, %v645_v38 }
 0x15e   :  { %v741_v40 = vmax.f32 %v692_v37, %v693_v56 }
 0x15f   :  { %v1190_v41 = vpack.c.bf16 %v717_v39, %v716_v32 }
 0x160   :  { %v1250_v42 = vpack.c.bf16 %v741_v40, %v740_v33 }
 0x161   :  { %1262 = vst [vmem:[%s1790_s3 + $0x58] sm:$0xff] %v1190_v41  }
 0x162   :  { %1274 = vst [vmem:[%s1790_s3 + $0xb8] sm:$0xff] %v1250_v42  }
 0x163   :  { %986 = vsyncpa [#allocation3], 1 }
 0x164   :  { %987 = vsyncpa [#allocation5], 1 }

// kernel: cnn_model_forward.3
= control target key start
LH: loop header
LB: loop body
LE: loop exit
PB: predicated region body
PF: predicated region fallthrough
CT: control target
= control target key end

     0   :  { %s13564_s0 = inlined_call_operand.vmem [shape: bf16[2,24576], index: 0, kind: input, shape index: {}]   ;;  %s13565_s1 = inlined_call_operand.hbm [shape: bf16[24576,256], index: 1, kind: input, shape index: {}]   ;;  %s13566_s2 = inlined_call_operand.hbm [shape: f32[1,256], index: 2, kind: input, shape index: {}]   ;;  %s13567_s3 = inlined_call_operand.vmem [shape: f32[256,10], index: 3, kind: input, shape index: {}]   ;;  %s13568_s4 = inlined_call_operand.vmem [shape: f32[2,2,10], index: 4, kind: output, shape index: {}]  }
   0x1   :  { %13575 = sst [smem:[#allocation11_spill]] %s13565_s1 }
   0x2   :  { %9 = vsyncpa [#allocation4], 0 }
   0x3   :  { %11 = vsyncpa [#allocation4 + $0x1], 0 }
   0x4   :  { %12 = vsyncpa [#allocation6], 0 }
   0x5   :  { %14 = vsyncpa [#allocation6 + $0x1], 0  ;;  %s12308_s15 = smov 0   ;;  %s12310_s16 = smov 0  }
   0x6   :  { %s12312_s17 = smov 0   ;;  %s12314_s18 = smov 0  }
   0x7   :  { %s12316_s19 = smov 0   ;;  %s12318_s20 = smov 0  }
   0x8   :  { %s12320_s21 = smov 0   ;;  %s12322_s22 = smov 0  }
   0x9   :  { %s12324_s23 = smov 0   ;;  %s12326_s24 = smov 0  }
   0xa   :  { %s12328_s25 = smov 0  }
   0xb LB: > { %s29_s26 = sadd.s32 1, %s12263_s23  ;;  %p74_p1 = scmp.ne.s32.totalorder %s12251_s20, %s12247_s19  ;;  %s12271_s25 = sphi %s12328_s25, %s20_s25   ;;  %s12267_s24 = sphi %s12326_s24, %s13604_s24   ;;  %s12263_s23 = sphi %s12324_s23, %s13603_s23   ;;  %s12259_s22 = sphi %s12322_s22, %s13602_s22   ;;  %s12255_s21 = sphi %s12320_s21, %s13601_s21   ;;  %s12251_s20 = sphi %s12318_s20, %s13600_s20   ;;  %s12247_s19 = sphi %s12316_s19, %s13599_s19   ;;  %s12243_s18 = sphi %s12314_s18, %s13598_s18   ;;  %s12239_s17 = sphi %s12312_s17, %s13597_s17   ;;  %s12235_s16 = sphi %s12310_s16, %s13596_s16   ;;  %s12231_s15 = sphi %s12308_s15, %s13595_s15  }
   0xc   : > { %p12365_p0 = scmp.ge.s32.totalorder %s29_s26, 2  ;;  %p13570_p2 = scmp.eq.s32.totalorder %s12271_s25, 0 }
   0xd   : > { %p13569_p4 = scmp.lt.s32.totalorder %s12271_s25, 4  ;;  %s190_s30 = sand.u32 1, %s12251_s20  }
   0xe   : > { %s13606_s26 = smov (%p12365_p0, %s29_s26), 0  ;;  %p76_p3 = por %p13570_p2, %p74_p1 }
   0xf   : > { %13577 = sst [smem:[#allocation9_spill]] %s13606_s26  ;;  %s11227_s5 = smul.u32 6144, %s190_s30 }
  0x10   : > { %s10094_s6 = smul.u32 3072, %s12263_s23  ;;  %p12385_p5 = pnand %p13569_p4, %p76_p3 }
  0x11   : > { %s194_s9 = scalar_lea.vmem [#allocation3], %s11227_s5  ;;  %s13579_s1 = sld [smem:[#allocation11_spill]] }
  0x12   : > { %s200_s8 = sadd.s32 %s12267_s24, %s10094_s6  ;;  %s203_s10 = sshll.u32 %s194_s9, 4  ;;  %s12390_s10 = int_to_ptr.vmem [resolvable:$true] %s203_s10 }
  0x13   : > { %s9315_s11 = sshll.u32 %s200_s8, 6  ;;  %s12397_s27 = scalar_lea.sflag [#allocation4], %s190_s30 }
  0x14   : > { %p12119_p7 = pneg %p12385_p5 }
  0x17   : > { %s12395_s14 = scalar_lea.hbm %s13579_s1, %s9315_s11  ;;  %s12122_s8 = scalar_lea.hbm %s13579_s1, 393216 }
  0x18   : > { %s12117_s29 = scalar_lea.hbm %s12395_s14, 98304  ;;  %p12123_p10 = scmp.lt.u32.totalorder %s12395_s14, %s13579_s1 }
  0x19   : > { %p12118_p6 = scmp.ne.s32.totalorder %s12395_s14, %s12117_s29  ;;  %p12124_p11 = scmp.lt.u32.totalorder %s12122_s8, %s12117_s29 }
  0x1a   : > { %p12126_p13 = scmp.lt.u32.totalorder %s12117_s29, %s12395_s14 }
  0x1b   : > { %p12120_p8 = pnand %p12119_p7, %p12118_p6  ;;  %p12125_p12 = por %p12124_p11, %p12123_p10 }
  0x1d   : > { %p12121_p9 = pneg %p12120_p8  ;;  %p12127_p1 = por %p12126_p13, %p12125_p12 }
  0x1f   : > { %p12128_p3 = pnand %p12127_p1, %p12121_p9 }
  0x21   : > { %12131 = shalt.err (!%p12128_p3)
}
  0x22   : > { %s12132_s30 = scalar_lea.vmem %s12390_s10, 98304  ;;  %s12273_s12 = smov [#allocation3]  }
  0x23   : > { %p12133_p6 = scmp.ne.s32.totalorder %s12390_s10, %s12132_s30  ;;  %s12137_s13 = sshll.u32 %s12273_s12, 4  ;;  %s12138_s13 = int_to_ptr.vmem [resolvable:$false] %s12137_s13 }
  0x24   : > { %s12139_s5 = scalar_lea.vmem %s12138_s13, 196608  ;;  %p12140_p2 = scmp.lt.s32.totalorder %s12390_s10, %s12138_s13 }
  0x25   : > { %p12135_p8 = pnand %p12133_p6, %p12119_p7  ;;  %p12141_p10 = scmp.lt.s32.totalorder %s12139_s5, %s12132_s30 }
  0x27   : > { %p12136_p4 = pneg %p12135_p8  ;;  %p12142_p11 = por %p12141_p10, %p12140_p2 }
  0x29   : > { %p12143_p12 = pnand %p12142_p11, %p12136_p4 }
  0x2b   : > { %12146 = shalt.err (!%p12143_p12)
}
  0x2c   : > { %s12274_s29 = smov 128   ;;  %s12275_s6 = smov 64  }
  0x2d   : > { %s12276_s8 = smov 4   ;;  %p9317_p2 = scmp.ge.s32.totalorder %s12271_s25, 1 }
  0x2e   : > { %11236 = dma.hbm_to_vmem [thread:$0]  (!%p12385_p5), %s12395_s14, 98304, %s12390_s10, %s12397_s27, %s12274_s29, %s12275_s6, %s12276_s8  }
  0x2f   : > { %p237_p4 = scmp.lt.s32.totalorder %s12271_s25, 5  ;;  %s9310_s11 = sadd.s32 4294967295, %s12271_s25  }
  0x30   : > { %s32_s30 = sadd.s32 1, %s12267_s24  ;;  %p80_p9 = scmp.ne.s32.totalorder %s12247_s19, %s12243_s18 }
  0x31   : > { %p12427_p7 = pnand %p9317_p2, %p237_p4  ;;  %s13608_s30 = smov (!%p12365_p0, %s32_s30), %s12267_s24 }
  0x32   : > { %p81_p13 = scmp.eq.s32.totalorder %s9310_s11, 0  ;;  %s93_s27 = sadd.s32 1, %s12239_s17 }
  0x33   : > { %p34_p5 = scmp.ge.s32.totalorder %s13608_s30, 2  ;;  %p100_p1 = scmp.ne.s32.totalorder %s12239_s17, %s12235_s16 }
  0x34   : > { %p12441_p3 = por %p81_p13, %p80_p9  ;;  %p106_p6 = scmp.ne.s32.totalorder %s12235_s16, %s12231_s15 }
  0x35   : > { %s13610_s30 = smov (%p34_p5, %s13608_s30), 0  ;;  %p13583_p8 = scmp.eq.s32.totalorder %s12271_s25, 0 }
  0x36   : > { %s13581_s7 = scalar_select %p12441_p3, 1, 0 }
  0x37   : > { %13582 = sst [smem:[#allocation10_spill]] %s13610_s30  ;;  %p12451_p10 = por %p100_p1, %p13583_p8 }
  0x38   : > { %p12455_p0 = por %p106_p6, %p81_p13  ;;  %s63_s10 = ssub.s32 %s12267_s24, %s13610_s30 }
  0x39   : > { %s213_s14 = sand.u32 1, %s12239_s17   ;;  %s13586_s12 = ssub.s32 %s12263_s23, %s13606_s26 }
  0x3a   : > { %s13585_s28 = scalar_select %p12455_p0, 1, 0 }
  0x3b   : > { %s64_s13 = sor.u32 %s63_s10, %s13586_s12  ;;  %p91_p11 = scmp.eq.s32.totalorder %s63_s10, 0 }
  0x3c   : > { %p65_p12 = scmp.eq.s32.totalorder %s64_s13, 0  ;;  %s13587_s5 = sadd.s32 1, %s12251_s20 }
  0x3d   : > { %s12466_s15 = scalar_select %p91_p11, %s12239_s17, %s93_s27  }
  0x3e   : > { %s12471_s29 = scalar_select %p65_p12, %s12251_s20, %s13587_s5  }
  0x3f   : > { %s9316_s6 = sshll.u32 %s12267_s24, 4  ;;  %s216_s30 = scalar_lea.vmem [#allocation5], %s213_s14 }
  0x40   : > { %s12477_s1 = scalar_lea.hbm %s13566_s2, %s9316_s6  ;;  %s223_s26 = sshll.u32 %s216_s30, 4  ;;  %s12479_s26 = int_to_ptr.vmem [resolvable:$true] %s223_s26 }
  0x41   : > { %p13588_p2 = scmp.lt.s32.totalorder %s12271_s25, 4  ;;  %s214_s10 = scalar_lea.sflag [#allocation6], %s213_s14 }
  0x42   : > { %s12147_s12 = scalar_lea.hbm %s12477_s1, 16  ;;  %s12152_s18 = scalar_lea.hbm %s13566_s2, 32 }
  0x43   : > { %p12485_p4 = pnand %p13588_p2, %p12451_p10  ;;  %p12148_p9 = scmp.ne.s32.totalorder %s12477_s1, %s12147_s12 }
  0x44   : > { %p12153_p6 = scmp.lt.u32.totalorder %s12477_s1, %s13566_s2  ;;  %p12154_p8 = scmp.lt.u32.totalorder %s12152_s18, %s12147_s12 }
  0x45   : > { %p12149_p13 = pneg %p12485_p4  ;;  %p12156_p11 = scmp.lt.u32.totalorder %s12147_s12, %s12477_s1 }
  0x46   : > { %p12155_p10 = por %p12154_p8, %p12153_p6 }
  0x47   : > { %p12150_p5 = pnand %p12149_p13, %p12148_p9 }
  0x48   : > { %p12157_p12 = por %p12156_p11, %p12155_p10 }
  0x49   : > { %p12151_p1 = pneg %p12150_p5 }
  0x4b   : > { %p12158_p2 = pnand %p12157_p12, %p12151_p1 }
  0x4d   : > { %12161 = shalt.err (!%p12158_p2)
}
  0x4e   : > { %s12162_s14 = scalar_lea.vmem %s12479_s26, 16  ;;  %s12277_s8 = smov [#allocation5]  }
  0x4f   : > { %p12163_p9 = scmp.ne.s32.totalorder %s12479_s26, %s12162_s14  ;;  %s12167_s11 = sshll.u32 %s12277_s8, 4  ;;  %s12168_s11 = int_to_ptr.vmem [resolvable:$false] %s12167_s11 }
  0x50   : > { %s12169_s30 = scalar_lea.vmem %s12168_s11, 32  ;;  %p12170_p3 = scmp.lt.s32.totalorder %s12479_s26, %s12168_s11 }
  0x51   : > { %p12165_p5 = pnand %p12163_p9, %p12149_p13  ;;  %p12171_p6 = scmp.lt.s32.totalorder %s12169_s30, %s12162_s14 }
  0x53   : > { %p12166_p0 = pneg %p12165_p5  ;;  %p12172_p8 = por %p12171_p6, %p12170_p3 }
  0x55   : > { %p12173_p10 = pnand %p12172_p8, %p12166_p0 }
  0x57   : > { %12176 = shalt.err (!%p12173_p10)
}
  0x58   : > { %11239 = dma.hbm_to_vmem [thread:$0]  (!%p12485_p4), %s12477_s1, 16, %s12479_s26, %s214_s10  }
  0x59   : > { %241 = sbr.rel (%p12427_p7) target bundleno = 1329 (0x531), region = 36  ;;  %s243_s12 = sand.u32 (!%p12427_p7), 1, %s12247_s19  }
  0x5a   : > { %s11228_s13 = smul.u32 (!%p12427_p7), 6144, %s243_s12  ;;  %s244_s18 = scalar_lea.sflag (!%p12427_p7), [#allocation4], %s243_s12 }
  0x5b   : > { %p13590_p13 = scmp.ne.s32.totalorder (!%p12427_p7), %s13581_s7, 0 }
  0x5c   : > { %s12517_s5 = scalar_lea.vmem (!%p12427_p7), [#allocation3], %s11228_s13 }
  0x60   : > { %12222 = dma.done.wait (%p13590_p13), %s244_s18, 98304  }
  0x61   : > { %12224 = vsyncadd (%p13590_p13), %s244_s18, 4294868992  ;;  %s252_s27 = sand.u32 1, %s12235_s16   ;;  %p13591_p3 = scmp.ne.s32.totalorder %s13585_s28, 0 }
  0x62   : > { %s253_s6 = scalar_lea.sflag [#allocation6], %s252_s27  ;;  %s12524_s1 = scalar_lea.vmem [#allocation5], %s252_s27 }
  0x63   : > { %12226 = dma.done.wait (%p13591_p3), %s253_s6, 16  }
  0x64   : > { %12228 = vsyncadd (%p13591_p3), %s253_s6, 4294967280  ;;  %s292_s26 = smul.u32 96, %s12255_s21  ;;  %s9318_s9 = sshll.u32 %s12259_s22, 4 }
  0x65   : > { %p299_p7 = scmp.lt.s32.totalorder %s9318_s9, 31  ;;  %p304_p4 = scmp.lt.s32.totalorder %s12259_s22, 1 }
  0x66   : > { %p293_p0 = scmp.lt.s32.totalorder %s292_s26, 191  ;;  %p9321_p1 = scmp.ne.s32.totalorder %s12255_s21, 0 }
  0x67   : > { %s13612_s9 = smov (!%p299_p7, %s9318_s9), 31  ;;  %s13616_s22 = smov (!%p304_p4, %s12259_s22), 1 }
  0x68   : > { %s13614_s26 = smov (!%p293_p0, %s292_s26), 191  ;;  %s9319_s7 = sshll.u32 %s13612_s9, 3  ;;  %v12278_v0 = vmov (!%p9321_p1), 0.0  }
  0x69   : > { %s12536_s8 = scalar_lea.vmem %s13564_s0, %s13614_s26  ;;  %s12541_s30 = scalar_lea.vmem %s13567_s3, %s9319_s7  ;;  %313 = vst [vmem:[#allocation2] sm:$0x3] (!%p9321_p1), %v12278_v0 }
  0x6a   : > { %s9320_s12 = sshll.u32 %s13616_s22, 1  ;;  %312 = sbr.rel (%p9321_p1) target bundleno = 113 (0x71), region = 48 }
  0x6b   : > { %s12547_s27 = scalar_lea.vmem %s13568_s4, %s9320_s12 }
  0x71 PF: > { %v11337_v1 = vld [vmem:[%s12517_s5 + $0x40] sm:$0xff]   ;;  %v11341_v5 = vld [vmem:[%s12517_s5 + $0x48] sm:$0xff]   ;;  %v11345_v9 = vld [vmem:[%s12517_s5 + $0x50] sm:$0xff]   ;;  %v1879_v29 = vlaneseq  ;;  %v12279_v37 = vmov 1966171168   ;;  %p10090_p11 = scmp.ne.s32.totalorder %s12255_s21, 1 }
  0x72   : > { %v11338_v2 = vld [vmem:[%s12517_s5 + $0xc0] sm:$0xff]   ;;  %10095 = vmatprep.subr.bf16.mxu0 %v11337_v1  ;;  %v11342_v6 = vld [vmem:[%s12517_s5 + $0xc8] sm:$0xff]   ;;  %v11346_v10 = vld [vmem:[%s12517_s5 + $0xd0] sm:$0xff]   ;;  %v1877_v38 = vunpack.c.l.s4 %v12279_v37  ;;  %vm12281_vm0 = vmmov (!%p10090_p11), 0   ;;  %vm9189_vm1 = vcmask (!%p10090_p11), 74752  }
  0x73   : > { %v11339_v3 = vld [vmem:[%s12517_s5] sm:$0xff]   ;;  %10117 = vmatprep.subr.bf16.mxu1 %v11338_v2  ;;  %v11343_v7 = vld [vmem:[%s12517_s5 + $0x8] sm:$0xff]   ;;  %v11347_v11 = vld [vmem:[%s12517_s5 + $0x10] sm:$0xff]   ;;  %v1880_v34 = vshrl.u32 %v1879_v29, 7 }
  0x74   : > { %v11340_v4 = vld [vmem:[%s12517_s5 + $0x80] sm:$0xff]   ;;  %10096 = vmatpush3.bf16.msra.mxu0 %v11339_v3  ;;  %v11344_v8 = vld [vmem:[%s12517_s5 + $0x88] sm:$0xff]   ;;  %v11348_v12 = vld [vmem:[%s12517_s5 + $0x90] sm:$0xff]   ;;  %v1878_v41 = vunpack.c.0.s8 %v1877_v38 }
  0x75   : > { %10118 = vmatpush3.bf16.msra.mxu1 %v11340_v4  ;;  %10097 = vmatprep.subr.bf16.mxu0 %v11341_v5  ;;  %v11349_v13 = vld [vmem:[%s12517_s5 + $0x58] sm:$0xff]   ;;  %v11353_v17 = vld [vmem:[%s12517_s5 + $0x60] sm:$0xff]   ;;  %v11357_v21 = vld [vmem:[%s12517_s5 + $0x68] sm:$0xff]  }
  0x76   : > { %10119 = vmatprep.subr.bf16.mxu1 %v11342_v6  ;;  %v11350_v14 = vld [vmem:[%s12517_s5 + $0xd8] sm:$0xff]   ;;  %v11354_v18 = vld [vmem:[%s12517_s5 + $0xe0] sm:$0xff]   ;;  %v11358_v22 = vld [vmem:[%s12517_s5 + $0xe8] sm:$0xff]   ;;  %v12585_v42 = vsub.s32 %v1878_v41, %v1880_v34 }
  0x77   : > { %v11351_v15 = vld [vmem:[%s12517_s5 + $0x18] sm:$0xff]   ;;  %v11355_v19 = vld [vmem:[%s12517_s5 + $0x20] sm:$0xff]   ;;  %v11359_v23 = vld [vmem:[%s12517_s5 + $0x28] sm:$0xff]  }
  0x78   : > { %10098 = vmatpush3.bf16.msra.mxu0 %v11343_v7  ;;  %v11352_v16 = vld [vmem:[%s12517_s5 + $0x98] sm:$0xff]   ;;  %v11356_v20 = vld [vmem:[%s12517_s5 + $0xa0] sm:$0xff]   ;;  %v11360_v24 = vld [vmem:[%s12517_s5 + $0xa8] sm:$0xff]  }
  0x79   : > { %10120 = vmatpush3.bf16.msra.mxu1 %v11344_v8  ;;  %10099 = vmatprep.subr.bf16.mxu0 %v11345_v9  ;;  %v11361_v25 = vld [vmem:[%s12517_s5 + $0x70] sm:$0xff]   ;;  %v11365_v30 = vld [vmem:[%s12517_s5 + $0x78] sm:$0xff]   ;;  %v11370_v36 = vld [vmem:[%s12517_s5 + $0x140] sm:$0xff]  }
  0x7a   : > { %10121 = vmatprep.subr.bf16.mxu1 %v11346_v10  ;;  %v11362_v26 = vld [vmem:[%s12517_s5 + $0xf0] sm:$0xff]   ;;  %v11366_v31 = vld [vmem:[%s12517_s5 + $0xf8] sm:$0xff]   ;;  %v11371_v39 = vld [vmem:[%s12517_s5 + $0x1c0] sm:$0xff]  }
  0x7b   : > { %v11363_v27 = vld [vmem:[%s12517_s5 + $0x30] sm:$0xff]   ;;  %v11367_v32 = vld [vmem:[%s12517_s5 + $0x38] sm:$0xff]   ;;  %v11372_v48 = vld [vmem:[%s12517_s5 + $0x100] sm:$0xff]  }
  0x7c   : > { %10100 = vmatpush3.bf16.msra.mxu0 %v11347_v11  ;;  %v11364_v28 = vld [vmem:[%s12517_s5 + $0xb0] sm:$0xff]   ;;  %v11368_v33 = vld [vmem:[%s12517_s5 + $0xb8] sm:$0xff]   ;;  %v11373_v50 = vld [vmem:[%s12517_s5 + $0x180] sm:$0xff]  }
  0x7d   : > { %10122 = vmatpush3.bf16.msra.mxu1 %v11348_v12  ;;  %10101 = vmatprep.subr.bf16.mxu0 %v11349_v13  ;;  %v315_v35 = vld [vmem:[%s12536_s8] sm:$0xff]  ;;  %v11374_v53 = vld [vmem:[%s12517_s5 + $0x148] sm:$0xff]   ;;  %v11378_v59 = vld [vmem:[%s12517_s5 + $0x150] sm:$0xff]  }
  0x7e   : > { %10123 = vmatprep.subr.bf16.mxu1 %v11350_v14  ;;  %v1875_v40 = vcombine.high %v315_v35, %v315_v35  ;;  %v1882_v43 = vrot.slane %v315_v35, %v12585_v42  ;;  %v11375_v55 = vld [vmem:[%s12517_s5 + $0x1c8] sm:$0xff]   ;;  %v11379_v60 = vld [vmem:[%s12517_s5 + $0x1d0] sm:$0xff]   ;;  %v11382_v63 = vld [vmem:[%s12517_s5 + $0x158] sm:$0xff]  }
  0x7f   : > { %v11376_v56 = vld [vmem:[%s12517_s5 + $0x108] sm:$0xff]   ;;  %v11380_v61 = vld [vmem:[%s12517_s5 + $0x110] sm:$0xff]   ;;  %v11383_v0 = vld [vmem:[%s12517_s5 + $0x1d8] sm:$0xff]  }
  0x80   : > { %10102 = vmatpush3.bf16.msra.mxu0 %v11351_v15  ;;  %v12589_v44 = vrot.slane %v1875_v40, %v12585_v42  ;;  %v1890_v45 = vcombine.high %v1882_v43, %v1882_v43  ;;  %v1898_v46 = vrot.slane %v1882_v43, %v12585_v42  ;;  %v11377_v58 = vld [vmem:[%s12517_s5 + $0x188] sm:$0xff]   ;;  %v11381_v62 = vld [vmem:[%s12517_s5 + $0x190] sm:$0xff]   ;;  %v11384_v1 = vld [vmem:[%s12517_s5 + $0x118] sm:$0xff]  }
  0x81   : > { %10124 = vmatpush3.bf16.msra.mxu1 %v11352_v16  ;;  %10103 = vmatprep.subr.bf16.mxu0 %v11353_v17  ;;  %v11385_v2 = vld [vmem:[%s12517_s5 + $0x198] sm:$0xff]   ;;  %v11386_v3 = vld [vmem:[%s12517_s5 + $0x160] sm:$0xff]   ;;  %v11390_v7 = vld [vmem:[%s12517_s5 + $0x168] sm:$0xff]  }
  0x82   : > { %10125 = vmatprep.subr.bf16.mxu1 %v11354_v18  ;;  %v1891_v47 = vcombine.high %v12589_v44, %v12589_v44  ;;  %v1912_v49 = vrot.slane %v1890_v45, %v12585_v42  ;;  %v1920_v52 = vcombine.high %v1898_v46, %v1898_v46  ;;  %v11387_v4 = vld [vmem:[%s12517_s5 + $0x1e0] sm:$0xff]   ;;  %v11391_v8 = vld [vmem:[%s12517_s5 + $0x1e8] sm:$0xff]   ;;  %v11394_v11 = vld [vmem:[%s12517_s5 + $0x170] sm:$0xff]  }
  0x83   : > { %v11388_v5 = vld [vmem:[%s12517_s5 + $0x120] sm:$0xff]   ;;  %v11392_v9 = vld [vmem:[%s12517_s5 + $0x128] sm:$0xff]   ;;  %v11395_v12 = vld [vmem:[%s12517_s5 + $0x1f0] sm:$0xff]  }
  0x84   : > { %10104 = vmatpush3.bf16.msra.mxu0 %v11355_v19  ;;  %v1919_v51 = vrot.slane %v1891_v47, %v12585_v42  ;;  %7199 = vmatprep.mubr.bf16.mxu0 %v1912_v49  ;;  %v1922_v54 = vcombine.high %v1912_v49, %v1912_v49  ;;  %v11389_v6 = vld [vmem:[%s12517_s5 + $0x1a0] sm:$0xff]   ;;  %v11393_v10 = vld [vmem:[%s12517_s5 + $0x1a8] sm:$0xff]   ;;  %v11396_v13 = vld [vmem:[%s12517_s5 + $0x130] sm:$0xff]   ;;  %v1905_v19 = vrot.slane %v12589_v44, %v12585_v42 }
  0x85   : > { %10126 = vmatpush3.bf16.msra.mxu1 %v11356_v20  ;;  %10105 = vmatprep.subr.bf16.mxu0 %v11357_v21  ;;  %v11397_v14 = vld [vmem:[%s12517_s5 + $0x1b0] sm:$0xff]   ;;  %v11398_v15 = vld [vmem:[%s12517_s5 + $0x178] sm:$0xff]   ;;  %v11402_v20 = vld [vmem:[%s12517_s5 + $0x240] sm:$0xff]  }
  0x86   : > { %10127 = vmatprep.subr.bf16.mxu1 %v11358_v22  ;;  %v1923_v57 = vcombine.high %v1919_v51, %v1919_v51  ;;  %7239 = vmatprep.mubr.bf16.mxu1 %v1922_v54  ;;  %v11399_v16 = vld [vmem:[%s12517_s5 + $0x1f8] sm:$0xff]   ;;  %v11403_v21 = vld [vmem:[%s12517_s5 + $0x2c0] sm:$0xff]   ;;  %v11410_v29 = vld [vmem:[%s12517_s5 + $0x250] sm:$0xff]  }
  0x87   : > { %v11400_v17 = vld [vmem:[%s12517_s5 + $0x138] sm:$0xff]   ;;  %v11404_v22 = vld [vmem:[%s12517_s5 + $0x200] sm:$0xff]   ;;  %v11422_v41 = vld [vmem:[%s12517_s5 + $0x268] sm:$0xff]  }
  0x88   : > { %10106 = vmatpush3.bf16.msra.mxu0 %v11359_v23  ;;  %v11401_v18 = vld [vmem:[%s12517_s5 + $0x1b8] sm:$0xff]   ;;  %v11405_v23 = vld [vmem:[%s12517_s5 + $0x280] sm:$0xff]   ;;  %v11423_v43 = vld [vmem:[%s12517_s5 + $0x2e8] sm:$0xff]  }
  0x89   : > { %10128 = vmatpush3.bf16.msra.mxu1 %v11360_v24  ;;  %10107 = vmatprep.subr.bf16.mxu0 %v11361_v25  ;;  %v1921_v24 = vcombine.high %v1905_v19, %v1905_v19  ;;  %v11406_v25 = vld [vmem:[%s12517_s5 + $0x248] sm:$0xff]   ;;  %v11415_v34 = vld [vmem:[%s12517_s5 + $0x2d8] sm:$0xff]   ;;  %v11418_v37 = vld [vmem:[%s12517_s5 + $0x260] sm:$0xff]  }
  0x8a   : > { %10129 = vmatprep.subr.bf16.mxu1 %v11362_v26  ;;  %v11407_v26 = vld [vmem:[%s12517_s5 + $0x2c8] sm:$0xff]   ;;  %v11416_v35 = vld [vmem:[%s12517_s5 + $0x218] sm:$0xff]   ;;  %v11419_v38 = vld [vmem:[%s12517_s5 + $0x2e0] sm:$0xff]  }
  0x8b   : > { %v11421_v40 = vld [vmem:[%s12517_s5 + $0x2a0] sm:$0xff]   ;;  %v11424_v44 = vld [vmem:[%s12517_s5 + $0x228] sm:$0xff]  }
  0x8c   : > { %10108 = vmatpush3.bf16.msra.mxu0 %v11363_v27  ;;  %v11408_v27 = vld [vmem:[%s12517_s5 + $0x208] sm:$0xff]  }
  0x8d   : > { %10130 = vmatpush3.bf16.msra.mxu1 %v11364_v28  ;;  %10109 = vmatprep.subr.bf16.mxu0 %v11365_v30  ;;  %v11409_v28 = vld [vmem:[%s12517_s5 + $0x288] sm:$0xff]   ;;  %v11411_v30 = vld [vmem:[%s12517_s5 + $0x2d0] sm:$0xff]  }
  0x8e   : > { %10131 = vmatprep.subr.bf16.mxu1 %v11366_v31  ;;  %v11412_v31 = vld [vmem:[%s12517_s5 + $0x210] sm:$0xff]   ;;  %v11425_v45 = vld [vmem:[%s12517_s5 + $0x2a8] sm:$0xff]  }
  0x8f   : > { %v316_v47 = vld [vmem:[%s12536_s8 + $0x8] sm:$0xff] }
  0x90   : > { %10110 = vmatpush3.bf16.msra.mxu0 %v11367_v32  ;;  %v11413_v32 = vld [vmem:[%s12517_s5 + $0x290] sm:$0xff]   ;;  %v1931_v49 = vrot.slane %v316_v47, %v12585_v42 }
  0x91   : > { %10132 = vmatpush3.bf16.msra.mxu1 %v11368_v33  ;;  %10139 = vmatprep.subr.bf16.mxu0 %v11370_v36  ;;  %v11414_v33 = vld [vmem:[%s12517_s5 + $0x258] sm:$0xff]  }
  0x92   : > { %10161 = vmatprep.subr.bf16.mxu1 %v11371_v39  ;;  %v11417_v36 = vld [vmem:[%s12517_s5 + $0x298] sm:$0xff]   ;;  %v11420_v39 = vld [vmem:[%s12517_s5 + $0x220] sm:$0xff]  }
  0x93   : > { %7200 = vmatmul.mubr.bf16.vlgmr.msra.gmra.mrb[0].mxu0 %v1898_v46  ;;  %v11426_v46 = vld [vmem:[%s12517_s5 + $0x270] sm:$0xff]  }
  0x94   : > { %10140 = vmatpush3.bf16.msra.mxu0 %v11372_v48  ;;  %7240 = vmatmul.mubr.bf16.vlgmr.msra.gmra.mrb[0].mxu1 %v1920_v52  ;;  %v11427_v48 = vld [vmem:[%s12517_s5 + $0x2f0] sm:$0xff]  }
  0x95   : > { %10141 = vmatprep.subr.bf16.mxu0 %v11374_v53  ;;  %10162 = vmatpush3.bf16.msra.mxu1 %v11373_v50  ;;  %v1924_v50 = vcombine.high %v316_v47, %v316_v47  ;;  %v11429_v52 = vld [vmem:[%s12517_s5 + $0x2b0] sm:$0xff]   ;;  %v1939_v53 = vcombine.high %v1931_v49, %v1931_v49 }
  0x96   : > { %7279 = vmatprep.mubr.bf16.mxu0 %v1919_v51  ;;  %10163 = vmatprep.subr.bf16.mxu1 %v11375_v55  ;;  %v11428_v51 = vld [vmem:[%s12517_s5 + $0x230] sm:$0xff]   ;;  %v11430_v55 = vld [vmem:[%s12517_s5 + $0x278] sm:$0xff]  }
  0x97   : > { %7319 = vmatprep.mubr.bf16.mxu1 %v1923_v57  ;;  %v12659_v54 = vrot.slane %v1924_v50, %v12585_v42  ;;  %v1961_v57 = vrot.slane %v1939_v53, %v12585_v42  ;;  %v11477_v47 = vld [vmem:[%s12517_s5 + $0x410] sm:$0xff]   ;;  %v11480_v50 = vld [vmem:[%s12517_s5 + $0x4d8] sm:$0xff]   ;;  %v11483_v53 = vld [vmem:[%s12517_s5 + $0x460] sm:$0xff]  }
  0x98   : > { %10142 = vmatpush3.bf16.msra.mxu0 %v11376_v56  ;;  %v11431_v56 = vld [vmem:[%s12517_s5 + $0x2f8] sm:$0xff]  }
  0x99   : > { %10143 = vmatprep.subr.bf16.mxu0 %v11378_v59  ;;  %10164 = vmatpush3.bf16.msra.mxu1 %v11377_v58  ;;  %v1940_v58 = vcombine.high %v12659_v54, %v12659_v54  ;;  %v11432_v59 = vld [vmem:[%s12517_s5 + $0x238] sm:$0xff]  }
  0x9a   : > { %10165 = vmatprep.subr.bf16.mxu1 %v11379_v60  ;;  %v11433_v60 = vld [vmem:[%s12517_s5 + $0x2b8] sm:$0xff]  }
  0x9c   : > { %10144 = vmatpush3.bf16.msra.mxu0 %v11380_v61  ;;  %v1971_v61 = vcombine.high %v1961_v57, %v1961_v57 }
  0x9d   : > { %10145 = vmatprep.subr.bf16.mxu0 %v11382_v63  ;;  %10166 = vmatpush3.bf16.msra.mxu1 %v11381_v62  ;;  %v1947_v62 = vrot.slane %v1931_v49, %v12585_v42  ;;  %v11434_v63 = vld [vmem:[%s12517_s5 + $0x340] sm:$0xff]   ;;  %v11479_v49 = vld [vmem:[%s12517_s5 + $0x458] sm:$0xff]  }
  0x9e   : > { %10167 = vmatprep.subr.bf16.mxu1 %v11383_v0  ;;  %v11435_v0 = vld [vmem:[%s12517_s5 + $0x3c0] sm:$0xff]  }
  0xa0   : > { %10146 = vmatpush3.bf16.msra.mxu0 %v11384_v1  ;;  %v1968_v1 = vrot.slane %v1940_v58, %v12585_v42  ;;  %v11488_v58 = vld [vmem:[%s12517_s5 + $0x4e8] sm:$0xff]  }
  0xa1   : > { %10147 = vmatprep.subr.bf16.mxu0 %v11386_v3  ;;  %10168 = vmatpush3.bf16.msra.mxu1 %v11385_v2  ;;  %v11436_v2 = vld [vmem:[%s12517_s5 + $0x300] sm:$0xff]  }
  0xa2   : > { %10169 = vmatprep.subr.bf16.mxu1 %v11387_v4  ;;  %v11437_v3 = vld [vmem:[%s12517_s5 + $0x380] sm:$0xff]   ;;  %v1969_v4 = vcombine.high %v1947_v62, %v1947_v62 }
  0xa4   : > { %10148 = vmatpush3.bf16.msra.mxu0 %v11388_v5  ;;  %v11438_v5 = vld [vmem:[%s12517_s5 + $0x348] sm:$0xff]  }
  0xa5   : > { %10149 = vmatprep.subr.bf16.mxu0 %v11390_v7  ;;  %10170 = vmatpush3.bf16.msra.mxu1 %v11389_v6  ;;  %v11439_v6 = vld [vmem:[%s12517_s5 + $0x3c8] sm:$0xff]   ;;  %v1972_v7 = vcombine.high %v1968_v1, %v1968_v1 }
  0xa6   : > { %10171 = vmatprep.subr.bf16.mxu1 %v11391_v8  ;;  %v11440_v8 = vld [vmem:[%s12517_s5 + $0x308] sm:$0xff]  }
  0xa8   : > { %10150 = vmatpush3.bf16.msra.mxu0 %v11392_v9  ;;  %v11441_v9 = vld [vmem:[%s12517_s5 + $0x388] sm:$0xff]  }
  0xa9   : > { %10151 = vmatprep.subr.bf16.mxu0 %v11394_v11  ;;  %10172 = vmatpush3.bf16.msra.mxu1 %v11393_v10  ;;  %v11442_v10 = vld [vmem:[%s12517_s5 + $0x350] sm:$0xff]  }
  0xaa   : > { %10173 = vmatprep.subr.bf16.mxu1 %v11395_v12  ;;  %v11443_v11 = vld [vmem:[%s12517_s5 + $0x3d0] sm:$0xff]  }
  0xab   : > { %v11444_v12 = vld [vmem:[%s12517_s5 + $0x310] sm:$0xff]  }
  0xac   : > { %10152 = vmatpush3.bf16.msra.mxu0 %v11396_v13  ;;  %v11445_v13 = vld [vmem:[%s12517_s5 + $0x390] sm:$0xff]  }
  0xad   : > { %10153 = vmatprep.subr.bf16.mxu0 %v11398_v15  ;;  %10174 = vmatpush3.bf16.msra.mxu1 %v11397_v14  ;;  %v11446_v14 = vld [vmem:[%s12517_s5 + $0x358] sm:$0xff]  }
  0xae   : > { %10175 = vmatprep.subr.bf16.mxu1 %v11399_v16  ;;  %v11447_v15 = vld [vmem:[%s12517_s5 + $0x3d8] sm:$0xff]  }
  0xaf   : > { %v11448_v16 = vld [vmem:[%s12517_s5 + $0x318] sm:$0xff]  }
  0xb0   : > { %10154 = vmatpush3.bf16.msra.mxu0 %v11400_v17  ;;  %v11449_v17 = vld [vmem:[%s12517_s5 + $0x398] sm:$0xff]  }
  0xb1   : > { %10183 = vmatprep.subr.bf16.mxu0 %v11402_v20  ;;  %10176 = vmatpush3.bf16.msra.mxu1 %v11401_v18  ;;  %v11450_v18 = vld [vmem:[%s12517_s5 + $0x360] sm:$0xff]  }
  0xb2   : > { %10205 = vmatprep.subr.bf16.mxu1 %v11403_v21  ;;  %v11452_v20 = vld [vmem:[%s12517_s5 + $0x320] sm:$0xff]  }
  0xb3   : > { %7280 = vmatmul.mubr.bf16.vlgmr.msra.gmra.mrb[4].mxu0 %v1905_v19  ;;  %v11451_v19 = vld [vmem:[%s12517_s5 + $0x3e0] sm:$0xff]  }
  0xb4   : > { %10184 = vmatpush3.bf16.msra.mxu0 %v11404_v22  ;;  %7320 = vmatmul.mubr.bf16.vlgmr.msra.gmra.mrb[4].mxu1 %v1921_v24  ;;  %v11453_v21 = vld [vmem:[%s12517_s5 + $0x3a0] sm:$0xff]   ;;  %v11454_v22 = vld [vmem:[%s12517_s5 + $0x368] sm:$0xff]  }
  0xb5   : > { %10185 = vmatprep.subr.bf16.mxu0 %v11406_v25  ;;  %10206 = vmatpush3.bf16.msra.mxu1 %v11405_v23  ;;  %v11455_v23 = vld [vmem:[%s12517_s5 + $0x3e8] sm:$0xff]  }
  0xb6   : > { %10207 = vmatprep.subr.bf16.mxu1 %v11407_v26  ;;  %7359 = vmatprep.mubr.bf16.mxu0 %v1961_v57  ;;  %v11456_v24 = vld [vmem:[%s12517_s5 + $0x328] sm:$0xff]   ;;  %v11458_v26 = vld [vmem:[%s12517_s5 + $0x370] sm:$0xff]  }
  0xb7   : > { %7399 = vmatprep.mubr.bf16.mxu1 %v1971_v61  ;;  %v11457_v25 = vld [vmem:[%s12517_s5 + $0x3a8] sm:$0xff]   ;;  %v11491_v61 = vld [vmem:[%s12517_s5 + $0x470] sm:$0xff]  }
  0xb8   : > { %10186 = vmatpush3.bf16.msra.mxu0 %v11408_v27  ;;  %v11459_v27 = vld [vmem:[%s12517_s5 + $0x3f0] sm:$0xff]   ;;  %v11487_v57 = vld [vmem:[%s12517_s5 + $0x468] sm:$0xff]  }
  0xb9   : > { %10187 = vmatprep.subr.bf16.mxu0 %v11410_v29  ;;  %10208 = vmatpush3.bf16.msra.mxu1 %v11409_v28  ;;  %v11460_v28 = vld [vmem:[%s12517_s5 + $0x330] sm:$0xff]  }
  0xba   : > { %10209 = vmatprep.subr.bf16.mxu1 %v11411_v30  ;;  %v11461_v29 = vld [vmem:[%s12517_s5 + $0x3b0] sm:$0xff]   ;;  %v11462_v30 = vld [vmem:[%s12517_s5 + $0x378] sm:$0xff]  }
  0xbc   : > { %10188 = vmatpush3.bf16.msra.mxu0 %v11412_v31  ;;  %v11463_v31 = vld [vmem:[%s12517_s5 + $0x3f8] sm:$0xff]  }
  0xbd   : > { %10189 = vmatprep.subr.bf16.mxu0 %v11414_v33  ;;  %10210 = vmatpush3.bf16.msra.mxu1 %v11413_v32  ;;  %v11464_v32 = vld [vmem:[%s12517_s5 + $0x338] sm:$0xff]  }
  0xbe   : > { %10211 = vmatprep.subr.bf16.mxu1 %v11415_v34  ;;  %v11465_v33 = vld [vmem:[%s12517_s5 + $0x3b8] sm:$0xff]   ;;  %v1954_v34 = vrot.slane %v12659_v54, %v12585_v42  ;;  %v11484_v54 = vld [vmem:[%s12517_s5 + $0x4e0] sm:$0xff]  }
  0xc0   : > { %10190 = vmatpush3.bf16.msra.mxu0 %v11416_v35  ;;  %v11467_v35 = vld [vmem:[%s12517_s5 + $0x440] sm:$0xff]  }
  0xc1   : > { %10191 = vmatprep.subr.bf16.mxu0 %v11418_v37  ;;  %10212 = vmatpush3.bf16.msra.mxu1 %v11417_v36  ;;  %v11468_v36 = vld [vmem:[%s12517_s5 + $0x4c0] sm:$0xff]  }
  0xc2   : > { %10213 = vmatprep.subr.bf16.mxu1 %v11419_v38  ;;  %v11469_v37 = vld [vmem:[%s12517_s5 + $0x400] sm:$0xff]  }
  0xc3   : > { %v11470_v38 = vld [vmem:[%s12517_s5 + $0x480] sm:$0xff]  }
  0xc4   : > { %10192 = vmatpush3.bf16.msra.mxu0 %v11420_v39  ;;  %v1970_v39 = vcombine.high %v1954_v34, %v1954_v34 }
  0xc5   : > { %10193 = vmatprep.subr.bf16.mxu0 %v11422_v41  ;;  %10214 = vmatpush3.bf16.msra.mxu1 %v11421_v40  ;;  %v11471_v40 = vld [vmem:[%s12517_s5 + $0x448] sm:$0xff]  }
  0xc6   : > { %10215 = vmatprep.subr.bf16.mxu1 %v11423_v43  ;;  %v11472_v41 = vld [vmem:[%s12517_s5 + $0x4c8] sm:$0xff]  }
  0xc7   : > { %v11473_v43 = vld [vmem:[%s12517_s5 + $0x408] sm:$0xff]  }
  0xc8   : > { %10194 = vmatpush3.bf16.msra.mxu0 %v11424_v44  ;;  %v11474_v44 = vld [vmem:[%s12517_s5 + $0x488] sm:$0xff]  }
  0xc9   : > { %10195 = vmatprep.subr.bf16.mxu0 %v11426_v46  ;;  %10216 = vmatpush3.bf16.msra.mxu1 %v11425_v45  ;;  %v11475_v45 = vld [vmem:[%s12517_s5 + $0x450] sm:$0xff]  }
  0xca   : > { %10217 = vmatprep.subr.bf16.mxu1 %v11427_v48  ;;  %v11476_v46 = vld [vmem:[%s12517_s5 + $0x4d0] sm:$0xff]  }
  0xcb   : > { %v11478_v48 = vld [vmem:[%s12517_s5 + $0x490] sm:$0xff]  }
  0xcc   : > { %10196 = vmatpush3.bf16.msra.mxu0 %v11428_v51  ;;  %v11481_v51 = vld [vmem:[%s12517_s5 + $0x418] sm:$0xff]  }
  0xcd   : > { %10197 = vmatprep.subr.bf16.mxu0 %v11430_v55  ;;  %10218 = vmatpush3.bf16.msra.mxu1 %v11429_v52  ;;  %v11482_v52 = vld [vmem:[%s12517_s5 + $0x498] sm:$0xff]   ;;  %v11485_v55 = vld [vmem:[%s12517_s5 + $0x420] sm:$0xff]  }
  0xce   : > { %10219 = vmatprep.subr.bf16.mxu1 %v11431_v56  ;;  %v11486_v56 = vld [vmem:[%s12517_s5 + $0x4a0] sm:$0xff]  }
  0xd0   : > { %10198 = vmatpush3.bf16.msra.mxu0 %v11432_v59  ;;  %v11489_v59 = vld [vmem:[%s12517_s5 + $0x428] sm:$0xff]  }
  0xd1   : > { %10227 = vmatprep.subr.bf16.mxu0 %v11434_v63  ;;  %10220 = vmatpush3.bf16.msra.mxu1 %v11433_v60  ;;  %v11490_v60 = vld [vmem:[%s12517_s5 + $0x4a8] sm:$0xff]   ;;  %v11492_v63 = vld [vmem:[%s12517_s5 + $0x4f0] sm:$0xff]  }
  0xd2   : > { %10249 = vmatprep.subr.bf16.mxu1 %v11435_v0 }
  0xd3   : > { %7360 = vmatmul.mubr.bf16.vlgmr.msra.gmra.mrb[8].mxu0 %v1947_v62  ;;  %v317_v62 = vld [vmem:[%s12536_s8 + $0x10] sm:$0xff] }
  0xd4   : > { %10228 = vmatpush3.bf16.msra.mxu0 %v11436_v2  ;;  %7439 = vmatprep.mubr.bf16.mxu0 %v1968_v1  ;;  %v1980_v0 = vrot.slane %v317_v62, %v12585_v42  ;;  %v1973_v1 = vcombine.high %v317_v62, %v317_v62  ;;  %v11493_v2 = vld [vmem:[%s12517_s5 + $0x430] sm:$0xff]  }
  0xd5   : > { %7400 = vmatmul.mubr.bf16.vlgmr.msra.gmra.mrb[8].mxu1 %v1969_v4  ;;  %10229 = vmatprep.subr.bf16.mxu0 %v11438_v5  ;;  %v11542_v62 = vld [vmem:[%s12517_s5 + $0x610] sm:$0xff]  }
  0xd6   : > { %10250 = vmatpush3.bf16.msra.mxu1 %v11437_v3  ;;  %7479 = vmatprep.mubr.bf16.mxu1 %v1972_v7  ;;  %v11494_v3 = vld [vmem:[%s12517_s5 + $0x4b0] sm:$0xff]   ;;  %v1988_v4 = vcombine.high %v1980_v0, %v1980_v0  ;;  %v12735_v5 = vrot.slane %v1973_v1, %v12585_v42  ;;  %v11496_v7 = vld [vmem:[%s12517_s5 + $0x4f8] sm:$0xff]  }
  0xd7   : > { %10251 = vmatprep.subr.bf16.mxu1 %v11439_v6  ;;  %v11495_v6 = vld [vmem:[%s12517_s5 + $0x478] sm:$0xff]  }
  0xd8   : > { %10230 = vmatpush3.bf16.msra.mxu0 %v11440_v8  ;;  %v2010_v8 = vrot.slane %v1988_v4, %v12585_v42  ;;  %v11545_v1 = vld [vmem:[%s12517_s5 + $0x6d8] sm:$0xff]   ;;  %v11548_v4 = vld [vmem:[%s12517_s5 + $0x660] sm:$0xff]  }
  0xd9   : > { %10231 = vmatprep.subr.bf16.mxu0 %v11442_v10  ;;  %v11497_v10 = vld [vmem:[%s12517_s5 + $0x438] sm:$0xff]  }
  0xda   : > { %10252 = vmatpush3.bf16.msra.mxu1 %v11441_v9  ;;  %v1989_v9 = vcombine.high %v12735_v5, %v12735_v5 }
  0xdb   : > { %10253 = vmatprep.subr.bf16.mxu1 %v11443_v11  ;;  %v11498_v11 = vld [vmem:[%s12517_s5 + $0x4b8] sm:$0xff]  }
  0xdc   : > { %10232 = vmatpush3.bf16.msra.mxu0 %v11444_v12  ;;  %v2020_v12 = vcombine.high %v2010_v8, %v2010_v8 }
  0xdd   : > { %10233 = vmatprep.subr.bf16.mxu0 %v11446_v14  ;;  %v11499_v14 = vld [vmem:[%s12517_s5 + $0x540] sm:$0xff]  }
  0xde   : > { %10254 = vmatpush3.bf16.msra.mxu1 %v11445_v13  ;;  %v1996_v13 = vrot.slane %v1980_v0, %v12585_v42  ;;  %v11544_v0 = vld [vmem:[%s12517_s5 + $0x658] sm:$0xff]  }
  0xdf   : > { %10255 = vmatprep.subr.bf16.mxu1 %v11447_v15  ;;  %v11500_v15 = vld [vmem:[%s12517_s5 + $0x5c0] sm:$0xff]  }
  0xe0   : > { %10234 = vmatpush3.bf16.msra.mxu0 %v11448_v16  ;;  %v2017_v16 = vrot.slane %v1989_v9, %v12585_v42  ;;  %v11553_v9 = vld [vmem:[%s12517_s5 + $0x6e8] sm:$0xff]  }
  0xe1   : > { %10235 = vmatprep.subr.bf16.mxu0 %v11450_v18  ;;  %v11502_v18 = vld [vmem:[%s12517_s5 + $0x580] sm:$0xff]  }
  0xe2   : > { %10256 = vmatpush3.bf16.msra.mxu1 %v11449_v17  ;;  %v11501_v17 = vld [vmem:[%s12517_s5 + $0x500] sm:$0xff]  }
  0xe3   : > { %10257 = vmatprep.subr.bf16.mxu1 %v11451_v19  ;;  %v2018_v19 = vcombine.high %v1996_v13, %v1996_v13 }
  0xe4   : > { %10236 = vmatpush3.bf16.msra.mxu0 %v11452_v20  ;;  %v11503_v20 = vld [vmem:[%s12517_s5 + $0x548] sm:$0xff]  }
  0xe5   : > { %10237 = vmatprep.subr.bf16.mxu0 %v11454_v22  ;;  %v2021_v22 = vcombine.high %v2017_v16, %v2017_v16 }
  0xe6   : > { %10258 = vmatpush3.bf16.msra.mxu1 %v11453_v21  ;;  %v11504_v21 = vld [vmem:[%s12517_s5 + $0x5c8] sm:$0xff]  }
  0xe7   : > { %10259 = vmatprep.subr.bf16.mxu1 %v11455_v23  ;;  %v11505_v23 = vld [vmem:[%s12517_s5 + $0x508] sm:$0xff]  }
  0xe8   : > { %10238 = vmatpush3.bf16.msra.mxu0 %v11456_v24  ;;  %v11506_v24 = vld [vmem:[%s12517_s5 + $0x588] sm:$0xff]  }
  0xe9   : > { %10239 = vmatprep.subr.bf16.mxu0 %v11458_v26  ;;  %v11508_v26 = vld [vmem:[%s12517_s5 + $0x5d0] sm:$0xff]  }
  0xea   : > { %10260 = vmatpush3.bf16.msra.mxu1 %v11457_v25  ;;  %v11507_v25 = vld [vmem:[%s12517_s5 + $0x550] sm:$0xff]  }
  0xeb   : > { %10261 = vmatprep.subr.bf16.mxu1 %v11459_v27  ;;  %v11509_v27 = vld [vmem:[%s12517_s5 + $0x510] sm:$0xff]  }
  0xec   : > { %10240 = vmatpush3.bf16.msra.mxu0 %v11460_v28  ;;  %v11510_v28 = vld [vmem:[%s12517_s5 + $0x590] sm:$0xff]  }
  0xed   : > { %10241 = vmatprep.subr.bf16.mxu0 %v11462_v30  ;;  %v11512_v30 = vld [vmem:[%s12517_s5 + $0x5d8] sm:$0xff]  }
  0xee   : > { %10262 = vmatpush3.bf16.msra.mxu1 %v11461_v29  ;;  %v11511_v29 = vld [vmem:[%s12517_s5 + $0x558] sm:$0xff]  }
  0xef   : > { %10263 = vmatprep.subr.bf16.mxu1 %v11463_v31  ;;  %v11513_v31 = vld [vmem:[%s12517_s5 + $0x518] sm:$0xff]  }
  0xf0   : > { %10242 = vmatpush3.bf16.msra.mxu0 %v11464_v32  ;;  %v11514_v32 = vld [vmem:[%s12517_s5 + $0x598] sm:$0xff]  }
  0xf1   : > { %10271 = vmatprep.subr.bf16.mxu0 %v11467_v35  ;;  %v11517_v35 = vld [vmem:[%s12517_s5 + $0x520] sm:$0xff]  }
  0xf2   : > { %10264 = vmatpush3.bf16.msra.mxu1 %v11465_v33  ;;  %v11515_v33 = vld [vmem:[%s12517_s5 + $0x560] sm:$0xff]  }
  0xf3   : > { %7440 = vmatmul.mubr.bf16.vlgmr.msra.gmra.mrb[12].mxu0 %v1954_v34  ;;  %10293 = vmatprep.subr.bf16.mxu1 %v11468_v36  ;;  %v11516_v34 = vld [vmem:[%s12517_s5 + $0x5e0] sm:$0xff]  }
  0xf4   : > { %10272 = vmatpush3.bf16.msra.mxu0 %v11469_v37  ;;  %7519 = vmatprep.mubr.bf16.mxu0 %v2010_v8  ;;  %v11518_v36 = vld [vmem:[%s12517_s5 + $0x5a0] sm:$0xff]   ;;  %v11519_v37 = vld [vmem:[%s12517_s5 + $0x568] sm:$0xff]  }
  0xf5   : > { %7480 = vmatmul.mubr.bf16.vlgmr.msra.gmra.mrb[12].mxu1 %v1970_v39  ;;  %10273 = vmatprep.subr.bf16.mxu0 %v11471_v40  ;;  %v11521_v39 = vld [vmem:[%s12517_s5 + $0x528] sm:$0xff]  }
  0xf6   : > { %10294 = vmatpush3.bf16.msra.mxu1 %v11470_v38  ;;  %7559 = vmatprep.mubr.bf16.mxu1 %v2020_v12  ;;  %v11520_v38 = vld [vmem:[%s12517_s5 + $0x5e8] sm:$0xff]   ;;  %v11556_v12 = vld [vmem:[%s12517_s5 + $0x670] sm:$0xff]  }
  0xf7   : > { %10295 = vmatprep.subr.bf16.mxu1 %v11472_v41  ;;  %v11522_v40 = vld [vmem:[%s12517_s5 + $0x5a8] sm:$0xff]   ;;  %v11523_v41 = vld [vmem:[%s12517_s5 + $0x570] sm:$0xff]  }
  0xf8   : > { %10274 = vmatpush3.bf16.msra.mxu0 %v11473_v43  ;;  %v11524_v43 = vld [vmem:[%s12517_s5 + $0x5f0] sm:$0xff]   ;;  %v11552_v8 = vld [vmem:[%s12517_s5 + $0x668] sm:$0xff]  }
  0xf9   : > { %10275 = vmatprep.subr.bf16.mxu0 %v11475_v45  ;;  %v11526_v45 = vld [vmem:[%s12517_s5 + $0x5b0] sm:$0xff]  }
  0xfa   : > { %10296 = vmatpush3.bf16.msra.mxu1 %v11474_v44  ;;  %v11525_v44 = vld [vmem:[%s12517_s5 + $0x530] sm:$0xff]  }
  0xfb   : > { %10297 = vmatprep.subr.bf16.mxu1 %v11476_v46  ;;  %v11527_v46 = vld [vmem:[%s12517_s5 + $0x578] sm:$0xff]  }
  0xfc   : > { %10276 = vmatpush3.bf16.msra.mxu0 %v11477_v47  ;;  %v11528_v47 = vld [vmem:[%s12517_s5 + $0x5f8] sm:$0xff]  }
  0xfd   : > { %10277 = vmatprep.subr.bf16.mxu0 %v11479_v49  ;;  %v11530_v49 = vld [vmem:[%s12517_s5 + $0x5b8] sm:$0xff]  }
  0xfe   : > { %10298 = vmatpush3.bf16.msra.mxu1 %v11478_v48  ;;  %v11529_v48 = vld [vmem:[%s12517_s5 + $0x538] sm:$0xff]  }
  0xff   : > { %10299 = vmatprep.subr.bf16.mxu1 %v11480_v50  ;;  %v2003_v50 = vrot.slane %v12735_v5, %v12585_v42  ;;  %v11549_v5 = vld [vmem:[%s12517_s5 + $0x6e0] sm:$0xff]  }
 0x100   : > { %10278 = vmatpush3.bf16.msra.mxu0 %v11481_v51  ;;  %v11532_v51 = vld [vmem:[%s12517_s5 + $0x640] sm:$0xff]  }
 0x101   : > { %10279 = vmatprep.subr.bf16.mxu0 %v11483_v53  ;;  %v11534_v53 = vld [vmem:[%s12517_s5 + $0x600] sm:$0xff]  }
 0x102   : > { %10300 = vmatpush3.bf16.msra.mxu1 %v11482_v52  ;;  %v11533_v52 = vld [vmem:[%s12517_s5 + $0x6c0] sm:$0xff]  }
 0x103   : > { %10301 = vmatprep.subr.bf16.mxu1 %v11484_v54  ;;  %v11535_v54 = vld [vmem:[%s12517_s5 + $0x680] sm:$0xff]  }
 0x104   : > { %10280 = vmatpush3.bf16.msra.mxu0 %v11485_v55  ;;  %v2019_v55 = vcombine.high %v2003_v50, %v2003_v50 }
 0x105   : > { %10281 = vmatprep.subr.bf16.mxu0 %v11487_v57  ;;  %v11537_v57 = vld [vmem:[%s12517_s5 + $0x6c8] sm:$0xff]  }
 0x106   : > { %10302 = vmatpush3.bf16.msra.mxu1 %v11486_v56  ;;  %v11536_v56 = vld [vmem:[%s12517_s5 + $0x648] sm:$0xff]  }
 0x107   : > { %10303 = vmatprep.subr.bf16.mxu1 %v11488_v58  ;;  %v11538_v58 = vld [vmem:[%s12517_s5 + $0x608] sm:$0xff]  }
 0x108   : > { %10282 = vmatpush3.bf16.msra.mxu0 %v11489_v59  ;;  %v11539_v59 = vld [vmem:[%s12517_s5 + $0x688] sm:$0xff]  }
 0x109   : > { %10283 = vmatprep.subr.bf16.mxu0 %v11491_v61  ;;  %v11541_v61 = vld [vmem:[%s12517_s5 + $0x6d0] sm:$0xff]  }
 0x10a   : > { %10304 = vmatpush3.bf16.msra.mxu1 %v11490_v60  ;;  %v11540_v60 = vld [vmem:[%s12517_s5 + $0x650] sm:$0xff]  }
 0x10b   : > { %10305 = vmatprep.subr.bf16.mxu1 %v11492_v63  ;;  %v11543_v63 = vld [vmem:[%s12517_s5 + $0x690] sm:$0xff]  }
 0x10c   : > { %10284 = vmatpush3.bf16.msra.mxu0 %v11493_v2  ;;  %v11546_v2 = vld [vmem:[%s12517_s5 + $0x618] sm:$0xff]  }
 0x10d   : > { %10285 = vmatprep.subr.bf16.mxu0 %v11495_v6  ;;  %v11550_v6 = vld [vmem:[%s12517_s5 + $0x620] sm:$0xff]  }
 0x10e   : > { %10306 = vmatpush3.bf16.msra.mxu1 %v11494_v3  ;;  %v11547_v3 = vld [vmem:[%s12517_s5 + $0x698] sm:$0xff]  }
 0x10f   : > { %10307 = vmatprep.subr.bf16.mxu1 %v11496_v7  ;;  %v11551_v7 = vld [vmem:[%s12517_s5 + $0x6a0] sm:$0xff]  }
 0x110   : > { %10286 = vmatpush3.bf16.msra.mxu0 %v11497_v10  ;;  %v11554_v10 = vld [vmem:[%s12517_s5 + $0x628] sm:$0xff]  }
 0x111   : > { %10315 = vmatprep.subr.bf16.mxu0 %v11499_v14  ;;  %v318_v14 = vld [vmem:[%s12536_s8 + $0x18] sm:$0xff] }
 0x112   : > { %10308 = vmatpush3.bf16.msra.mxu1 %v11498_v11  ;;  %v11555_v11 = vld [vmem:[%s12517_s5 + $0x6a8] sm:$0xff]  }
 0x113   : > { %7520 = vmatmul.mubr.bf16.vlgmr.msra.gmra.mrb[16].mxu0 %v1996_v13  ;;  %10337 = vmatprep.subr.bf16.mxu1 %v11500_v15  ;;  %v11557_v13 = vld [vmem:[%s12517_s5 + $0x6f0] sm:$0xff]  }
 0x114   : > { %10316 = vmatpush3.bf16.msra.mxu0 %v11501_v17  ;;  %7599 = vmatprep.mubr.bf16.mxu0 %v2017_v16  ;;  %v11558_v15 = vld [vmem:[%s12517_s5 + $0x630] sm:$0xff]   ;;  %v2029_v16 = vrot.slane %v318_v14, %v12585_v42  ;;  %v2022_v17 = vcombine.high %v318_v14, %v318_v14  ;;  %v11598_v14 = vld [vmem:[%s12517_s5 + $0x8c0] sm:$0xff]  }
 0x115   : > { %7560 = vmatmul.mubr.bf16.vlgmr.msra.gmra.mrb[16].mxu1 %v2018_v19  ;;  %10317 = vmatprep.subr.bf16.mxu0 %v11503_v20  ;;  %v11560_v19 = vld [vmem:[%s12517_s5 + $0x678] sm:$0xff]  }
 0x116   : > { %10338 = vmatpush3.bf16.msra.mxu1 %v11502_v18  ;;  %7639 = vmatprep.mubr.bf16.mxu1 %v2021_v22  ;;  %v11559_v18 = vld [vmem:[%s12517_s5 + $0x6b0] sm:$0xff]   ;;  %v2037_v20 = vcombine.high %v2029_v16, %v2029_v16  ;;  %v11561_v22 = vld [vmem:[%s12517_s5 + $0x6f8] sm:$0xff]  }
 0x117   : > { %10339 = vmatprep.subr.bf16.mxu1 %v11504_v21  ;;  %v12812_v21 = vrot.slane %v2022_v17, %v12585_v42 }
 0x118   : > { %10318 = vmatpush3.bf16.msra.mxu0 %v11505_v23  ;;  %v11562_v23 = vld [vmem:[%s12517_s5 + $0x638] sm:$0xff]  }
 0x119   : > { %10319 = vmatprep.subr.bf16.mxu0 %v11507_v25  ;;  %v2038_v25 = vcombine.high %v12812_v21, %v12812_v21 }
 0x11a   : > { %10340 = vmatpush3.bf16.msra.mxu1 %v11506_v24  ;;  %v2059_v24 = vrot.slane %v2037_v20, %v12585_v42  ;;  %v11603_v20 = vld [vmem:[%s12517_s5 + $0x808] sm:$0xff]  }
 0x11b   : > { %10341 = vmatprep.subr.bf16.mxu1 %v11508_v26  ;;  %v11563_v26 = vld [vmem:[%s12517_s5 + $0x6b8] sm:$0xff]  }
 0x11c   : > { %10320 = vmatpush3.bf16.msra.mxu0 %v11509_v27  ;;  %v2069_v27 = vcombine.high %v2059_v24, %v2059_v24 }
 0x11d   : > { %10321 = vmatprep.subr.bf16.mxu0 %v11511_v29  ;;  %v11564_v29 = vld [vmem:[%s12517_s5 + $0x740] sm:$0xff]  }
 0x11e   : > { %10342 = vmatpush3.bf16.msra.mxu1 %v11510_v28  ;;  %v2045_v28 = vrot.slane %v2029_v16, %v12585_v42  ;;  %v11600_v16 = vld [vmem:[%s12517_s5 + $0x880] sm:$0xff]  }
 0x11f   : > { %10343 = vmatprep.subr.bf16.mxu1 %v11512_v30  ;;  %v11565_v30 = vld [vmem:[%s12517_s5 + $0x7c0] sm:$0xff]  }
 0x120   : > { %10322 = vmatpush3.bf16.msra.mxu0 %v11513_v31  ;;  %v2066_v31 = vrot.slane %v2038_v25, %v12585_v42  ;;  %v11608_v25 = vld [vmem:[%s12517_s5 + $0x890] sm:$0xff]  }
 0x121   : > { %10323 = vmatprep.subr.bf16.mxu0 %v11515_v33  ;;  %v11567_v33 = vld [vmem:[%s12517_s5 + $0x780] sm:$0xff]  }
 0x122   : > { %10344 = vmatpush3.bf16.msra.mxu1 %v11514_v32  ;;  %v11566_v32 = vld [vmem:[%s12517_s5 + $0x700] sm:$0xff]  }
 0x123   : > { %10345 = vmatprep.subr.bf16.mxu1 %v11516_v34  ;;  %v2067_v34 = vcombine.high %v2045_v28, %v2045_v28 }
 0x124   : > { %10324 = vmatpush3.bf16.msra.mxu0 %v11517_v35  ;;  %v11568_v35 = vld [vmem:[%s12517_s5 + $0x748] sm:$0xff]  }
 0x125   : > { %10325 = vmatprep.subr.bf16.mxu0 %v11519_v37  ;;  %v2070_v37 = vcombine.high %v2066_v31, %v2066_v31 }
 0x126   : > { %10346 = vmatpush3.bf16.msra.mxu1 %v11518_v36  ;;  %v11569_v36 = vld [vmem:[%s12517_s5 + $0x7c8] sm:$0xff]  }
 0x127   : > { %10347 = vmatprep.subr.bf16.mxu1 %v11520_v38  ;;  %v11570_v38 = vld [vmem:[%s12517_s5 + $0x708] sm:$0xff]  }
 0x128   : > { %10326 = vmatpush3.bf16.msra.mxu0 %v11521_v39  ;;  %v11571_v39 = vld [vmem:[%s12517_s5 + $0x788] sm:$0xff]  }
 0x129   : > { %10327 = vmatprep.subr.bf16.mxu0 %v11523_v41  ;;  %v11573_v41 = vld [vmem:[%s12517_s5 + $0x7d0] sm:$0xff]  }
 0x12a   : > { %10348 = vmatpush3.bf16.msra.mxu1 %v11522_v40  ;;  %v11572_v40 = vld [vmem:[%s12517_s5 + $0x750] sm:$0xff]  }
 0x12b   : > { %10349 = vmatprep.subr.bf16.mxu1 %v11524_v43  ;;  %v11574_v43 = vld [vmem:[%s12517_s5 + $0x710] sm:$0xff]  }
 0x12c   : > { %10328 = vmatpush3.bf16.msra.mxu0 %v11525_v44  ;;  %v11575_v44 = vld [vmem:[%s12517_s5 + $0x790] sm:$0xff]  }
 0x12d   : > { %10329 = vmatprep.subr.bf16.mxu0 %v11527_v46  ;;  %v11577_v46 = vld [vmem:[%s12517_s5 + $0x7d8] sm:$0xff]  }
 0x12e   : > { %10350 = vmatpush3.bf16.msra.mxu1 %v11526_v45  ;;  %v11576_v45 = vld [vmem:[%s12517_s5 + $0x758] sm:$0xff]  }
 0x12f   : > { %10351 = vmatprep.subr.bf16.mxu1 %v11528_v47  ;;  %v11578_v47 = vld [vmem:[%s12517_s5 + $0x718] sm:$0xff]  }
 0x130   : > { %10330 = vmatpush3.bf16.msra.mxu0 %v11529_v48  ;;  %v11579_v48 = vld [vmem:[%s12517_s5 + $0x798] sm:$0xff]  }
 0x131   : > { %10359 = vmatprep.subr.bf16.mxu0 %v11532_v51  ;;  %v11582_v51 = vld [vmem:[%s12517_s5 + $0x720] sm:$0xff]  }
 0x132   : > { %10352 = vmatpush3.bf16.msra.mxu1 %v11530_v49  ;;  %v11580_v49 = vld [vmem:[%s12517_s5 + $0x760] sm:$0xff]  }
 0x133   : > { %7600 = vmatmul.mubr.bf16.vlgmr.msra.gmra.mrb[20].mxu0 %v2003_v50  ;;  %10381 = vmatprep.subr.bf16.mxu1 %v11533_v52  ;;  %v11581_v50 = vld [vmem:[%s12517_s5 + $0x7e0] sm:$0xff]  }
 0x134   : > { %10360 = vmatpush3.bf16.msra.mxu0 %v11534_v53  ;;  %7679 = vmatprep.mubr.bf16.mxu0 %v2059_v24  ;;  %v11583_v52 = vld [vmem:[%s12517_s5 + $0x7a0] sm:$0xff]   ;;  %v11584_v53 = vld [vmem:[%s12517_s5 + $0x768] sm:$0xff]   ;;  %v11607_v24 = vld [vmem:[%s12517_s5 + $0x810] sm:$0xff]  }
 0x135   : > { %7640 = vmatmul.mubr.bf16.vlgmr.msra.gmra.mrb[20].mxu1 %v2019_v55  ;;  %10361 = vmatprep.subr.bf16.mxu0 %v11536_v56  ;;  %v11586_v55 = vld [vmem:[%s12517_s5 + $0x728] sm:$0xff]  }
 0x136   : > { %10382 = vmatpush3.bf16.msra.mxu1 %v11535_v54  ;;  %7719 = vmatprep.mubr.bf16.mxu1 %v2069_v27  ;;  %v11585_v54 = vld [vmem:[%s12517_s5 + $0x7e8] sm:$0xff]   ;;  %v11610_v27 = vld [vmem:[%s12517_s5 + $0x8d8] sm:$0xff]  }
 0x137   : > { %10383 = vmatprep.subr.bf16.mxu1 %v11537_v57  ;;  %v11587_v56 = vld [vmem:[%s12517_s5 + $0x7a8] sm:$0xff]   ;;  %v11588_v57 = vld [vmem:[%s12517_s5 + $0x770] sm:$0xff]  }
 0x138   : > { %10362 = vmatpush3.bf16.msra.mxu0 %v11538_v58 }
 0x139   : > { %10363 = vmatprep.subr.bf16.mxu0 %v11540_v60 }
 0x13a   : > { %10384 = vmatpush3.bf16.msra.mxu1 %v11539_v59  ;;  %v11589_v59 = vld [vmem:[%s12517_s5 + $0x7f0] sm:$0xff]  }
 0x13b   : > { %10385 = vmatprep.subr.bf16.mxu1 %v11541_v61  ;;  %v11590_v61 = vld [vmem:[%s12517_s5 + $0x730] sm:$0xff]  }
 0x13c   : > { %10364 = vmatpush3.bf16.msra.mxu0 %v11542_v62 }
 0x13d   : > { %10365 = vmatprep.subr.bf16.mxu0 %v11544_v0 }
 0x13e   : > { %10386 = vmatpush3.bf16.msra.mxu1 %v11543_v63 }
 0x13f   : > { %10387 = vmatprep.subr.bf16.mxu1 %v11545_v1  ;;  %v11591_v1 = vld [vmem:[%s12517_s5 + $0x7b0] sm:$0xff]  }
 0x140   : > { %10366 = vmatpush3.bf16.msra.mxu0 %v11546_v2  ;;  %v11592_v2 = vld [vmem:[%s12517_s5 + $0x778] sm:$0xff]  }
 0x141   : > { %10367 = vmatprep.subr.bf16.mxu0 %v11548_v4 }
 0x142   : > { %10388 = vmatpush3.bf16.msra.mxu1 %v11547_v3 }
 0x143   : > { %10389 = vmatprep.subr.bf16.mxu1 %v11549_v5 }
 0x144   : > { %10368 = vmatpush3.bf16.msra.mxu0 %v11550_v6 }
 0x145   : > { %10369 = vmatprep.subr.bf16.mxu0 %v11552_v8 }
 0x146   : > { %10390 = vmatpush3.bf16.msra.mxu1 %v11551_v7  ;;  %v11593_v7 = vld [vmem:[%s12517_s5 + $0x7f8] sm:$0xff]  }
 0x147   : > { %10391 = vmatprep.subr.bf16.mxu1 %v11553_v9  ;;  %v11594_v9 = vld [vmem:[%s12517_s5 + $0x738] sm:$0xff]  }
 0x148   : > { %10370 = vmatpush3.bf16.msra.mxu0 %v11554_v10 }
 0x149   : > { %10371 = vmatprep.subr.bf16.mxu0 %v11556_v12  ;;  %v2052_v12 = vrot.slane %v12812_v21, %v12585_v42  ;;  %v11604_v21 = vld [vmem:[%s12517_s5 + $0x888] sm:$0xff]  }
 0x14a   : > { %10392 = vmatpush3.bf16.msra.mxu1 %v11555_v11  ;;  %v11595_v11 = vld [vmem:[%s12517_s5 + $0x7b8] sm:$0xff]  }
 0x14b   : > { %10393 = vmatprep.subr.bf16.mxu1 %v11557_v13  ;;  %v11597_v13 = vld [vmem:[%s12517_s5 + $0x840] sm:$0xff]   ;;  %v2068_v17 = vcombine.high %v2052_v12, %v2052_v12 }
 0x14c   : > { %10372 = vmatpush3.bf16.msra.mxu0 %v11558_v15  ;;  %v11599_v15 = vld [vmem:[%s12517_s5 + $0x800] sm:$0xff]  }
 0x14d   : > { %10373 = vmatprep.subr.bf16.mxu0 %v11560_v19  ;;  %v11602_v19 = vld [vmem:[%s12517_s5 + $0x8c8] sm:$0xff]  }
 0x14e   : > { %10394 = vmatpush3.bf16.msra.mxu1 %v11559_v18  ;;  %v11601_v18 = vld [vmem:[%s12517_s5 + $0x848] sm:$0xff]  }
 0x14f   : > { %10395 = vmatprep.subr.bf16.mxu1 %v11561_v22  ;;  %v11605_v22 = vld [vmem:[%s12517_s5 + $0x850] sm:$0xff]  }
 0x150   : > { %10374 = vmatpush3.bf16.msra.mxu0 %v11562_v23  ;;  %v11606_v23 = vld [vmem:[%s12517_s5 + $0x8d0] sm:$0xff]  }
 0x151   : > { %10403 = vmatprep.subr.bf16.mxu0 %v11564_v29  ;;  %v11612_v29 = vld [vmem:[%s12517_s5 + $0x898] sm:$0xff]  }
 0x152   : > { %10396 = vmatpush3.bf16.msra.mxu1 %v11563_v26  ;;  %v11609_v26 = vld [vmem:[%s12517_s5 + $0x858] sm:$0xff]  }
 0x153   : > { %7680 = vmatmul.mubr.bf16.vlgmr.msra.gmra.mrb[24].mxu0 %v2045_v28  ;;  %10425 = vmatprep.subr.bf16.mxu1 %v11565_v30  ;;  %v11611_v28 = vld [vmem:[%s12517_s5 + $0x818] sm:$0xff]   ;;  %v11613_v30 = vld [vmem:[%s12517_s5 + $0x860] sm:$0xff]  }
 0x154   : > { %10404 = vmatpush3.bf16.msra.mxu0 %v11566_v32  ;;  %7759 = vmatprep.mubr.bf16.mxu0 %v2066_v31  ;;  %v11614_v31 = vld [vmem:[%s12517_s5 + $0x8e0] sm:$0xff]  }
 0x155   : > { %7720 = vmatmul.mubr.bf16.vlgmr.msra.gmra.mrb[24].mxu1 %v2067_v34  ;;  %10405 = vmatprep.subr.bf16.mxu0 %v11568_v35  ;;  %v11615_v32 = vld [vmem:[%s12517_s5 + $0x820] sm:$0xff]   ;;  %v11617_v34 = vld [vmem:[%s12517_s5 + $0x868] sm:$0xff]  }
 0x156   : > { %10426 = vmatpush3.bf16.msra.mxu1 %v11567_v33  ;;  %7799 = vmatprep.mubr.bf16.mxu1 %v2070_v37  ;;  %v11616_v33 = vld [vmem:[%s12517_s5 + $0x8a0] sm:$0xff]   ;;  %v11618_v35 = vld [vmem:[%s12517_s5 + $0x8e8] sm:$0xff]  }
 0x157   : > { %10427 = vmatprep.subr.bf16.mxu1 %v11569_v36  ;;  %v11619_v36 = vld [vmem:[%s12517_s5 + $0x828] sm:$0xff]  }
 0x158   : > { %10406 = vmatpush3.bf16.msra.mxu0 %v11570_v38  ;;  %v11620_v37 = vld [vmem:[%s12517_s5 + $0x8a8] sm:$0xff]   ;;  %v11621_v38 = vld [vmem:[%s12517_s5 + $0x870] sm:$0xff]  }
 0x159   : > { %10407 = vmatprep.subr.bf16.mxu0 %v11572_v40  ;;  %v11622_v40 = vld [vmem:[%s12517_s5 + $0x8f0] sm:$0xff]  }
 0x15a   : > { %10428 = vmatpush3.bf16.msra.mxu1 %v11571_v39 }
 0x15b   : > { %10429 = vmatprep.subr.bf16.mxu1 %v11573_v41  ;;  %v319_v41 = vld [vmem:[%s12536_s8 + $0x20] sm:$0xff] }
 0x15c   : > { %10408 = vmatpush3.bf16.msra.mxu0 %v11574_v43 }
 0x15d   : > { %10409 = vmatprep.subr.bf16.mxu0 %v11576_v45  ;;  %v2078_v45 = vrot.slane %v319_v41, %v12585_v42 }
 0x15e   : > { %10430 = vmatpush3.bf16.msra.mxu1 %v11575_v44  ;;  %v11623_v44 = vld [vmem:[%s12517_s5 + $0x830] sm:$0xff]  }
 0x15f   : > { %10431 = vmatprep.subr.bf16.mxu1 %v11577_v46  ;;  %v2071_v46 = vcombine.high %v319_v41, %v319_v41 }
 0x160   : > { %10410 = vmatpush3.bf16.msra.mxu0 %v11578_v47 }
 0x161   : > { %10411 = vmatprep.subr.bf16.mxu0 %v11580_v49 }
 0x162   : > { %10432 = vmatpush3.bf16.msra.mxu1 %v11579_v48 }
 0x163   : > { %10433 = vmatprep.subr.bf16.mxu1 %v11581_v50 }
 0x164   : > { %10412 = vmatpush3.bf16.msra.mxu0 %v11582_v51 }
 0x165   : > { %10413 = vmatprep.subr.bf16.mxu0 %v11584_v53  ;;  %v11625_v53 = vld [vmem:[%s12517_s5 + $0x878] sm:$0xff]  }
 0x166   : > { %10434 = vmatpush3.bf16.msra.mxu1 %v11583_v52  ;;  %v10111_v58 = vpop.f32.mrb[0].mxu0  ;;  %v11624_v52 = vld [vmem:[%s12517_s5 + $0x8b0] sm:$0xff]  }
 0x167   : > { %v10112_v60 = vpop.f32.mrb[1].mxu0  ;;  %10435 = vmatprep.subr.bf16.mxu1 %v11585_v54  ;;  %v10133_v62 = vpop.f32.mrb[0].mxu1  ;;  %v2086_v54 = vcombine.high %v2078_v45, %v2078_v45 }
 0x168   : > { %v10113_v63 = vadd.f32 %v10112_v60, %v10111_v58  ;;  %v10114_v0 = vpop.f32.mrb[2].mxu0  ;;  %10414 = vmatpush3.bf16.msra.mxu0 %v11586_v55  ;;  %v10134_v3 = vpop.f32.mrb[1].mxu1  ;;  %v12890_v55 = vrot.slane %v2071_v46, %v12585_v42 }
 0x169   : > { %v10115_v4 = vpop.f32.mrb[3].mxu0  ;;  %10415 = vmatprep.subr.bf16.mxu0 %v11588_v57  ;;  %v10135_v5 = vadd.f32 %v10134_v3, %v10133_v62  ;;  %v10136_v6 = vpop.f32.mrb[2].mxu1  ;;  %v2108_v62 = vrot.slane %v2086_v54, %v12585_v42  ;;  %v2094_v3 = vrot.slane %v2078_v45, %v12585_v42  ;;  %v11663_v54 = vld [vmem:[%s12517_s5 + $0xac0] sm:$0xff]  }
 0x16a   : > { %10436 = vmatpush3.bf16.msra.mxu1 %v11587_v56  ;;  %v10137_v8 = vpop.f32.mrb[3].mxu1  ;;  %v11629_v4 = vld [vmem:[%s12517_s5 + $0x940] sm:$0xff]  }
 0x16b   : > { %10437 = vmatprep.subr.bf16.mxu1 %v11589_v59  ;;  %v12853_v10 = vadd.f32 %v10135_v5, %v10113_v63  ;;  %v11626_v59 = vld [vmem:[%s12517_s5 + $0x8f8] sm:$0xff]   ;;  %v2087_v63 = vcombine.high %v12890_v55, %v12890_v55  ;;  %v11630_v5 = vld [vmem:[%s12517_s5 + $0x9c0] sm:$0xff]  }
 0x16c   : > { %10416 = vmatpush3.bf16.msra.mxu0 %v11590_v61  ;;  %v11627_v61 = vld [vmem:[%s12517_s5 + $0x838] sm:$0xff]   ;;  %v11632_v8 = vld [vmem:[%s12517_s5 + $0x980] sm:$0xff]  }
 0x16d   : > { %10417 = vmatprep.subr.bf16.mxu0 %v11592_v2  ;;  %v2118_v2 = vcombine.high %v2108_v62, %v2108_v62  ;;  %v2115_v6 = vrot.slane %v2087_v63, %v12585_v42  ;;  %v11671_v63 = vld [vmem:[%s12517_s5 + $0xad0] sm:$0xff]  }
 0x16e   : > { %10438 = vmatpush3.bf16.msra.mxu1 %v11591_v1  ;;  %v11628_v1 = vld [vmem:[%s12517_s5 + $0x8b8] sm:$0xff]  }
 0x16f   : > { %10439 = vmatprep.subr.bf16.mxu1 %v11593_v7  ;;  %v11631_v7 = vld [vmem:[%s12517_s5 + $0x900] sm:$0xff]  }
 0x170   : > { %10418 = vmatpush3.bf16.msra.mxu0 %v11594_v9  ;;  %v2116_v9 = vcombine.high %v2094_v3, %v2094_v3 }
 0x171   : > { %10447 = vmatprep.subr.bf16.mxu0 %v11597_v13  ;;  %v11635_v13 = vld [vmem:[%s12517_s5 + $0x908] sm:$0xff]  }
 0x172   : > { %10440 = vmatpush3.bf16.msra.mxu1 %v11595_v11  ;;  %v11634_v11 = vld [vmem:[%s12517_s5 + $0x9c8] sm:$0xff]  }
 0x173   : > { %7760 = vmatmul.mubr.bf16.vlgmr.msra.gmra.mrb[28].mxu0 %v2052_v12  ;;  %10469 = vmatprep.subr.bf16.mxu1 %v11598_v14  ;;  %v2119_v12 = vcombine.high %v2115_v6, %v2115_v6  ;;  %v11636_v14 = vld [vmem:[%s12517_s5 + $0x988] sm:$0xff]  }
 0x174   : > { %10448 = vmatpush3.bf16.msra.mxu0 %v11599_v15  ;;  %7839 = vmatprep.mubr.bf16.mxu0 %v2108_v62  ;;  %v11637_v15 = vld [vmem:[%s12517_s5 + $0x950] sm:$0xff]  }
 0x175   : > { %7800 = vmatmul.mubr.bf16.vlgmr.msra.gmra.mrb[28].mxu1 %v2068_v17  ;;  %10449 = vmatprep.subr.bf16.mxu0 %v11601_v18  ;;  %v11639_v17 = vld [vmem:[%s12517_s5 + $0x910] sm:$0xff]  }
 0x176   : > { %10470 = vmatpush3.bf16.msra.mxu1 %v11600_v16  ;;  %7879 = vmatprep.mubr.bf16.mxu1 %v2118_v2  ;;  %v11638_v16 = vld [vmem:[%s12517_s5 + $0x9d0] sm:$0xff]   ;;  %v11674_v2 = vld [vmem:[%s12517_s5 + $0xa58] sm:$0xff]  }
 0x177   : > { %10471 = vmatprep.subr.bf16.mxu1 %v11602_v19  ;;  %v11640_v18 = vld [vmem:[%s12517_s5 + $0x990] sm:$0xff]   ;;  %v11641_v19 = vld [vmem:[%s12517_s5 + $0x958] sm:$0xff]  }
 0x178   : > { %10450 = vmatpush3.bf16.msra.mxu0 %v11603_v20  ;;  %v11642_v20 = vld [vmem:[%s12517_s5 + $0x9d8] sm:$0xff]   ;;  %v11670_v62 = vld [vmem:[%s12517_s5 + $0xa50] sm:$0xff]  }
 0x179   : > { %10451 = vmatprep.subr.bf16.mxu0 %v11605_v22  ;;  %v11644_v22 = vld [vmem:[%s12517_s5 + $0x998] sm:$0xff]  }
 0x17a   : > { %10472 = vmatpush3.bf16.msra.mxu1 %v11604_v21  ;;  %v11643_v21 = vld [vmem:[%s12517_s5 + $0x918] sm:$0xff]  }
 0x17b   : > { %10473 = vmatprep.subr.bf16.mxu1 %v11606_v23  ;;  %v11645_v23 = vld [vmem:[%s12517_s5 + $0x960] sm:$0xff]  }
 0x17c   : > { %10452 = vmatpush3.bf16.msra.mxu0 %v11607_v24  ;;  %v11646_v24 = vld [vmem:[%s12517_s5 + $0x9e0] sm:$0xff]  }
 0x17d   : > { %10453 = vmatprep.subr.bf16.mxu0 %v11609_v26  ;;  %v11648_v26 = vld [vmem:[%s12517_s5 + $0x9a0] sm:$0xff]  }
 0x17e   : > { %10474 = vmatpush3.bf16.msra.mxu1 %v11608_v25  ;;  %v11647_v25 = vld [vmem:[%s12517_s5 + $0x920] sm:$0xff]  }
 0x17f   : > { %10475 = vmatprep.subr.bf16.mxu1 %v11610_v27  ;;  %v11649_v27 = vld [vmem:[%s12517_s5 + $0x968] sm:$0xff]  }
 0x180   : > { %10454 = vmatpush3.bf16.msra.mxu0 %v11611_v28  ;;  %v11650_v28 = vld [vmem:[%s12517_s5 + $0x9e8] sm:$0xff]  }
 0x181   : > { %10455 = vmatprep.subr.bf16.mxu0 %v11613_v30  ;;  %v11652_v30 = vld [vmem:[%s12517_s5 + $0x9a8] sm:$0xff]  }
 0x182   : > { %10476 = vmatpush3.bf16.msra.mxu1 %v11612_v29  ;;  %v11651_v29 = vld [vmem:[%s12517_s5 + $0x928] sm:$0xff]  }
 0x183   : > { %10477 = vmatprep.subr.bf16.mxu1 %v11614_v31  ;;  %v11653_v31 = vld [vmem:[%s12517_s5 + $0x970] sm:$0xff]  }
 0x184   : > { %10456 = vmatpush3.bf16.msra.mxu0 %v11615_v32 }
 0x185   : > { %10457 = vmatprep.subr.bf16.mxu0 %v11617_v34 }
 0x186   : > { %10478 = vmatpush3.bf16.msra.mxu1 %v11616_v33  ;;  %v10155_v39 = vpop.f32.mrb[4].mxu0  ;;  %v11654_v33 = vld [vmem:[%s12517_s5 + $0x9f0] sm:$0xff]  }
 0x187   : > { %v10156_v43 = vpop.f32.mrb[5].mxu0  ;;  %10479 = vmatprep.subr.bf16.mxu1 %v11618_v35  ;;  %v10177_v47 = vpop.f32.mrb[4].mxu1  ;;  %v11655_v35 = vld [vmem:[%s12517_s5 + $0x930] sm:$0xff]  }
 0x188   : > { %v10157_v48 = vadd.f32 %v10156_v43, %v10155_v39  ;;  %v10158_v49 = vpop.f32.mrb[6].mxu0  ;;  %10458 = vmatpush3.bf16.msra.mxu0 %v11619_v36  ;;  %v10178_v50 = vpop.f32.mrb[5].mxu1  ;;  %v11656_v39 = vld [vmem:[%s12517_s5 + $0x9b0] sm:$0xff]  }
 0x189   : > { %v10159_v51 = vpop.f32.mrb[7].mxu0  ;;  %10459 = vmatprep.subr.bf16.mxu0 %v11621_v38  ;;  %v10179_v57 = vadd.f32 %v10178_v50, %v10177_v47  ;;  %v10180_v58 = vpop.f32.mrb[6].mxu1  ;;  %v11658_v47 = vld [vmem:[%s12517_s5 + $0x9f8] sm:$0xff]  }
 0x18a   : > { %v7282_v56 = vadd.f32 %v10157_v48, %v12853_v10  ;;  %10480 = vmatpush3.bf16.msra.mxu1 %v11620_v37  ;;  %v10181_v60 = vpop.f32.mrb[7].mxu1  ;;  %v11633_v10 = vld [vmem:[%s12517_s5 + $0x948] sm:$0xff]   ;;  %v11659_v49 = vld [vmem:[%s12517_s5 + $0x938] sm:$0xff]  }
 0x18b   : > { %10481 = vmatprep.subr.bf16.mxu1 %v11622_v40  ;;  %v11657_v40 = vld [vmem:[%s12517_s5 + $0x978] sm:$0xff]   ;;  %v11667_v60 = vld [vmem:[%s12517_s5 + $0xac8] sm:$0xff]  }
 0x18c   : > { %v12898_v0 = vadd.f32 %v10179_v57, %v7282_v56  ;;  %10460 = vmatpush3.bf16.msra.mxu0 %v11623_v44  ;;  %v11660_v51 = vld [vmem:[%s12517_s5 + $0x9b8] sm:$0xff]   ;;  %v11664_v56 = vld [vmem:[%s12517_s5 + $0xa00] sm:$0xff]  }
 0x18d   : > { %10461 = vmatprep.subr.bf16.mxu0 %v11625_v53  ;;  %v11662_v53 = vld [vmem:[%s12517_s5 + $0xa40] sm:$0xff]  }
 0x18e   : > { %10482 = vmatpush3.bf16.msra.mxu1 %v11624_v52  ;;  %v2101_v52 = vrot.slane %v12890_v55, %v12585_v42  ;;  %v11665_v57 = vld [vmem:[%s12517_s5 + $0xa80] sm:$0xff]   ;;  %v11668_v55 = vld [vmem:[%s12517_s5 + $0xa08] sm:$0xff]  }
 0x18f   : > { %10483 = vmatprep.subr.bf16.mxu1 %v11626_v59  ;;  %v11666_v59 = vld [vmem:[%s12517_s5 + $0xa48] sm:$0xff]  }
 0x190   : > { %10462 = vmatpush3.bf16.msra.mxu0 %v11627_v61  ;;  %v2117_v58 = vcombine.high %v2101_v52, %v2101_v52  ;;  %v11669_v61 = vld [vmem:[%s12517_s5 + $0xa88] sm:$0xff]  }
 0x191   : > { %10491 = vmatprep.subr.bf16.mxu0 %v11629_v4  ;;  %v11676_v4 = vld [vmem:[%s12517_s5 + $0xa18] sm:$0xff]  }
 0x192   : > { %10484 = vmatpush3.bf16.msra.mxu1 %v11628_v1  ;;  %v11673_v1 = vld [vmem:[%s12517_s5 + $0xa90] sm:$0xff]  }
 0x193   : > { %7840 = vmatmul.mubr.bf16.vlgmr.msra.gmra.mrb[32].mxu0 %v2094_v3  ;;  %10513 = vmatprep.subr.bf16.mxu1 %v11630_v5  ;;  %v11675_v3 = vld [vmem:[%s12517_s5 + $0xad8] sm:$0xff]  }
 0x194   : > { %10492 = vmatpush3.bf16.msra.mxu0 %v11631_v7  ;;  %7919 = vmatprep.mubr.bf16.mxu0 %v2115_v6  ;;  %v11677_v5 = vld [vmem:[%s12517_s5 + $0xa98] sm:$0xff]   ;;  %v11678_v6 = vld [vmem:[%s12517_s5 + $0xa60] sm:$0xff]  }
 0x195   : > { %7880 = vmatmul.mubr.bf16.vlgmr.msra.gmra.mrb[32].mxu1 %v2116_v9  ;;  %10493 = vmatprep.subr.bf16.mxu0 %v11633_v10  ;;  %v11679_v7 = vld [vmem:[%s12517_s5 + $0xae0] sm:$0xff]   ;;  %v11682_v10 = vld [vmem:[%s12517_s5 + $0xa68] sm:$0xff]  }
 0x196   : > { %10514 = vmatpush3.bf16.msra.mxu1 %v11632_v8  ;;  %7959 = vmatprep.mubr.bf16.mxu1 %v2119_v12  ;;  %v11680_v8 = vld [vmem:[%s12517_s5 + $0xa20] sm:$0xff]   ;;  %v11684_v12 = vld [vmem:[%s12517_s5 + $0xa28] sm:$0xff]  }
 0x197   : > { %10515 = vmatprep.subr.bf16.mxu1 %v11634_v11  ;;  %v11681_v9 = vld [vmem:[%s12517_s5 + $0xaa0] sm:$0xff]   ;;  %v11683_v11 = vld [vmem:[%s12517_s5 + $0xae8] sm:$0xff]  }
 0x198   : > { %10494 = vmatpush3.bf16.msra.mxu0 %v11635_v13  ;;  %v11685_v13 = vld [vmem:[%s12517_s5 + $0xaa8] sm:$0xff]  }
 0x199   : > { %10495 = vmatprep.subr.bf16.mxu0 %v11637_v15 }
 0x19a   : > { %10516 = vmatpush3.bf16.msra.mxu1 %v11636_v14  ;;  %v11686_v14 = vld [vmem:[%s12517_s5 + $0xa70] sm:$0xff]  }
 0x19b   : > { %10517 = vmatprep.subr.bf16.mxu1 %v11638_v16  ;;  %v11687_v16 = vld [vmem:[%s12517_s5 + $0xaf0] sm:$0xff]  }
 0x19c   : > { %10496 = vmatpush3.bf16.msra.mxu0 %v11639_v17 }
 0x19d   : > { %10497 = vmatprep.subr.bf16.mxu0 %v11641_v19  ;;  %v320_v19 = vld [vmem:[%s12536_s8 + $0x28] sm:$0xff] }
 0x19e   : > { %10518 = vmatpush3.bf16.msra.mxu1 %v11640_v18  ;;  %v11688_v18 = vld [vmem:[%s12517_s5 + $0xa30] sm:$0xff]  }
 0x19f   : > { %10519 = vmatprep.subr.bf16.mxu1 %v11642_v20 }
 0x1a0   : > { %10498 = vmatpush3.bf16.msra.mxu0 %v11643_v21 }
 0x1a1   : > { %10499 = vmatprep.subr.bf16.mxu0 %v11645_v23  ;;  %v2127_v23 = vrot.slane %v320_v19, %v12585_v42 }
 0x1a2   : > { %10520 = vmatpush3.bf16.msra.mxu1 %v11644_v22 }
 0x1a3   : > { %10521 = vmatprep.subr.bf16.mxu1 %v11646_v24  ;;  %v2120_v24 = vcombine.high %v320_v19, %v320_v19 }
 0x1a4   : > { %10500 = vmatpush3.bf16.msra.mxu0 %v11647_v25 }
 0x1a5   : > { %10501 = vmatprep.subr.bf16.mxu0 %v11649_v27  ;;  %v11689_v27 = vld [vmem:[%s12517_s5 + $0xab0] sm:$0xff]  }
 0x1a6   : > { %10522 = vmatpush3.bf16.msra.mxu1 %v11648_v26  ;;  %v10199_v32 = vpop.f32.mrb[8].mxu0 }
 0x1a7   : > { %v10200_v34 = vpop.f32.mrb[9].mxu0  ;;  %10523 = vmatprep.subr.bf16.mxu1 %v11650_v28  ;;  %v11690_v28 = vld [vmem:[%s12517_s5 + $0xa78] sm:$0xff]  }
 0x1a8   : > { %v10221_v36 = vpop.f32.mrb[8].mxu1  ;;  %v10201_v37 = vadd.f32 %v10200_v34, %v10199_v32  ;;  %v10202_v38 = vpop.f32.mrb[10].mxu0  ;;  %10502 = vmatpush3.bf16.msra.mxu0 %v11651_v29  ;;  %v11691_v32 = vld [vmem:[%s12517_s5 + $0xaf8] sm:$0xff]  }
 0x1a9   : > { %v10222_v41 = vpop.f32.mrb[9].mxu1  ;;  %v10203_v43 = vpop.f32.mrb[11].mxu0  ;;  %10503 = vmatprep.subr.bf16.mxu0 %v11653_v31  ;;  %v11693_v38 = vld [vmem:[%s12517_s5 + $0xab8] sm:$0xff]  }
 0x1aa   : > { %v7362_v44 = vadd.f32 %v10201_v37, %v12898_v0  ;;  %v10223_v45 = vadd.f32 %v10222_v41, %v10221_v36  ;;  %v10224_v46 = vpop.f32.mrb[10].mxu1  ;;  %10524 = vmatpush3.bf16.msra.mxu1 %v11652_v30  ;;  %v11672_v0 = vld [vmem:[%s12517_s5 + $0xa10] sm:$0xff]   ;;  %v12975_v36 = vrot.slane %v2120_v24, %v12585_v42  ;;  %v11694_v41 = vld [vmem:[%s12517_s5 + $0xb40] sm:$0xff]   ;;  %v11724_v24 = vld [vmem:[%s12517_s5 + $0xb38] sm:$0xff]  }
 0x1ab   : > { %v10225_v48 = vpop.f32.mrb[11].mxu1  ;;  %10525 = vmatprep.subr.bf16.mxu1 %v11654_v33  ;;  %v2135_v33 = vcombine.high %v2127_v23, %v2127_v23  ;;  %v11696_v46 = vld [vmem:[%s12517_s5 + $0xb00] sm:$0xff]  }
 0x1ac   : > { %v12935_v50 = vadd.f32 %v10223_v45, %v7362_v44  ;;  %10504 = vmatpush3.bf16.msra.mxu0 %v11655_v35  ;;  %v11692_v35 = vld [vmem:[%s12517_s5 + $0xa38] sm:$0xff]   ;;  %v2136_v43 = vcombine.high %v12975_v36, %v12975_v36  ;;  %v11695_v45 = vld [vmem:[%s12517_s5 + $0xbc0] sm:$0xff]  }
 0x1ad   : > { %10505 = vmatprep.subr.bf16.mxu0 %v11657_v40  ;;  %v2143_v40 = vrot.slane %v2127_v23, %v12585_v42  ;;  %v11697_v48 = vld [vmem:[%s12517_s5 + $0xb80] sm:$0xff]  }
 0x1ae   : > { %10526 = vmatpush3.bf16.msra.mxu1 %v11656_v39  ;;  %v2157_v39 = vrot.slane %v2135_v33, %v12585_v42  ;;  %v11731_v33 = vld [vmem:[%s12517_s5 + $0xc48] sm:$0xff]  }
 0x1af   : > { %10527 = vmatprep.subr.bf16.mxu1 %v11658_v47  ;;  %v2164_v47 = vrot.slane %v2136_v43, %v12585_v42  ;;  %v11740_v43 = vld [vmem:[%s12517_s5 + $0xcd8] sm:$0xff]  }
 0x1b0   : > { %10506 = vmatpush3.bf16.msra.mxu0 %v11659_v49  ;;  %v2167_v44 = vcombine.high %v2157_v39, %v2157_v39  ;;  %v2165_v49 = vcombine.high %v2143_v40, %v2143_v40 }
 0x1b1   : > { %10535 = vmatprep.subr.bf16.mxu0 %v11662_v53  ;;  %v11700_v53 = vld [vmem:[%s12517_s5 + $0xb08] sm:$0xff]  }
 0x1b2   : > { %10528 = vmatpush3.bf16.msra.mxu1 %v11660_v51  ;;  %v11699_v51 = vld [vmem:[%s12517_s5 + $0xbc8] sm:$0xff]  }
 0x1b3   : > { %7920 = vmatmul.mubr.bf16.vlgmr.msra.gmra.mrb[36].mxu0 %v2101_v52  ;;  %10557 = vmatprep.subr.bf16.mxu1 %v11663_v54  ;;  %v2168_v52 = vcombine.high %v2164_v47, %v2164_v47  ;;  %v11701_v54 = vld [vmem:[%s12517_s5 + $0xb88] sm:$0xff]  }
 0x1b4   : > { %10536 = vmatpush3.bf16.msra.mxu0 %v11664_v56  ;;  %7999 = vmatprep.mubr.bf16.mxu0 %v2157_v39  ;;  %v11702_v56 = vld [vmem:[%s12517_s5 + $0xb50] sm:$0xff]  }
 0x1b5   : > { %7960 = vmatmul.mubr.bf16.vlgmr.msra.gmra.mrb[36].mxu1 %v2117_v58  ;;  %10537 = vmatprep.subr.bf16.mxu0 %v11666_v59  ;;  %v11704_v58 = vld [vmem:[%s12517_s5 + $0xb10] sm:$0xff]  }
 0x1b6   : > { %10558 = vmatpush3.bf16.msra.mxu1 %v11665_v57  ;;  %8039 = vmatprep.mubr.bf16.mxu1 %v2167_v44  ;;  %v11703_v57 = vld [vmem:[%s12517_s5 + $0xbd0] sm:$0xff]   ;;  %v11741_v44 = vld [vmem:[%s12517_s5 + $0xc18] sm:$0xff]  }
 0x1b7   : > { %10559 = vmatprep.subr.bf16.mxu1 %v11667_v60  ;;  %v11705_v59 = vld [vmem:[%s12517_s5 + $0xb90] sm:$0xff]   ;;  %v11706_v60 = vld [vmem:[%s12517_s5 + $0xb58] sm:$0xff]  }
 0x1b8   : > { %10538 = vmatpush3.bf16.msra.mxu0 %v11668_v55  ;;  %v11707_v55 = vld [vmem:[%s12517_s5 + $0xbd8] sm:$0xff]   ;;  %v11737_v39 = vld [vmem:[%s12517_s5 + $0xc10] sm:$0xff]  }
 0x1b9   : > { %10539 = vmatprep.subr.bf16.mxu0 %v11670_v62  ;;  %v11709_v62 = vld [vmem:[%s12517_s5 + $0xb98] sm:$0xff]  }
 0x1ba   : > { %10560 = vmatpush3.bf16.msra.mxu1 %v11669_v61  ;;  %v11708_v61 = vld [vmem:[%s12517_s5 + $0xb18] sm:$0xff]  }
 0x1bb   : > { %10561 = vmatprep.subr.bf16.mxu1 %v11671_v63  ;;  %v11710_v63 = vld [vmem:[%s12517_s5 + $0xb60] sm:$0xff]  }
 0x1bc   : > { %10540 = vmatpush3.bf16.msra.mxu0 %v11672_v0  ;;  %v11711_v0 = vld [vmem:[%s12517_s5 + $0xbe0] sm:$0xff]  }
 0x1bd   : > { %10541 = vmatprep.subr.bf16.mxu0 %v11674_v2  ;;  %v11713_v2 = vld [vmem:[%s12517_s5 + $0xba0] sm:$0xff]  }
 0x1be   : > { %10562 = vmatpush3.bf16.msra.mxu1 %v11673_v1  ;;  %v11712_v1 = vld [vmem:[%s12517_s5 + $0xb20] sm:$0xff]  }
 0x1bf   : > { %10563 = vmatprep.subr.bf16.mxu1 %v11675_v3  ;;  %v11714_v3 = vld [vmem:[%s12517_s5 + $0xb68] sm:$0xff]  }
 0x1c0   : > { %10542 = vmatpush3.bf16.msra.mxu0 %v11676_v4  ;;  %v11715_v4 = vld [vmem:[%s12517_s5 + $0xbe8] sm:$0xff]  }
 0x1c1   : > { %10543 = vmatprep.subr.bf16.mxu0 %v11678_v6  ;;  %v11717_v6 = vld [vmem:[%s12517_s5 + $0xba8] sm:$0xff]  }
 0x1c2   : > { %10564 = vmatpush3.bf16.msra.mxu1 %v11677_v5  ;;  %v11716_v5 = vld [vmem:[%s12517_s5 + $0xb28] sm:$0xff]  }
 0x1c3   : > { %10565 = vmatprep.subr.bf16.mxu1 %v11679_v7  ;;  %v11718_v7 = vld [vmem:[%s12517_s5 + $0xb70] sm:$0xff]  }
 0x1c4   : > { %10544 = vmatpush3.bf16.msra.mxu0 %v11680_v8 }
 0x1c5   : > { %10545 = vmatprep.subr.bf16.mxu0 %v11682_v10 }
 0x1c6   : > { %10566 = vmatpush3.bf16.msra.mxu1 %v11681_v9  ;;  %v10243_v15 = vpop.f32.mrb[12].mxu0  ;;  %v11719_v9 = vld [vmem:[%s12517_s5 + $0xbf0] sm:$0xff]  }
 0x1c7   : > { %v10244_v17 = vpop.f32.mrb[13].mxu0  ;;  %10567 = vmatprep.subr.bf16.mxu1 %v11683_v11  ;;  %v11720_v11 = vld [vmem:[%s12517_s5 + $0xb30] sm:$0xff]  }
 0x1c8   : > { %v10265_v20 = vpop.f32.mrb[12].mxu1  ;;  %v10245_v21 = vadd.f32 %v10244_v17, %v10243_v15  ;;  %v10246_v22 = vpop.f32.mrb[14].mxu0  ;;  %10546 = vmatpush3.bf16.msra.mxu0 %v11684_v12  ;;  %v11721_v15 = vld [vmem:[%s12517_s5 + $0xbb0] sm:$0xff]  }
 0x1c9   : > { %v10266_v25 = vpop.f32.mrb[13].mxu1  ;;  %v10247_v26 = vpop.f32.mrb[15].mxu0  ;;  %10547 = vmatprep.subr.bf16.mxu0 %v11686_v14  ;;  %v11723_v22 = vld [vmem:[%s12517_s5 + $0xbf8] sm:$0xff]  }
 0x1ca   : > { %v7442_v29 = vadd.f32 %v10245_v21, %v12935_v50  ;;  %v10267_v30 = vadd.f32 %v10266_v25, %v10265_v20  ;;  %v10268_v31 = vpop.f32.mrb[14].mxu1  ;;  %10568 = vmatpush3.bf16.msra.mxu1 %v11685_v13  ;;  %v11698_v50 = vld [vmem:[%s12517_s5 + $0xb48] sm:$0xff]   ;;  %v11725_v26 = vld [vmem:[%s12517_s5 + $0xbb8] sm:$0xff]  }
 0x1cb   : > { %v10269_v34 = vpop.f32.mrb[15].mxu1  ;;  %10569 = vmatprep.subr.bf16.mxu1 %v11687_v16  ;;  %v11722_v16 = vld [vmem:[%s12517_s5 + $0xb78] sm:$0xff]   ;;  %v11730_v31 = vld [vmem:[%s12517_s5 + $0xc80] sm:$0xff]  }
 0x1cc   : > { %v12977_v37 = vadd.f32 %v10267_v30, %v7442_v29  ;;  %10548 = vmatpush3.bf16.msra.mxu0 %v11688_v18  ;;  %v11728_v29 = vld [vmem:[%s12517_s5 + $0xcc0] sm:$0xff]   ;;  %v11732_v34 = vld [vmem:[%s12517_s5 + $0xcc8] sm:$0xff]  }
 0x1cd   : > { %10549 = vmatprep.subr.bf16.mxu0 %v11690_v28  ;;  %v11727_v28 = vld [vmem:[%s12517_s5 + $0xc40] sm:$0xff]  }
 0x1ce   : > { %10570 = vmatpush3.bf16.msra.mxu1 %v11689_v27  ;;  %v2150_v27 = vrot.slane %v12975_v36, %v12585_v42  ;;  %v11729_v30 = vld [vmem:[%s12517_s5 + $0xc00] sm:$0xff]   ;;  %v11734_v36 = vld [vmem:[%s12517_s5 + $0xc88] sm:$0xff]  }
 0x1cf   : > { %10571 = vmatprep.subr.bf16.mxu1 %v11691_v32 }
 0x1d0   : > { %10550 = vmatpush3.bf16.msra.mxu0 %v11692_v35  ;;  %v2166_v32 = vcombine.high %v2150_v27, %v2150_v27  ;;  %v11733_v35 = vld [vmem:[%s12517_s5 + $0xc08] sm:$0xff]  }
 0x1d1   : > { %10579 = vmatprep.subr.bf16.mxu0 %v11694_v41  ;;  %v11739_v41 = vld [vmem:[%s12517_s5 + $0xc58] sm:$0xff]  }
 0x1d2   : > { %10572 = vmatpush3.bf16.msra.mxu1 %v11693_v38  ;;  %v11736_v38 = vld [vmem:[%s12517_s5 + $0xcd0] sm:$0xff]  }
 0x1d3   : > { %8000 = vmatmul.mubr.bf16.vlgmr.msra.gmra.mrb[40].mxu0 %v2143_v40  ;;  %10601 = vmatprep.subr.bf16.mxu1 %v11695_v45  ;;  %v11738_v40 = vld [vmem:[%s12517_s5 + $0xc90] sm:$0xff]   ;;  %v11742_v45 = vld [vmem:[%s12517_s5 + $0xc98] sm:$0xff]  }
 0x1d4   : > { %10580 = vmatpush3.bf16.msra.mxu0 %v11696_v46  ;;  %8079 = vmatprep.mubr.bf16.mxu0 %v2164_v47  ;;  %v11743_v46 = vld [vmem:[%s12517_s5 + $0xc60] sm:$0xff]  }
 0x1d5   : > { %8040 = vmatmul.mubr.bf16.vlgmr.msra.gmra.mrb[40].mxu1 %v2165_v49  ;;  %10581 = vmatprep.subr.bf16.mxu0 %v11698_v50  ;;  %v11744_v47 = vld [vmem:[%s12517_s5 + $0xce0] sm:$0xff]   ;;  %v11747_v50 = vld [vmem:[%s12517_s5 + $0xc68] sm:$0xff]  }
 0x1d6   : > { %10602 = vmatpush3.bf16.msra.mxu1 %v11697_v48  ;;  %8119 = vmatprep.mubr.bf16.mxu1 %v2168_v52  ;;  %v11745_v48 = vld [vmem:[%s12517_s5 + $0xc20] sm:$0xff]   ;;  %v11749_v52 = vld [vmem:[%s12517_s5 + $0xc28] sm:$0xff]  }
 0x1d7   : > { %10603 = vmatprep.subr.bf16.mxu1 %v11699_v51  ;;  %v11746_v49 = vld [vmem:[%s12517_s5 + $0xca0] sm:$0xff]   ;;  %v11748_v51 = vld [vmem:[%s12517_s5 + $0xce8] sm:$0xff]  }
 0x1d8   : > { %10582 = vmatpush3.bf16.msra.mxu0 %v11700_v53  ;;  %v11750_v53 = vld [vmem:[%s12517_s5 + $0xca8] sm:$0xff]  }
 0x1d9   : > { %10583 = vmatprep.subr.bf16.mxu0 %v11702_v56 }
 0x1da   : > { %10604 = vmatpush3.bf16.msra.mxu1 %v11701_v54  ;;  %v11751_v54 = vld [vmem:[%s12517_s5 + $0xc70] sm:$0xff]  }
 0x1db   : > { %10605 = vmatprep.subr.bf16.mxu1 %v11703_v57  ;;  %v11752_v57 = vld [vmem:[%s12517_s5 + $0xcf0] sm:$0xff]  }
 0x1dc   : > { %10584 = vmatpush3.bf16.msra.mxu0 %v11704_v58 }
 0x1dd   : > { %10585 = vmatprep.subr.bf16.mxu0 %v11706_v60 }
 0x1de   : > { %10606 = vmatpush3.bf16.msra.mxu1 %v11705_v59  ;;  %v11753_v59 = vld [vmem:[%s12517_s5 + $0xc30] sm:$0xff]  }
 0x1df   : > { %10607 = vmatprep.subr.bf16.mxu1 %v11707_v55 }
 0x1e0   : > { %10586 = vmatpush3.bf16.msra.mxu0 %v11708_v61 }
 0x1e1   : > { %10587 = vmatprep.subr.bf16.mxu0 %v11710_v63  ;;  %v11755_v63 = vld [vmem:[%s12517_s5 + $0xc78] sm:$0xff]  }
 0x1e2   : > { %10608 = vmatpush3.bf16.msra.mxu1 %v11709_v62  ;;  %v11754_v62 = vld [vmem:[%s12517_s5 + $0xcb0] sm:$0xff]  }
 0x1e3   : > { %10609 = vmatprep.subr.bf16.mxu1 %v11711_v0  ;;  %v321_v0 = vld [vmem:[%s12536_s8 + $0x30] sm:$0xff] }
 0x1e4   : > { %10588 = vmatpush3.bf16.msra.mxu0 %v11712_v1 }
 0x1e5   : > { %10589 = vmatprep.subr.bf16.mxu0 %v11714_v3  ;;  %v2176_v3 = vrot.slane %v321_v0, %v12585_v42 }
 0x1e6   : > { %10610 = vmatpush3.bf16.msra.mxu1 %v11713_v2  ;;  %v10287_v8 = vpop.f32.mrb[16].mxu0 }
 0x1e7   : > { %v10288_v10 = vpop.f32.mrb[17].mxu0  ;;  %10611 = vmatprep.subr.bf16.mxu1 %v11715_v4  ;;  %v2169_v4 = vcombine.high %v321_v0, %v321_v0  ;;  %v11789_v0 = vld [vmem:[%s12517_s5 + $0xd38] sm:$0xff]  }
 0x1e8   : > { %v10309_v12 = vpop.f32.mrb[16].mxu1  ;;  %v10289_v13 = vadd.f32 %v10288_v10, %v10287_v8  ;;  %v10290_v14 = vpop.f32.mrb[18].mxu0  ;;  %10590 = vmatpush3.bf16.msra.mxu0 %v11716_v5  ;;  %v11756_v8 = vld [vmem:[%s12517_s5 + $0xcf8] sm:$0xff]  }
 0x1e9   : > { %v10310_v17 = vpop.f32.mrb[17].mxu1  ;;  %v10291_v18 = vpop.f32.mrb[19].mxu0  ;;  %10591 = vmatprep.subr.bf16.mxu0 %v11718_v7  ;;  %v11757_v10 = vld [vmem:[%s12517_s5 + $0xc38] sm:$0xff]  }
 0x1ea   : > { %v7522_v19 = vadd.f32 %v10289_v13, %v12977_v37  ;;  %v10311_v20 = vadd.f32 %v10310_v17, %v10309_v12  ;;  %v10312_v21 = vpop.f32.mrb[18].mxu1  ;;  %10612 = vmatpush3.bf16.msra.mxu1 %v11717_v6  ;;  %v11735_v37 = vld [vmem:[%s12517_s5 + $0xc50] sm:$0xff]   ;;  %v13057_v12 = vrot.slane %v2169_v4, %v12585_v42  ;;  %v11758_v14 = vld [vmem:[%s12517_s5 + $0xcb8] sm:$0xff]   ;;  %v11759_v17 = vld [vmem:[%s12517_s5 + $0xd40] sm:$0xff]  }
 0x1eb   : > { %v10313_v23 = vpop.f32.mrb[19].mxu1  ;;  %10613 = vmatprep.subr.bf16.mxu1 %v11719_v9  ;;  %v11761_v21 = vld [vmem:[%s12517_s5 + $0xd00] sm:$0xff]  }
 0x1ec   : > { %v13017_v25 = vadd.f32 %v10311_v20, %v7522_v19  ;;  %10592 = vmatpush3.bf16.msra.mxu0 %v11720_v11  ;;  %v2184_v11 = vcombine.high %v2176_v3, %v2176_v3  ;;  %v2185_v18 = vcombine.high %v13057_v12, %v13057_v12  ;;  %v11760_v19 = vld [vmem:[%s12517_s5 + $0xdc0] sm:$0xff]  }
 0x1ed   : > { %10593 = vmatprep.subr.bf16.mxu0 %v11722_v16  ;;  %v2192_v16 = vrot.slane %v2176_v3, %v12585_v42  ;;  %v11762_v23 = vld [vmem:[%s12517_s5 + $0xd80] sm:$0xff]   ;;  %v2199_v3 = vrot.slane %v13057_v12, %v12585_v42  ;;  %v11799_v12 = vld [vmem:[%s12517_s5 + $0xe88] sm:$0xff]  }
 0x1ee   : > { %10614 = vmatpush3.bf16.msra.mxu1 %v11721_v15  ;;  %v2206_v15 = vrot.slane %v2184_v11, %v12585_v42  ;;  %v11792_v4 = vld [vmem:[%s12517_s5 + $0xe40] sm:$0xff]   ;;  %v11798_v11 = vld [vmem:[%s12517_s5 + $0xe08] sm:$0xff]  }
 0x1ef   : > { %10615 = vmatprep.subr.bf16.mxu1 %v11723_v22  ;;  %v2213_v22 = vrot.slane %v2185_v18, %v12585_v42  ;;  %v11805_v18 = vld [vmem:[%s12517_s5 + $0xed8] sm:$0xff]  }
 0x1f0   : > { %10594 = vmatpush3.bf16.msra.mxu0 %v11724_v24  ;;  %v2216_v20 = vcombine.high %v2206_v15, %v2206_v15  ;;  %v2214_v24 = vcombine.high %v2192_v16, %v2192_v16 }
 0x1f1   : > { %10623 = vmatprep.subr.bf16.mxu0 %v11727_v28  ;;  %v11765_v28 = vld [vmem:[%s12517_s5 + $0xd08] sm:$0xff]  }
 0x1f2   : > { %10616 = vmatpush3.bf16.msra.mxu1 %v11725_v26  ;;  %v11764_v26 = vld [vmem:[%s12517_s5 + $0xdc8] sm:$0xff]  }
 0x1f3   : > { %8080 = vmatmul.mubr.bf16.vlgmr.msra.gmra.mrb[44].mxu0 %v2150_v27  ;;  %10645 = vmatprep.subr.bf16.mxu1 %v11728_v29  ;;  %v2217_v27 = vcombine.high %v2213_v22, %v2213_v22  ;;  %v11766_v29 = vld [vmem:[%s12517_s5 + $0xd88] sm:$0xff]  }
 0x1f4   : > { %10624 = vmatpush3.bf16.msra.mxu0 %v11729_v30  ;;  %8159 = vmatprep.mubr.bf16.mxu0 %v2206_v15  ;;  %v11767_v30 = vld [vmem:[%s12517_s5 + $0xd50] sm:$0xff]  }
 0x1f5   : > { %8120 = vmatmul.mubr.bf16.vlgmr.msra.gmra.mrb[44].mxu1 %v2166_v32  ;;  %10625 = vmatprep.subr.bf16.mxu0 %v11731_v33  ;;  %v11769_v32 = vld [vmem:[%s12517_s5 + $0xd10] sm:$0xff]  }
 0x1f6   : > { %10646 = vmatpush3.bf16.msra.mxu1 %v11730_v31  ;;  %8199 = vmatprep.mubr.bf16.mxu1 %v2216_v20  ;;  %v11768_v31 = vld [vmem:[%s12517_s5 + $0xdd0] sm:$0xff]   ;;  %v11807_v20 = vld [vmem:[%s12517_s5 + $0xe98] sm:$0xff]  }
 0x1f7   : > { %10647 = vmatprep.subr.bf16.mxu1 %v11732_v34  ;;  %v11770_v33 = vld [vmem:[%s12517_s5 + $0xd90] sm:$0xff]   ;;  %v11771_v34 = vld [vmem:[%s12517_s5 + $0xd58] sm:$0xff]  }
 0x1f8   : > { %10626 = vmatpush3.bf16.msra.mxu0 %v11733_v35  ;;  %v11772_v35 = vld [vmem:[%s12517_s5 + $0xdd8] sm:$0xff]   ;;  %v11802_v15 = vld [vmem:[%s12517_s5 + $0xe10] sm:$0xff]  }
 0x1f9   : > { %10627 = vmatprep.subr.bf16.mxu0 %v11735_v37  ;;  %v11774_v37 = vld [vmem:[%s12517_s5 + $0xd98] sm:$0xff]  }
 0x1fa   : > { %10648 = vmatpush3.bf16.msra.mxu1 %v11734_v36  ;;  %v11773_v36 = vld [vmem:[%s12517_s5 + $0xd18] sm:$0xff]  }
 0x1fb   : > { %10649 = vmatprep.subr.bf16.mxu1 %v11736_v38  ;;  %v11775_v38 = vld [vmem:[%s12517_s5 + $0xd60] sm:$0xff]  }
 0x1fc   : > { %10628 = vmatpush3.bf16.msra.mxu0 %v11737_v39  ;;  %v11776_v39 = vld [vmem:[%s12517_s5 + $0xde0] sm:$0xff]  }
 0x1fd   : > { %10629 = vmatprep.subr.bf16.mxu0 %v11739_v41  ;;  %v11778_v41 = vld [vmem:[%s12517_s5 + $0xda0] sm:$0xff]  }
 0x1fe   : > { %10650 = vmatpush3.bf16.msra.mxu1 %v11738_v40  ;;  %v11777_v40 = vld [vmem:[%s12517_s5 + $0xd20] sm:$0xff]  }
 0x1ff   : > { %10651 = vmatprep.subr.bf16.mxu1 %v11740_v43  ;;  %v11779_v43 = vld [vmem:[%s12517_s5 + $0xd68] sm:$0xff]  }
 0x200   : > { %10630 = vmatpush3.bf16.msra.mxu0 %v11741_v44  ;;  %v11780_v44 = vld [vmem:[%s12517_s5 + $0xde8] sm:$0xff]  }
 0x201   : > { %10631 = vmatprep.subr.bf16.mxu0 %v11743_v46  ;;  %v11782_v46 = vld [vmem:[%s12517_s5 + $0xda8] sm:$0xff]  }
 0x202   : > { %10652 = vmatpush3.bf16.msra.mxu1 %v11742_v45  ;;  %v11781_v45 = vld [vmem:[%s12517_s5 + $0xd28] sm:$0xff]  }
 0x203   : > { %10653 = vmatprep.subr.bf16.mxu1 %v11744_v47  ;;  %v11783_v47 = vld [vmem:[%s12517_s5 + $0xd70] sm:$0xff]  }
 0x204   : > { %10632 = vmatpush3.bf16.msra.mxu0 %v11745_v48 }
 0x205   : > { %10633 = vmatprep.subr.bf16.mxu0 %v11747_v50 }
 0x206   : > { %10654 = vmatpush3.bf16.msra.mxu1 %v11746_v49  ;;  %v10331_v56 = vpop.f32.mrb[20].mxu0  ;;  %v11784_v49 = vld [vmem:[%s12517_s5 + $0xdf0] sm:$0xff]  }
 0x207   : > { %v10332_v58 = vpop.f32.mrb[21].mxu0  ;;  %10655 = vmatprep.subr.bf16.mxu1 %v11748_v51  ;;  %v11785_v51 = vld [vmem:[%s12517_s5 + $0xd30] sm:$0xff]  }
 0x208   : > { %v10353_v60 = vpop.f32.mrb[20].mxu1  ;;  %v10333_v55 = vadd.f32 %v10332_v58, %v10331_v56  ;;  %v10334_v61 = vpop.f32.mrb[22].mxu0  ;;  %10634 = vmatpush3.bf16.msra.mxu0 %v11749_v52  ;;  %v11786_v56 = vld [vmem:[%s12517_s5 + $0xdb0] sm:$0xff]  }
 0x209   : > { %v10354_v1 = vpop.f32.mrb[21].mxu1  ;;  %v10335_v2 = vpop.f32.mrb[23].mxu0  ;;  %10635 = vmatprep.subr.bf16.mxu0 %v11751_v54 }
 0x20a   : > { %v7602_v5 = vadd.f32 %v10333_v55, %v13017_v25  ;;  %v10355_v6 = vadd.f32 %v10354_v1, %v10353_v60  ;;  %v10356_v7 = vpop.f32.mrb[22].mxu1  ;;  %10656 = vmatpush3.bf16.msra.mxu1 %v11750_v53  ;;  %v11763_v25 = vld [vmem:[%s12517_s5 + $0xd48] sm:$0xff]   ;;  %v11790_v2 = vld [vmem:[%s12517_s5 + $0xdb8] sm:$0xff]  }
 0x20b   : > { %v10357_v9 = vpop.f32.mrb[23].mxu1  ;;  %10657 = vmatprep.subr.bf16.mxu1 %v11752_v57  ;;  %v11787_v57 = vld [vmem:[%s12517_s5 + $0xd78] sm:$0xff]   ;;  %v11795_v7 = vld [vmem:[%s12517_s5 + $0xe80] sm:$0xff]  }
 0x20c   : > { %v13059_v13 = vadd.f32 %v10355_v6, %v7602_v5  ;;  %10636 = vmatpush3.bf16.msra.mxu0 %v11753_v59  ;;  %v11793_v5 = vld [vmem:[%s12517_s5 + $0xec0] sm:$0xff]   ;;  %v11796_v9 = vld [vmem:[%s12517_s5 + $0xe48] sm:$0xff]  }
 0x20d   : > { %10637 = vmatprep.subr.bf16.mxu0 %v11755_v63  ;;  %v11794_v6 = vld [vmem:[%s12517_s5 + $0xe00] sm:$0xff]  }
 0x20e   : > { %10658 = vmatpush3.bf16.msra.mxu1 %v11754_v62  ;;  %v11788_v62 = vld [vmem:[%s12517_s5 + $0xdf8] sm:$0xff]  }
 0x20f   : > { %10659 = vmatprep.subr.bf16.mxu1 %v11756_v8  ;;  %v2215_v8 = vcombine.high %v2199_v3, %v2199_v3 }
 0x210   : > { %10638 = vmatpush3.bf16.msra.mxu0 %v11757_v10  ;;  %v11797_v10 = vld [vmem:[%s12517_s5 + $0xec8] sm:$0xff]  }
 0x211   : > { %10667 = vmatprep.subr.bf16.mxu0 %v11759_v17  ;;  %v11804_v17 = vld [vmem:[%s12517_s5 + $0xe58] sm:$0xff]  }
 0x212   : > { %10660 = vmatpush3.bf16.msra.mxu1 %v11758_v14  ;;  %v11801_v14 = vld [vmem:[%s12517_s5 + $0xed0] sm:$0xff]  }
 0x213   : > { %8160 = vmatmul.mubr.bf16.vlgmr.msra.gmra.mrb[48].mxu0 %v2192_v16  ;;  %10689 = vmatprep.subr.bf16.mxu1 %v11760_v19  ;;  %v11803_v16 = vld [vmem:[%s12517_s5 + $0xe90] sm:$0xff]   ;;  %v11806_v19 = vld [vmem:[%s12517_s5 + $0xe18] sm:$0xff]  }
 0x214   : > { %10668 = vmatpush3.bf16.msra.mxu0 %v11761_v21  ;;  %8239 = vmatprep.mubr.bf16.mxu0 %v2213_v22  ;;  %v11808_v21 = vld [vmem:[%s12517_s5 + $0xe60] sm:$0xff]  }
 0x215   : > { %8200 = vmatmul.mubr.bf16.vlgmr.msra.gmra.mrb[48].mxu1 %v2214_v24  ;;  %10669 = vmatprep.subr.bf16.mxu0 %v11763_v25  ;;  %v11809_v22 = vld [vmem:[%s12517_s5 + $0xee0] sm:$0xff]   ;;  %v11812_v25 = vld [vmem:[%s12517_s5 + $0xe68] sm:$0xff]  }
 0x216   : > { %10690 = vmatpush3.bf16.msra.mxu1 %v11762_v23  ;;  %8279 = vmatprep.mubr.bf16.mxu1 %v2217_v27  ;;  %v11810_v23 = vld [vmem:[%s12517_s5 + $0xe20] sm:$0xff]   ;;  %v11814_v27 = vld [vmem:[%s12517_s5 + $0xe28] sm:$0xff]  }
 0x217   : > { %10691 = vmatprep.subr.bf16.mxu1 %v11764_v26  ;;  %v11811_v24 = vld [vmem:[%s12517_s5 + $0xea0] sm:$0xff]   ;;  %v11813_v26 = vld [vmem:[%s12517_s5 + $0xee8] sm:$0xff]  }
 0x218   : > { %10670 = vmatpush3.bf16.msra.mxu0 %v11765_v28  ;;  %v11815_v28 = vld [vmem:[%s12517_s5 + $0xea8] sm:$0xff]  }
 0x219   : > { %10671 = vmatprep.subr.bf16.mxu0 %v11767_v30 }
 0x21a   : > { %10692 = vmatpush3.bf16.msra.mxu1 %v11766_v29  ;;  %v11816_v29 = vld [vmem:[%s12517_s5 + $0xe70] sm:$0xff]  }
 0x21b   : > { %10693 = vmatprep.subr.bf16.mxu1 %v11768_v31  ;;  %v11817_v31 = vld [vmem:[%s12517_s5 + $0xef0] sm:$0xff]  }
 0x21c   : > { %10672 = vmatpush3.bf16.msra.mxu0 %v11769_v32 }
 0x21d   : > { %10673 = vmatprep.subr.bf16.mxu0 %v11771_v34 }
 0x21e   : > { %10694 = vmatpush3.bf16.msra.mxu1 %v11770_v33  ;;  %v11818_v33 = vld [vmem:[%s12517_s5 + $0xe30] sm:$0xff]  }
 0x21f   : > { %10695 = vmatprep.subr.bf16.mxu1 %v11772_v35 }
 0x220   : > { %10674 = vmatpush3.bf16.msra.mxu0 %v11773_v36 }
 0x221   : > { %10675 = vmatprep.subr.bf16.mxu0 %v11775_v38  ;;  %v11820_v38 = vld [vmem:[%s12517_s5 + $0xe78] sm:$0xff]  }
 0x222   : > { %10696 = vmatpush3.bf16.msra.mxu1 %v11774_v37  ;;  %v11819_v37 = vld [vmem:[%s12517_s5 + $0xeb0] sm:$0xff]  }
 0x223   : > { %10697 = vmatprep.subr.bf16.mxu1 %v11776_v39 }
 0x224   : > { %10676 = vmatpush3.bf16.msra.mxu0 %v11777_v40 }
 0x225   : > { %10677 = vmatprep.subr.bf16.mxu0 %v11779_v43 }
 0x226   : > { %10698 = vmatpush3.bf16.msra.mxu1 %v11778_v41  ;;  %v10375_v48 = vpop.f32.mrb[24].mxu0  ;;  %v11821_v41 = vld [vmem:[%s12517_s5 + $0xef8] sm:$0xff]  }
 0x227   : > { %v10376_v50 = vpop.f32.mrb[25].mxu0  ;;  %10699 = vmatprep.subr.bf16.mxu1 %v11780_v44 }
 0x228   : > { %v10397_v52 = vpop.f32.mrb[24].mxu1  ;;  %v10377_v53 = vadd.f32 %v10376_v50, %v10375_v48  ;;  %v10378_v54 = vpop.f32.mrb[26].mxu0  ;;  %10678 = vmatpush3.bf16.msra.mxu0 %v11781_v45  ;;  %v11822_v48 = vld [vmem:[%s12517_s5 + $0xe38] sm:$0xff]  }
 0x229   : > { %v10398_v58 = vpop.f32.mrb[25].mxu1  ;;  %v10379_v59 = vpop.f32.mrb[27].mxu0  ;;  %10679 = vmatprep.subr.bf16.mxu0 %v11783_v47 }
 0x22a   : > { %v7682_v60 = vadd.f32 %v10377_v53, %v13059_v13  ;;  %v10399_v55 = vadd.f32 %v10398_v58, %v10397_v52  ;;  %v10400_v61 = vpop.f32.mrb[26].mxu1  ;;  %10700 = vmatpush3.bf16.msra.mxu1 %v11782_v46  ;;  %v11800_v13 = vld [vmem:[%s12517_s5 + $0xe50] sm:$0xff]   ;;  %v11823_v52 = vld [vmem:[%s12517_s5 + $0xeb8] sm:$0xff]   ;;  %v11825_v58 = vld [vmem:[%s12517_s5 + $0xfc0] sm:$0xff]  }
 0x22b   : > { %v10401_v63 = vpop.f32.mrb[27].mxu1  ;;  %10701 = vmatprep.subr.bf16.mxu1 %v11784_v49  ;;  %v322_v46 = vld [vmem:[%s12536_s8 + $0x38] sm:$0xff]  ;;  %v11827_v61 = vld [vmem:[%s12517_s5 + $0xf80] sm:$0xff]  }
 0x22c   : > { %v13099_v1 = vadd.f32 %v10399_v55, %v7682_v60  ;;  %10680 = vmatpush3.bf16.msra.mxu0 %v11785_v51  ;;  %v2225_v49 = vrot.slane %v322_v46, %v12585_v42  ;;  %v2218_v50 = vcombine.high %v322_v46, %v322_v46  ;;  %v11826_v60 = vld [vmem:[%s12517_s5 + $0xf00] sm:$0xff]  }
 0x22d   : > { %10681 = vmatprep.subr.bf16.mxu0 %v11787_v57  ;;  %v11859_v46 = vld [vmem:[%s12517_s5 + $0x1000] sm:$0xff]  }
 0x22e   : > { %10702 = vmatpush3.bf16.msra.mxu1 %v11786_v56  ;;  %v2233_v53 = vcombine.high %v2225_v49, %v2225_v49  ;;  %v2241_v54 = vrot.slane %v2225_v49, %v12585_v42  ;;  %v11824_v56 = vld [vmem:[%s12517_s5 + $0xf40] sm:$0xff]   ;;  %v13144_v57 = vrot.slane %v2218_v50, %v12585_v42  ;;  %v11861_v49 = vld [vmem:[%s12517_s5 + $0x1048] sm:$0xff]  }
 0x22f   : > { %10703 = vmatprep.subr.bf16.mxu1 %v11788_v62  ;;  %v11862_v50 = vld [vmem:[%s12517_s5 + $0x10c8] sm:$0xff]  }
 0x230   : > { %10682 = vmatpush3.bf16.msra.mxu0 %v11789_v0  ;;  %v2255_v59 = vrot.slane %v2233_v53, %v12585_v42  ;;  %v2234_v55 = vcombine.high %v13144_v57, %v13144_v57  ;;  %v2263_v63 = vcombine.high %v2241_v54, %v2241_v54  ;;  %v11828_v0 = vld [vmem:[%s12517_s5 + $0xf48] sm:$0xff]   ;;  %v11865_v53 = vld [vmem:[%s12517_s5 + $0x1050] sm:$0xff]  }
 0x231   : > { %10711 = vmatprep.subr.bf16.mxu0 %v11792_v4 }
 0x232   : > { %10704 = vmatpush3.bf16.msra.mxu1 %v11790_v2  ;;  %v2265_v62 = vcombine.high %v2255_v59, %v2255_v59  ;;  %v11829_v2 = vld [vmem:[%s12517_s5 + $0xfc8] sm:$0xff]  }
 0x233   : > { %8240 = vmatmul.mubr.bf16.vlgmr.msra.gmra.mrb[52].mxu0 %v2199_v3  ;;  %10733 = vmatprep.subr.bf16.mxu1 %v11793_v5  ;;  %v11830_v3 = vld [vmem:[%s12517_s5 + $0xf08] sm:$0xff]  }
 0x234   : > { %10712 = vmatpush3.bf16.msra.mxu0 %v11794_v6  ;;  %8319 = vmatprep.mubr.bf16.mxu0 %v2255_v59  ;;  %v11831_v5 = vld [vmem:[%s12517_s5 + $0xf88] sm:$0xff]   ;;  %v11832_v6 = vld [vmem:[%s12517_s5 + $0xf50] sm:$0xff]   ;;  %v11870_v59 = vld [vmem:[%s12517_s5 + $0x10d8] sm:$0xff]  }
 0x235   : > { %8280 = vmatmul.mubr.bf16.vlgmr.msra.gmra.mrb[52].mxu1 %v2215_v8  ;;  %10713 = vmatprep.subr.bf16.mxu0 %v11796_v9  ;;  %v11834_v8 = vld [vmem:[%s12517_s5 + $0xf10] sm:$0xff]  }
 0x236   : > { %10734 = vmatpush3.bf16.msra.mxu1 %v11795_v7  ;;  %8359 = vmatprep.mubr.bf16.mxu1 %v2265_v62  ;;  %v11833_v7 = vld [vmem:[%s12517_s5 + $0xfd0] sm:$0xff]   ;;  %v11874_v62 = vld [vmem:[%s12517_s5 + $0x10e0] sm:$0xff]  }
 0x237   : > { %10735 = vmatprep.subr.bf16.mxu1 %v11797_v10  ;;  %v11835_v9 = vld [vmem:[%s12517_s5 + $0xf90] sm:$0xff]   ;;  %v11836_v10 = vld [vmem:[%s12517_s5 + $0xf58] sm:$0xff]  }
 0x238   : > { %10714 = vmatpush3.bf16.msra.mxu0 %v11798_v11  ;;  %v11837_v11 = vld [vmem:[%s12517_s5 + $0xfd8] sm:$0xff]  }
 0x239   : > { %10715 = vmatprep.subr.bf16.mxu0 %v11800_v13  ;;  %v11839_v13 = vld [vmem:[%s12517_s5 + $0xf98] sm:$0xff]  }
 0x23a   : > { %10736 = vmatpush3.bf16.msra.mxu1 %v11799_v12  ;;  %v11838_v12 = vld [vmem:[%s12517_s5 + $0xf18] sm:$0xff]  }
 0x23b   : > { %10737 = vmatprep.subr.bf16.mxu1 %v11801_v14  ;;  %v11840_v14 = vld [vmem:[%s12517_s5 + $0xf60] sm:$0xff]  }
 0x23c   : > { %10716 = vmatpush3.bf16.msra.mxu0 %v11802_v15  ;;  %v11841_v15 = vld [vmem:[%s12517_s5 + $0xfe0] sm:$0xff]  }
 0x23d   : > { %10717 = vmatprep.subr.bf16.mxu0 %v11804_v17  ;;  %v11843_v17 = vld [vmem:[%s12517_s5 + $0xfa0] sm:$0xff]  }
 0x23e   : > { %10738 = vmatpush3.bf16.msra.mxu1 %v11803_v16  ;;  %v11842_v16 = vld [vmem:[%s12517_s5 + $0xf20] sm:$0xff]  }
 0x23f   : > { %10739 = vmatprep.subr.bf16.mxu1 %v11805_v18  ;;  %v11844_v18 = vld [vmem:[%s12517_s5 + $0xf68] sm:$0xff]  }
 0x240   : > { %10718 = vmatpush3.bf16.msra.mxu0 %v11806_v19  ;;  %v11845_v19 = vld [vmem:[%s12517_s5 + $0xfe8] sm:$0xff]  }
 0x241   : > { %10719 = vmatprep.subr.bf16.mxu0 %v11808_v21  ;;  %v11847_v21 = vld [vmem:[%s12517_s5 + $0xfa8] sm:$0xff]  }
 0x242   : > { %10740 = vmatpush3.bf16.msra.mxu1 %v11807_v20  ;;  %v11846_v20 = vld [vmem:[%s12517_s5 + $0xf28] sm:$0xff]  }
 0x243   : > { %10741 = vmatprep.subr.bf16.mxu1 %v11809_v22  ;;  %v11848_v22 = vld [vmem:[%s12517_s5 + $0xf70] sm:$0xff]  }
 0x244   : > { %10720 = vmatpush3.bf16.msra.mxu0 %v11810_v23 }
 0x245   : > { %10721 = vmatprep.subr.bf16.mxu0 %v11812_v25 }
 0x246   : > { %10742 = vmatpush3.bf16.msra.mxu1 %v11811_v24  ;;  %v10419_v30 = vpop.f32.mrb[28].mxu0  ;;  %v11849_v24 = vld [vmem:[%s12517_s5 + $0xff0] sm:$0xff]  }
 0x247   : > { %v10420_v32 = vpop.f32.mrb[29].mxu0  ;;  %10743 = vmatprep.subr.bf16.mxu1 %v11813_v26  ;;  %v11850_v26 = vld [vmem:[%s12517_s5 + $0xf30] sm:$0xff]  }
 0x248   : > { %v10441_v34 = vpop.f32.mrb[28].mxu1  ;;  %v10421_v35 = vadd.f32 %v10420_v32, %v10419_v30  ;;  %v10422_v36 = vpop.f32.mrb[30].mxu0  ;;  %10722 = vmatpush3.bf16.msra.mxu0 %v11814_v27  ;;  %v11851_v30 = vld [vmem:[%s12517_s5 + $0xfb0] sm:$0xff]  }
 0x249   : > { %v10442_v39 = vpop.f32.mrb[29].mxu1  ;;  %v10423_v40 = vpop.f32.mrb[31].mxu0  ;;  %10723 = vmatprep.subr.bf16.mxu0 %v11816_v29 }
 0x24a   : > { %v7762_v43 = vadd.f32 %v10421_v35, %v13099_v1  ;;  %v10443_v44 = vadd.f32 %v10442_v39, %v10441_v34  ;;  %v10444_v45 = vpop.f32.mrb[30].mxu1  ;;  %10744 = vmatpush3.bf16.msra.mxu1 %v11815_v28  ;;  %v2262_v1 = vrot.slane %v2234_v55, %v12585_v42  ;;  %v11854_v39 = vld [vmem:[%s12517_s5 + $0xf38] sm:$0xff]  }
 0x24b   : > { %v10445_v47 = vpop.f32.mrb[31].mxu1  ;;  %10745 = vmatprep.subr.bf16.mxu1 %v11817_v31  ;;  %v11852_v31 = vld [vmem:[%s12517_s5 + $0xf78] sm:$0xff]   ;;  %v11858_v45 = vld [vmem:[%s12517_s5 + $0x10c0] sm:$0xff]  }
 0x24c   : > { %v13138_v51 = vadd.f32 %v10443_v44, %v7762_v43  ;;  %10724 = vmatpush3.bf16.msra.mxu0 %v11818_v33  ;;  %v2266_v4 = vcombine.high %v2262_v1, %v2262_v1  ;;  %v2248_v43 = vrot.slane %v13144_v57, %v12585_v42  ;;  %v11857_v44 = vld [vmem:[%s12517_s5 + $0x1040] sm:$0xff]   ;;  %v11868_v57 = vld [vmem:[%s12517_s5 + $0x1090] sm:$0xff]   ;;  %v11872_v55 = vld [vmem:[%s12517_s5 + $0x1098] sm:$0xff]  }
 0x24d   : > { %10725 = vmatprep.subr.bf16.mxu0 %v11820_v38  ;;  %v11860_v47 = vld [vmem:[%s12517_s5 + $0x1080] sm:$0xff]  }
 0x24e   : > { %10746 = vmatpush3.bf16.msra.mxu1 %v11819_v37  ;;  %v11853_v37 = vld [vmem:[%s12517_s5 + $0xff8] sm:$0xff]  }
 0x24f   : > { %10747 = vmatprep.subr.bf16.mxu1 %v11821_v41  ;;  %v11855_v41 = vld [vmem:[%s12517_s5 + $0xfb8] sm:$0xff]  }
 0x250   : > { %10726 = vmatpush3.bf16.msra.mxu0 %v11822_v48  ;;  %v2264_v48 = vcombine.high %v2248_v43, %v2248_v43 }
 0x251   : > { %10755 = vmatprep.subr.bf16.mxu0 %v11824_v56  ;;  %v11867_v56 = vld [vmem:[%s12517_s5 + $0x1010] sm:$0xff]  }
 0x252   : > { %10748 = vmatpush3.bf16.msra.mxu1 %v11823_v52  ;;  %v11864_v52 = vld [vmem:[%s12517_s5 + $0x1088] sm:$0xff]  }
 0x253   : > { %8320 = vmatmul.mubr.bf16.vlgmr.msra.gmra.mrb[56].mxu0 %v2241_v54  ;;  %10777 = vmatprep.subr.bf16.mxu1 %v11825_v58  ;;  %v11866_v54 = vld [vmem:[%s12517_s5 + $0x10d0] sm:$0xff]   ;;  %v11869_v58 = vld [vmem:[%s12517_s5 + $0x1058] sm:$0xff]  }
 0x254   : > { %10756 = vmatpush3.bf16.msra.mxu0 %v11826_v60  ;;  %8399 = vmatprep.mubr.bf16.mxu0 %v2262_v1  ;;  %v11871_v60 = vld [vmem:[%s12517_s5 + $0x1018] sm:$0xff]   ;;  %v11877_v1 = vld [vmem:[%s12517_s5 + $0x1068] sm:$0xff]  }
 0x255   : > { %8360 = vmatmul.mubr.bf16.vlgmr.msra.gmra.mrb[56].mxu1 %v2263_v63  ;;  %10757 = vmatprep.subr.bf16.mxu0 %v11828_v0  ;;  %v11875_v63 = vld [vmem:[%s12517_s5 + $0x1020] sm:$0xff]  }
 0x256   : > { %10778 = vmatpush3.bf16.msra.mxu1 %v11827_v61  ;;  %8439 = vmatprep.mubr.bf16.mxu1 %v2266_v4  ;;  %v11873_v61 = vld [vmem:[%s12517_s5 + $0x1060] sm:$0xff]   ;;  %v11880_v4 = vld [vmem:[%s12517_s5 + $0x10a8] sm:$0xff]  }
 0x257   : > { %10779 = vmatprep.subr.bf16.mxu1 %v11829_v2  ;;  %v11876_v0 = vld [vmem:[%s12517_s5 + $0x10a0] sm:$0xff]   ;;  %v11878_v2 = vld [vmem:[%s12517_s5 + $0x10e8] sm:$0xff]  }
 0x258   : > { %10758 = vmatpush3.bf16.msra.mxu0 %v11830_v3  ;;  %v11879_v3 = vld [vmem:[%s12517_s5 + $0x1028] sm:$0xff]  }
 0x259   : > { %10759 = vmatprep.subr.bf16.mxu0 %v11832_v6 }
 0x25a   : > { %10780 = vmatpush3.bf16.msra.mxu1 %v11831_v5  ;;  %v11881_v5 = vld [vmem:[%s12517_s5 + $0x1070] sm:$0xff]  }
 0x25b   : > { %10781 = vmatprep.subr.bf16.mxu1 %v11833_v7  ;;  %v11882_v7 = vld [vmem:[%s12517_s5 + $0x10f0] sm:$0xff]  }
 0x25c   : > { %10760 = vmatpush3.bf16.msra.mxu0 %v11834_v8 }
 0x25d   : > { %10761 = vmatprep.subr.bf16.mxu0 %v11836_v10 }
 0x25e   : > { %10782 = vmatpush3.bf16.msra.mxu1 %v11835_v9  ;;  %v11883_v9 = vld [vmem:[%s12517_s5 + $0x1030] sm:$0xff]  }
 0x25f   : > { %10783 = vmatprep.subr.bf16.mxu1 %v11837_v11 }
 0x260   : > { %10762 = vmatpush3.bf16.msra.mxu0 %v11838_v12 }
 0x261   : > { %10763 = vmatprep.subr.bf16.mxu0 %v11840_v14  ;;  %v11885_v14 = vld [vmem:[%s12517_s5 + $0x1078] sm:$0xff]  }
 0x262   : > { %10784 = vmatpush3.bf16.msra.mxu1 %v11839_v13  ;;  %v11884_v13 = vld [vmem:[%s12517_s5 + $0x10b0] sm:$0xff]  }
 0x263   : > { %10785 = vmatprep.subr.bf16.mxu1 %v11841_v15 }
 0x264   : > { %10764 = vmatpush3.bf16.msra.mxu0 %v11842_v16 }
 0x265   : > { %10765 = vmatprep.subr.bf16.mxu0 %v11844_v18 }
 0x266   : > { %10786 = vmatpush3.bf16.msra.mxu1 %v11843_v17  ;;  %v10463_v23 = vpop.f32.mrb[32].mxu0  ;;  %v11886_v17 = vld [vmem:[%s12517_s5 + $0x10f8] sm:$0xff]  }
 0x267   : > { %v10464_v25 = vpop.f32.mrb[33].mxu0  ;;  %10787 = vmatprep.subr.bf16.mxu1 %v11845_v19 }
 0x268   : > { %v10485_v27 = vpop.f32.mrb[32].mxu1  ;;  %v10465_v28 = vadd.f32 %v10464_v25, %v10463_v23  ;;  %v10466_v29 = vpop.f32.mrb[34].mxu0  ;;  %10766 = vmatpush3.bf16.msra.mxu0 %v11846_v20  ;;  %v323_v23 = vld [vmem:[%s12536_s8 + $0x40] sm:$0xff] }
 0x269   : > { %v10486_v32 = vpop.f32.mrb[33].mxu1  ;;  %v10467_v33 = vpop.f32.mrb[35].mxu0  ;;  %10767 = vmatprep.subr.bf16.mxu0 %v11848_v22  ;;  %v11888_v25 = vld [vmem:[%s12517_s5 + $0x10b8] sm:$0xff]  }
 0x26a   : > { %v7842_v34 = vadd.f32 %v10465_v28, %v13138_v51  ;;  %v10487_v35 = vadd.f32 %v10486_v32, %v10485_v27  ;;  %v10488_v36 = vpop.f32.mrb[34].mxu1  ;;  %10788 = vmatpush3.bf16.msra.mxu1 %v11847_v21  ;;  %v11863_v51 = vld [vmem:[%s12517_s5 + $0x1008] sm:$0xff]   ;;  %v11887_v21 = vld [vmem:[%s12517_s5 + $0x1038] sm:$0xff]   ;;  %v2267_v27 = vcombine.high %v323_v23, %v323_v23  ;;  %v11889_v28 = vld [vmem:[%s12517_s5 + $0x1140] sm:$0xff]  }
 0x26b   : > { %v10489_v38 = vpop.f32.mrb[35].mxu1  ;;  %10789 = vmatprep.subr.bf16.mxu1 %v11849_v24  ;;  %v11891_v33 = vld [vmem:[%s12517_s5 + $0x1100] sm:$0xff]  }
 0x26c   : > { %v13181_v40 = vadd.f32 %v10487_v35, %v7842_v34  ;;  %10768 = vmatpush3.bf16.msra.mxu0 %v11850_v26  ;;  %v2274_v26 = vrot.slane %v323_v23, %v12585_v42  ;;  %v13227_v32 = vrot.slane %v2267_v27, %v12585_v42  ;;  %v11892_v35 = vld [vmem:[%s12517_s5 + $0x1180] sm:$0xff]   ;;  %v11893_v38 = vld [vmem:[%s12517_s5 + $0x1148] sm:$0xff]  }
 0x26d   : > { %10769 = vmatprep.subr.bf16.mxu0 %v11852_v31  ;;  %v11890_v31 = vld [vmem:[%s12517_s5 + $0x11c0] sm:$0xff]   ;;  %v11929_v27 = vld [vmem:[%s12517_s5 + $0x1288] sm:$0xff]  }
 0x26e   : > { %10790 = vmatpush3.bf16.msra.mxu1 %v11851_v30  ;;  %v2282_v29 = vcombine.high %v2274_v26, %v2274_v26  ;;  %v2290_v30 = vrot.slane %v2274_v26, %v12585_v42  ;;  %v2283_v36 = vcombine.high %v13227_v32, %v13227_v32  ;;  %v11928_v26 = vld [vmem:[%s12517_s5 + $0x1208] sm:$0xff]  }
 0x26f   : > { %10791 = vmatprep.subr.bf16.mxu1 %v11853_v37 }
 0x270   : > { %10770 = vmatpush3.bf16.msra.mxu0 %v11854_v39  ;;  %v2304_v34 = vrot.slane %v2282_v29, %v12585_v42  ;;  %v2312_v37 = vcombine.high %v2290_v30, %v2290_v30  ;;  %v11931_v29 = vld [vmem:[%s12517_s5 + $0x12d0] sm:$0xff]  }
 0x271   : > { %10799 = vmatprep.subr.bf16.mxu0 %v11857_v44  ;;  %v11896_v44 = vld [vmem:[%s12517_s5 + $0x1188] sm:$0xff]  }
 0x272   : > { %10792 = vmatpush3.bf16.msra.mxu1 %v11855_v41  ;;  %v2314_v39 = vcombine.high %v2304_v34, %v2304_v34  ;;  %v2311_v41 = vrot.slane %v2283_v36, %v12585_v42  ;;  %v11938_v36 = vld [vmem:[%s12517_s5 + $0x1260] sm:$0xff]  }
 0x273   : > { %8400 = vmatmul.mubr.bf16.vlgmr.msra.gmra.mrb[60].mxu0 %v2248_v43  ;;  %10821 = vmatprep.subr.bf16.mxu1 %v11858_v45  ;;  %v11895_v43 = vld [vmem:[%s12517_s5 + $0x1108] sm:$0xff]  }
 0x274   : > { %10800 = vmatpush3.bf16.msra.mxu0 %v11859_v46  ;;  %8479 = vmatprep.mubr.bf16.mxu0 %v2304_v34  ;;  %v2315_v45 = vcombine.high %v2311_v41, %v2311_v41  ;;  %v11897_v46 = vld [vmem:[%s12517_s5 + $0x1150] sm:$0xff]   ;;  %v11936_v34 = vld [vmem:[%s12517_s5 + $0x1218] sm:$0xff]  }
 0x275   : > { %8440 = vmatmul.mubr.bf16.vlgmr.msra.gmra.mrb[60].mxu1 %v2264_v48  ;;  %10801 = vmatprep.subr.bf16.mxu0 %v11861_v49  ;;  %v11899_v48 = vld [vmem:[%s12517_s5 + $0x1110] sm:$0xff]  }
 0x276   : > { %10822 = vmatpush3.bf16.msra.mxu1 %v11860_v47  ;;  %8519 = vmatprep.mubr.bf16.mxu1 %v2314_v39  ;;  %v11898_v47 = vld [vmem:[%s12517_s5 + $0x11d0] sm:$0xff]   ;;  %v11941_v39 = vld [vmem:[%s12517_s5 + $0x12a0] sm:$0xff]  }
 0x277   : > { %10823 = vmatprep.subr.bf16.mxu1 %v11862_v50  ;;  %v11900_v49 = vld [vmem:[%s12517_s5 + $0x1190] sm:$0xff]   ;;  %v11901_v50 = vld [vmem:[%s12517_s5 + $0x1158] sm:$0xff]  }
 0x278   : > { %10802 = vmatpush3.bf16.msra.mxu0 %v11863_v51  ;;  %v11902_v51 = vld [vmem:[%s12517_s5 + $0x11d8] sm:$0xff]  }
 0x279   : > { %10803 = vmatprep.subr.bf16.mxu0 %v11865_v53  ;;  %v11904_v53 = vld [vmem:[%s12517_s5 + $0x1198] sm:$0xff]  }
 0x27a   : > { %10824 = vmatpush3.bf16.msra.mxu1 %v11864_v52  ;;  %v11903_v52 = vld [vmem:[%s12517_s5 + $0x1118] sm:$0xff]  }
 0x27b   : > { %10825 = vmatprep.subr.bf16.mxu1 %v11866_v54  ;;  %v11905_v54 = vld [vmem:[%s12517_s5 + $0x1160] sm:$0xff]  }
 0x27c   : > { %10804 = vmatpush3.bf16.msra.mxu0 %v11867_v56  ;;  %v11906_v56 = vld [vmem:[%s12517_s5 + $0x11e0] sm:$0xff]  }
 0x27d   : > { %10805 = vmatprep.subr.bf16.mxu0 %v11869_v58  ;;  %v11908_v58 = vld [vmem:[%s12517_s5 + $0x11a0] sm:$0xff]  }
 0x27e   : > { %10826 = vmatpush3.bf16.msra.mxu1 %v11868_v57  ;;  %v11907_v57 = vld [vmem:[%s12517_s5 + $0x1120] sm:$0xff]  }
 0x27f   : > { %10827 = vmatprep.subr.bf16.mxu1 %v11870_v59  ;;  %v11909_v59 = vld [vmem:[%s12517_s5 + $0x1168] sm:$0xff]  }
 0x280   : > { %10806 = vmatpush3.bf16.msra.mxu0 %v11871_v60  ;;  %v11910_v60 = vld [vmem:[%s12517_s5 + $0x11e8] sm:$0xff]  }
 0x281   : > { %10807 = vmatprep.subr.bf16.mxu0 %v11873_v61  ;;  %v11912_v61 = vld [vmem:[%s12517_s5 + $0x11a8] sm:$0xff]  }
 0x282   : > { %10828 = vmatpush3.bf16.msra.mxu1 %v11872_v55  ;;  %v11911_v55 = vld [vmem:[%s12517_s5 + $0x1128] sm:$0xff]  }
 0x283   : > { %10829 = vmatprep.subr.bf16.mxu1 %v11874_v62  ;;  %v11913_v62 = vld [vmem:[%s12517_s5 + $0x1170] sm:$0xff]  }
 0x284   : > { %10808 = vmatpush3.bf16.msra.mxu0 %v11875_v63 }
 0x285   : > { %10809 = vmatprep.subr.bf16.mxu0 %v11877_v1 }
 0x286   : > { %10830 = vmatpush3.bf16.msra.mxu1 %v11876_v0  ;;  %v10507_v6 = vpop.f32.mrb[36].mxu0  ;;  %v11914_v0 = vld [vmem:[%s12517_s5 + $0x11f0] sm:$0xff]  }
 0x287   : > { %v10508_v8 = vpop.f32.mrb[37].mxu0  ;;  %10831 = vmatprep.subr.bf16.mxu1 %v11878_v2  ;;  %v11915_v2 = vld [vmem:[%s12517_s5 + $0x1130] sm:$0xff]  }
 0x288   : > { %v10529_v10 = vpop.f32.mrb[36].mxu1  ;;  %v10509_v11 = vadd.f32 %v10508_v8, %v10507_v6  ;;  %v10510_v12 = vpop.f32.mrb[38].mxu0  ;;  %10810 = vmatpush3.bf16.msra.mxu0 %v11879_v3  ;;  %v11916_v6 = vld [vmem:[%s12517_s5 + $0x11b0] sm:$0xff]  }
 0x289   : > { %v10530_v15 = vpop.f32.mrb[37].mxu1  ;;  %v10511_v16 = vpop.f32.mrb[39].mxu0  ;;  %10811 = vmatprep.subr.bf16.mxu0 %v11881_v5 }
 0x28a   : > { %v7922_v18 = vadd.f32 %v10509_v11, %v13181_v40  ;;  %v10531_v19 = vadd.f32 %v10530_v15, %v10529_v10  ;;  %v10532_v20 = vpop.f32.mrb[38].mxu1  ;;  %10832 = vmatpush3.bf16.msra.mxu1 %v11880_v4  ;;  %v11894_v40 = vld [vmem:[%s12517_s5 + $0x11c8] sm:$0xff]   ;;  %v11919_v15 = vld [vmem:[%s12517_s5 + $0x1138] sm:$0xff]  }
 0x28b   : > { %v10533_v22 = vpop.f32.mrb[39].mxu1  ;;  %10833 = vmatprep.subr.bf16.mxu1 %v11882_v7  ;;  %v11917_v7 = vld [vmem:[%s12517_s5 + $0x1178] sm:$0xff]   ;;  %v11923_v20 = vld [vmem:[%s12517_s5 + $0x12c0] sm:$0xff]  }
 0x28c   : > { %v13219_v24 = vadd.f32 %v10531_v19, %v7922_v18  ;;  %10812 = vmatpush3.bf16.msra.mxu0 %v11883_v9  ;;  %v2297_v18 = vrot.slane %v13227_v32, %v12585_v42  ;;  %v11922_v19 = vld [vmem:[%s12517_s5 + $0x1240] sm:$0xff]   ;;  %v11934_v32 = vld [vmem:[%s12517_s5 + $0x1258] sm:$0xff]  }
 0x28d   : > { %10813 = vmatprep.subr.bf16.mxu0 %v11885_v14  ;;  %v11925_v22 = vld [vmem:[%s12517_s5 + $0x1280] sm:$0xff]  }
 0x28e   : > { %10834 = vmatpush3.bf16.msra.mxu1 %v11884_v13  ;;  %v11918_v13 = vld [vmem:[%s12517_s5 + $0x11f8] sm:$0xff]   ;;  %v2313_v23 = vcombine.high %v2297_v18, %v2297_v18 }
 0x28f   : > { %10835 = vmatprep.subr.bf16.mxu1 %v11886_v17  ;;  %v11920_v17 = vld [vmem:[%s12517_s5 + $0x11b8] sm:$0xff]  }
 0x290   : > { %10814 = vmatpush3.bf16.msra.mxu0 %v11887_v21  ;;  %v11924_v21 = vld [vmem:[%s12517_s5 + $0x1200] sm:$0xff]  }
 0x291   : > { %10843 = vmatprep.subr.bf16.mxu0 %v11889_v28  ;;  %v11930_v28 = vld [vmem:[%s12517_s5 + $0x1250] sm:$0xff]  }
 0x292   : > { %10836 = vmatpush3.bf16.msra.mxu1 %v11888_v25  ;;  %v11927_v25 = vld [vmem:[%s12517_s5 + $0x12c8] sm:$0xff]  }
 0x293   : > { %8480 = vmatmul.mubr.bf16.vlgmr.msra.gmra.mrb[64].mxu0 %v2290_v30  ;;  %10865 = vmatprep.subr.bf16.mxu1 %v11890_v31  ;;  %v11932_v30 = vld [vmem:[%s12517_s5 + $0x1210] sm:$0xff]  }
 0x294   : > { %10844 = vmatpush3.bf16.msra.mxu0 %v11891_v33  ;;  %8559 = vmatprep.mubr.bf16.mxu0 %v2311_v41  ;;  %v11933_v31 = vld [vmem:[%s12517_s5 + $0x1290] sm:$0xff]   ;;  %v11935_v33 = vld [vmem:[%s12517_s5 + $0x12d8] sm:$0xff]   ;;  %v11943_v41 = vld [vmem:[%s12517_s5 + $0x12e8] sm:$0xff]  }
 0x295   : > { %8520 = vmatmul.mubr.bf16.vlgmr.msra.gmra.mrb[64].mxu1 %v2312_v37  ;;  %10845 = vmatprep.subr.bf16.mxu0 %v11893_v38  ;;  %v11939_v37 = vld [vmem:[%s12517_s5 + $0x12e0] sm:$0xff]  }
 0x296   : > { %10866 = vmatpush3.bf16.msra.mxu1 %v11892_v35  ;;  %8599 = vmatprep.mubr.bf16.mxu1 %v2315_v45  ;;  %v11937_v35 = vld [vmem:[%s12517_s5 + $0x1298] sm:$0xff]   ;;  %v11940_v38 = vld [vmem:[%s12517_s5 + $0x1220] sm:$0xff]   ;;  %v11946_v45 = vld [vmem:[%s12517_s5 + $0x1270] sm:$0xff]  }
 0x297   : > { %10867 = vmatprep.subr.bf16.mxu1 %v11894_v40  ;;  %v11942_v40 = vld [vmem:[%s12517_s5 + $0x1268] sm:$0xff]  }
 0x298   : > { %10846 = vmatpush3.bf16.msra.mxu0 %v11895_v43  ;;  %v11944_v43 = vld [vmem:[%s12517_s5 + $0x1228] sm:$0xff]  }
 0x299   : > { %10847 = vmatprep.subr.bf16.mxu0 %v11897_v46 }
 0x29a   : > { %10868 = vmatpush3.bf16.msra.mxu1 %v11896_v44  ;;  %v11945_v44 = vld [vmem:[%s12517_s5 + $0x12a8] sm:$0xff]  }
 0x29b   : > { %10869 = vmatprep.subr.bf16.mxu1 %v11898_v47  ;;  %v11947_v47 = vld [vmem:[%s12517_s5 + $0x12f0] sm:$0xff]  }
 0x29c   : > { %10848 = vmatpush3.bf16.msra.mxu0 %v11899_v48 }
 0x29d   : > { %10849 = vmatprep.subr.bf16.mxu0 %v11901_v50 }
 0x29e   : > { %10870 = vmatpush3.bf16.msra.mxu1 %v11900_v49  ;;  %v11948_v49 = vld [vmem:[%s12517_s5 + $0x1230] sm:$0xff]  }
 0x29f   : > { %10871 = vmatprep.subr.bf16.mxu1 %v11902_v51 }
 0x2a0   : > { %10850 = vmatpush3.bf16.msra.mxu0 %v11903_v52 }
 0x2a1   : > { %10851 = vmatprep.subr.bf16.mxu0 %v11905_v54  ;;  %v11950_v54 = vld [vmem:[%s12517_s5 + $0x1278] sm:$0xff]  }
 0x2a2   : > { %10872 = vmatpush3.bf16.msra.mxu1 %v11904_v53  ;;  %v11949_v53 = vld [vmem:[%s12517_s5 + $0x12b0] sm:$0xff]  }
 0x2a3   : > { %10873 = vmatprep.subr.bf16.mxu1 %v11906_v56 }
 0x2a4   : > { %10852 = vmatpush3.bf16.msra.mxu0 %v11907_v57 }
 0x2a5   : > { %10853 = vmatprep.subr.bf16.mxu0 %v11909_v59 }
 0x2a6   : > { %10874 = vmatpush3.bf16.msra.mxu1 %v11908_v58  ;;  %v10551_v63 = vpop.f32.mrb[40].mxu0 }
 0x2a7   : > { %v10552_v1 = vpop.f32.mrb[41].mxu0  ;;  %10875 = vmatprep.subr.bf16.mxu1 %v11910_v60 }
 0x2a8   : > { %v10573_v3 = vpop.f32.mrb[40].mxu1  ;;  %v10553_v4 = vadd.f32 %v10552_v1, %v10551_v63  ;;  %v10554_v5 = vpop.f32.mrb[42].mxu0  ;;  %10854 = vmatpush3.bf16.msra.mxu0 %v11911_v55  ;;  %v11951_v55 = vld [vmem:[%s12517_s5 + $0x12f8] sm:$0xff]  }
 0x2a9   : > { %v10574_v8 = vpop.f32.mrb[41].mxu1  ;;  %v10555_v9 = vpop.f32.mrb[43].mxu0  ;;  %10855 = vmatprep.subr.bf16.mxu0 %v11913_v62  ;;  %v11952_v62 = vld [vmem:[%s12517_s5 + $0x1238] sm:$0xff]  }
 0x2aa   : > { %v8002_v10 = vadd.f32 %v10553_v4, %v13219_v24  ;;  %v10575_v11 = vadd.f32 %v10574_v8, %v10573_v3  ;;  %v10576_v12 = vpop.f32.mrb[42].mxu1  ;;  %10876 = vmatpush3.bf16.msra.mxu1 %v11912_v61  ;;  %v11926_v24 = vld [vmem:[%s12517_s5 + $0x1248] sm:$0xff]   ;;  %v11953_v4 = vld [vmem:[%s12517_s5 + $0x12b8] sm:$0xff]  }
 0x2ab   : > { %v10577_v14 = vpop.f32.mrb[43].mxu1  ;;  %10877 = vmatprep.subr.bf16.mxu1 %v11914_v0  ;;  %v324_v0 = vld [vmem:[%s12536_s8 + $0x48] sm:$0xff] }
 0x2ac   : > { %v13263_v16 = vadd.f32 %v10575_v11, %v8002_v10  ;;  %10856 = vmatpush3.bf16.msra.mxu0 %v11915_v2  ;;  %v2323_v1 = vrot.slane %v324_v0, %v12585_v42  ;;  %v11954_v2 = vld [vmem:[%s12517_s5 + $0x1340] sm:$0xff]   ;;  %v2316_v3 = vcombine.high %v324_v0, %v324_v0 }
 0x2ad   : > { %10857 = vmatprep.subr.bf16.mxu0 %v11917_v7  ;;  %v11955_v7 = vld [vmem:[%s12517_s5 + $0x13c0] sm:$0xff]  }
 0x2ae   : > { %10878 = vmatpush3.bf16.msra.mxu1 %v11916_v6  ;;  %v2331_v5 = vcombine.high %v2323_v1, %v2323_v1  ;;  %v2339_v6 = vrot.slane %v2323_v1, %v12585_v42  ;;  %v13309_v8 = vrot.slane %v2316_v3, %v12585_v42  ;;  %v11956_v10 = vld [vmem:[%s12517_s5 + $0x1300] sm:$0xff]   ;;  %v11992_v1 = vld [vmem:[%s12517_s5 + $0x14c8] sm:$0xff]   ;;  %v11995_v3 = vld [vmem:[%s12517_s5 + $0x1450] sm:$0xff]  }
 0x2af   : > { %10879 = vmatprep.subr.bf16.mxu1 %v11918_v13  ;;  %v11958_v13 = vld [vmem:[%s12517_s5 + $0x1348] sm:$0xff]   ;;  %v11990_v0 = vld [vmem:[%s12517_s5 + $0x1480] sm:$0xff]  }
 0x2b0   : > { %10858 = vmatpush3.bf16.msra.mxu0 %v11919_v15  ;;  %v2353_v9 = vrot.slane %v2331_v5, %v12585_v42  ;;  %v2332_v11 = vcombine.high %v13309_v8, %v13309_v8  ;;  %v2361_v12 = vcombine.high %v2339_v6, %v2339_v6  ;;  %v11957_v15 = vld [vmem:[%s12517_s5 + $0x1380] sm:$0xff]   ;;  %v11996_v5 = vld [vmem:[%s12517_s5 + $0x14d0] sm:$0xff]  }
 0x2b1   : > { %10887 = vmatprep.subr.bf16.mxu0 %v11922_v19 }
 0x2b2   : > { %10880 = vmatpush3.bf16.msra.mxu1 %v11920_v17  ;;  %v2363_v14 = vcombine.high %v2353_v9, %v2353_v9  ;;  %v11959_v17 = vld [vmem:[%s12517_s5 + $0x13c8] sm:$0xff]  }
 0x2b3   : > { %8560 = vmatmul.mubr.bf16.vlgmr.msra.gmra.mrb[68].mxu0 %v2297_v18  ;;  %10909 = vmatprep.subr.bf16.mxu1 %v11923_v20  ;;  %v11960_v18 = vld [vmem:[%s12517_s5 + $0x1308] sm:$0xff]   ;;  %v11962_v20 = vld [vmem:[%s12517_s5 + $0x1350] sm:$0xff]  }
 0x2b4   : > { %10888 = vmatpush3.bf16.msra.mxu0 %v11924_v21  ;;  %8639 = vmatprep.mubr.bf16.mxu0 %v2353_v9  ;;  %v11961_v21 = vld [vmem:[%s12517_s5 + $0x1388] sm:$0xff]   ;;  %v12000_v9 = vld [vmem:[%s12517_s5 + $0x14d8] sm:$0xff]  }
 0x2b5   : > { %8600 = vmatmul.mubr.bf16.vlgmr.msra.gmra.mrb[68].mxu1 %v2313_v23  ;;  %10889 = vmatprep.subr.bf16.mxu0 %v11926_v24  ;;  %v11964_v23 = vld [vmem:[%s12517_s5 + $0x1310] sm:$0xff]   ;;  %v11966_v24 = vld [vmem:[%s12517_s5 + $0x1358] sm:$0xff]  }
 0x2b6   : > { %10910 = vmatpush3.bf16.msra.mxu1 %v11925_v22  ;;  %8679 = vmatprep.mubr.bf16.mxu1 %v2363_v14  ;;  %v11963_v22 = vld [vmem:[%s12517_s5 + $0x13d0] sm:$0xff]   ;;  %v12005_v14 = vld [vmem:[%s12517_s5 + $0x1420] sm:$0xff]  }
 0x2b7   : > { %10911 = vmatprep.subr.bf16.mxu1 %v11927_v25  ;;  %v11965_v25 = vld [vmem:[%s12517_s5 + $0x1390] sm:$0xff]  }
 0x2b8   : > { %10890 = vmatpush3.bf16.msra.mxu0 %v11928_v26  ;;  %v11967_v26 = vld [vmem:[%s12517_s5 + $0x13d8] sm:$0xff]  }
 0x2b9   : > { %10891 = vmatprep.subr.bf16.mxu0 %v11930_v28  ;;  %v11970_v28 = vld [vmem:[%s12517_s5 + $0x1360] sm:$0xff]  }
 0x2ba   : > { %10912 = vmatpush3.bf16.msra.mxu1 %v11929_v27  ;;  %v11968_v27 = vld [vmem:[%s12517_s5 + $0x1318] sm:$0xff]  }
 0x2bb   : > { %10913 = vmatprep.subr.bf16.mxu1 %v11931_v29  ;;  %v11969_v29 = vld [vmem:[%s12517_s5 + $0x1398] sm:$0xff]  }
 0x2bc   : > { %10892 = vmatpush3.bf16.msra.mxu0 %v11932_v30  ;;  %v11971_v30 = vld [vmem:[%s12517_s5 + $0x13e0] sm:$0xff]  }
 0x2bd   : > { %10893 = vmatprep.subr.bf16.mxu0 %v11934_v32  ;;  %v11974_v32 = vld [vmem:[%s12517_s5 + $0x1368] sm:$0xff]  }
 0x2be   : > { %10914 = vmatpush3.bf16.msra.mxu1 %v11933_v31  ;;  %v11972_v31 = vld [vmem:[%s12517_s5 + $0x1320] sm:$0xff]  }
 0x2bf   : > { %10915 = vmatprep.subr.bf16.mxu1 %v11935_v33  ;;  %v11973_v33 = vld [vmem:[%s12517_s5 + $0x13a0] sm:$0xff]  }
 0x2c0   : > { %10894 = vmatpush3.bf16.msra.mxu0 %v11936_v34  ;;  %v11975_v34 = vld [vmem:[%s12517_s5 + $0x13e8] sm:$0xff]  }
 0x2c1   : > { %10895 = vmatprep.subr.bf16.mxu0 %v11938_v36 }
 0x2c2   : > { %10916 = vmatpush3.bf16.msra.mxu1 %v11937_v35  ;;  %v11976_v35 = vld [vmem:[%s12517_s5 + $0x1328] sm:$0xff]  }
 0x2c3   : > { %10917 = vmatprep.subr.bf16.mxu1 %v11939_v37  ;;  %v11978_v37 = vld [vmem:[%s12517_s5 + $0x1370] sm:$0xff]  }
 0x2c4   : > { %10896 = vmatpush3.bf16.msra.mxu0 %v11940_v38 }
 0x2c5   : > { %10897 = vmatprep.subr.bf16.mxu0 %v11942_v40 }
 0x2c6   : > { %10918 = vmatpush3.bf16.msra.mxu1 %v11941_v39  ;;  %v10595_v46 = vpop.f32.mrb[44].mxu0  ;;  %v11977_v39 = vld [vmem:[%s12517_s5 + $0x13a8] sm:$0xff]  }
 0x2c7   : > { %v10596_v48 = vpop.f32.mrb[45].mxu0  ;;  %10919 = vmatprep.subr.bf16.mxu1 %v11943_v41 }
 0x2c8   : > { %v10617_v50 = vpop.f32.mrb[44].mxu1  ;;  %v10597_v51 = vadd.f32 %v10596_v48, %v10595_v46  ;;  %v10598_v52 = vpop.f32.mrb[46].mxu0  ;;  %10898 = vmatpush3.bf16.msra.mxu0 %v11944_v43 }
 0x2c9   : > { %v10618_v56 = vpop.f32.mrb[45].mxu1  ;;  %v10599_v57 = vpop.f32.mrb[47].mxu0  ;;  %10899 = vmatprep.subr.bf16.mxu0 %v11946_v45  ;;  %v11980_v45 = vld [vmem:[%s12517_s5 + $0x1330] sm:$0xff]  }
 0x2ca   : > { %v8082_v58 = vadd.f32 %v10597_v51, %v13263_v16  ;;  %v10619_v59 = vadd.f32 %v10618_v56, %v10617_v50  ;;  %v10620_v60 = vpop.f32.mrb[46].mxu1  ;;  %10920 = vmatpush3.bf16.msra.mxu1 %v11945_v44  ;;  %v2360_v16 = vrot.slane %v2332_v11, %v12585_v42  ;;  %v11979_v44 = vld [vmem:[%s12517_s5 + $0x13f0] sm:$0xff]   ;;  %v11982_v51 = vld [vmem:[%s12517_s5 + $0x1378] sm:$0xff]   ;;  %v12003_v11 = vld [vmem:[%s12517_s5 + $0x1460] sm:$0xff]  }
 0x2cb   : > { %v10621_v61 = vpop.f32.mrb[47].mxu1  ;;  %10921 = vmatprep.subr.bf16.mxu1 %v11947_v47  ;;  %v11983_v56 = vld [vmem:[%s12517_s5 + $0x13f8] sm:$0xff]  }
 0x2cc   : > { %v13300_v63 = vadd.f32 %v10619_v59, %v8082_v58  ;;  %10900 = vmatpush3.bf16.msra.mxu0 %v11948_v49  ;;  %v2364_v19 = vcombine.high %v2360_v16, %v2360_v16  ;;  %v11984_v57 = vld [vmem:[%s12517_s5 + $0x1338] sm:$0xff]   ;;  %v2346_v58 = vrot.slane %v13309_v8, %v12585_v42  ;;  %v11987_v59 = vld [vmem:[%s12517_s5 + $0x1440] sm:$0xff]   ;;  %v11998_v8 = vld [vmem:[%s12517_s5 + $0x1490] sm:$0xff]  }
 0x2cd   : > { %10901 = vmatprep.subr.bf16.mxu0 %v11950_v54  ;;  %v11985_v60 = vld [vmem:[%s12517_s5 + $0x13b8] sm:$0xff]   ;;  %v11989_v61 = vld [vmem:[%s12517_s5 + $0x1400] sm:$0xff]  }
 0x2ce   : > { %10922 = vmatpush3.bf16.msra.mxu1 %v11949_v53  ;;  %v11981_v53 = vld [vmem:[%s12517_s5 + $0x13b0] sm:$0xff]  }
 0x2cf   : > { %10923 = vmatprep.subr.bf16.mxu1 %v11951_v55  ;;  %v11988_v55 = vld [vmem:[%s12517_s5 + $0x14c0] sm:$0xff]  }
 0x2d0   : > { %10902 = vmatpush3.bf16.msra.mxu0 %v11952_v62  ;;  %v2362_v62 = vcombine.high %v2346_v58, %v2346_v58 }
 0x2d1   : > { %10931 = vmatprep.subr.bf16.mxu0 %v11954_v2  ;;  %v11993_v2 = vld [vmem:[%s12517_s5 + $0x1408] sm:$0xff]  }
 0x2d2   : > { %10924 = vmatpush3.bf16.msra.mxu1 %v11953_v4  ;;  %v11994_v4 = vld [vmem:[%s12517_s5 + $0x1488] sm:$0xff]  }
 0x2d3   : > { %10953 = vmatprep.subr.bf16.mxu1 %v11955_v7  ;;  %8640 = vmatmul.mubr.bf16.vlgmr.msra.gmra.mrb[72].mxu0 %v2339_v6  ;;  %v11997_v6 = vld [vmem:[%s12517_s5 + $0x1410] sm:$0xff]   ;;  %v11999_v7 = vld [vmem:[%s12517_s5 + $0x1458] sm:$0xff]  }
 0x2d4   : > { %10932 = vmatpush3.bf16.msra.mxu0 %v11956_v10  ;;  %8719 = vmatprep.mubr.bf16.mxu0 %v2360_v16  ;;  %v12001_v10 = vld [vmem:[%s12517_s5 + $0x1418] sm:$0xff]   ;;  %v12006_v16 = vld [vmem:[%s12517_s5 + $0x14a0] sm:$0xff]  }
 0x2d5   : > { %8680 = vmatmul.mubr.bf16.vlgmr.msra.gmra.mrb[72].mxu1 %v2361_v12  ;;  %10933 = vmatprep.subr.bf16.mxu0 %v11958_v13  ;;  %v12002_v12 = vld [vmem:[%s12517_s5 + $0x1498] sm:$0xff]   ;;  %v12004_v13 = vld [vmem:[%s12517_s5 + $0x14e0] sm:$0xff]  }
 0x2d6   : > { %10954 = vmatpush3.bf16.msra.mxu1 %v11957_v15  ;;  %8759 = vmatprep.mubr.bf16.mxu1 %v2364_v19  ;;  %v12007_v15 = vld [vmem:[%s12517_s5 + $0x1468] sm:$0xff]  }
 0x2d7   : > { %10955 = vmatprep.subr.bf16.mxu1 %v11959_v17  ;;  %v12008_v17 = vld [vmem:[%s12517_s5 + $0x14e8] sm:$0xff]  }
 0x2d8   : > { %10934 = vmatpush3.bf16.msra.mxu0 %v11960_v18  ;;  %v12009_v18 = vld [vmem:[%s12517_s5 + $0x1428] sm:$0xff]  }
 0x2d9   : > { %10935 = vmatprep.subr.bf16.mxu0 %v11962_v20  ;;  %v12011_v20 = vld [vmem:[%s12517_s5 + $0x1470] sm:$0xff]  }
 0x2da   : > { %10956 = vmatpush3.bf16.msra.mxu1 %v11961_v21 }
 0x2db   : > { %10957 = vmatprep.subr.bf16.mxu1 %v11963_v22  ;;  %v12010_v22 = vld [vmem:[%s12517_s5 + $0x14a8] sm:$0xff]  }
 0x2dc   : > { %10936 = vmatpush3.bf16.msra.mxu0 %v11964_v23 }
 0x2dd   : > { %10937 = vmatprep.subr.bf16.mxu0 %v11966_v24 }
 0x2de   : > { %10958 = vmatpush3.bf16.msra.mxu1 %v11965_v25 }
 0x2df   : > { %10959 = vmatprep.subr.bf16.mxu1 %v11967_v26  ;;  %v12012_v26 = vld [vmem:[%s12517_s5 + $0x14f0] sm:$0xff]  }
 0x2e0   : > { %10938 = vmatpush3.bf16.msra.mxu0 %v11968_v27  ;;  %v12013_v27 = vld [vmem:[%s12517_s5 + $0x1430] sm:$0xff]  }
 0x2e1   : > { %10939 = vmatprep.subr.bf16.mxu0 %v11970_v28 }
 0x2e2   : > { %10960 = vmatpush3.bf16.msra.mxu1 %v11969_v29 }
 0x2e3   : > { %10961 = vmatprep.subr.bf16.mxu1 %v11971_v30  ;;  %v12014_v30 = vld [vmem:[%s12517_s5 + $0x14b0] sm:$0xff]  }
 0x2e4   : > { %10940 = vmatpush3.bf16.msra.mxu0 %v11972_v31 }
 0x2e5   : > { %10941 = vmatprep.subr.bf16.mxu0 %v11974_v32 }
 0x2e6   : > { %v10639_v36 = vpop.f32.mrb[48].mxu0  ;;  %10962 = vmatpush3.bf16.msra.mxu1 %v11973_v33 }
 0x2e7   : > { %v10640_v38 = vpop.f32.mrb[49].mxu0  ;;  %10963 = vmatprep.subr.bf16.mxu1 %v11975_v34  ;;  %v12015_v34 = vld [vmem:[%s12517_s5 + $0x1478] sm:$0xff]  }
 0x2e8   : > { %v10661_v40 = vpop.f32.mrb[48].mxu1  ;;  %v10641_v41 = vadd.f32 %v10640_v38, %v10639_v36  ;;  %v10642_v43 = vpop.f32.mrb[50].mxu0  ;;  %10942 = vmatpush3.bf16.msra.mxu0 %v11976_v35  ;;  %v12016_v36 = vld [vmem:[%s12517_s5 + $0x14f8] sm:$0xff]  }
 0x2e9   : > { %v10662_v46 = vpop.f32.mrb[49].mxu1  ;;  %v10643_v47 = vpop.f32.mrb[51].mxu0  ;;  %10943 = vmatprep.subr.bf16.mxu0 %v11978_v37  ;;  %v12017_v38 = vld [vmem:[%s12517_s5 + $0x1438] sm:$0xff]  }
 0x2ea   : > { %v8162_v48 = vadd.f32 %v10641_v41, %v13300_v63  ;;  %v10663_v49 = vadd.f32 %v10662_v46, %v10661_v40  ;;  %v10664_v50 = vpop.f32.mrb[50].mxu1  ;;  %10964 = vmatpush3.bf16.msra.mxu1 %v11977_v39  ;;  %v11991_v63 = vld [vmem:[%s12517_s5 + $0x1448] sm:$0xff]   ;;  %v12019_v41 = vld [vmem:[%s12517_s5 + $0x1540] sm:$0xff]  }
 0x2eb   : > { %v10665_v52 = vpop.f32.mrb[51].mxu1  ;;  %10965 = vmatprep.subr.bf16.mxu1 %v11979_v44  ;;  %v325_v39 = vld [vmem:[%s12536_s8 + $0x50] sm:$0xff]  ;;  %v12018_v44 = vld [vmem:[%s12517_s5 + $0x14b8] sm:$0xff]   ;;  %v12020_v47 = vld [vmem:[%s12517_s5 + $0x15c0] sm:$0xff]  }
 0x2ec   : > { %v13343_v54 = vadd.f32 %v10663_v49, %v8162_v48  ;;  %10944 = vmatpush3.bf16.msra.mxu0 %v11980_v45  ;;  %v2372_v40 = vrot.slane %v325_v39, %v12585_v42  ;;  %v2365_v43 = vcombine.high %v325_v39, %v325_v39  ;;  %v12021_v49 = vld [vmem:[%s12517_s5 + $0x1500] sm:$0xff]   ;;  %v12056_v39 = vld [vmem:[%s12517_s5 + $0x1648] sm:$0xff]  }
 0x2ed   : > { %10945 = vmatprep.subr.bf16.mxu0 %v11982_v51  ;;  %v12022_v51 = vld [vmem:[%s12517_s5 + $0x1580] sm:$0xff]  }
 0x2ee   : > { %10966 = vmatpush3.bf16.msra.mxu1 %v11981_v53  ;;  %v2380_v45 = vcombine.high %v2372_v40, %v2372_v40  ;;  %v2388_v46 = vrot.slane %v2372_v40, %v12585_v42  ;;  %v13391_v48 = vrot.slane %v2365_v43, %v12585_v42  ;;  %v12057_v40 = vld [vmem:[%s12517_s5 + $0x16c8] sm:$0xff]  }
 0x2ef   : > { %10967 = vmatprep.subr.bf16.mxu1 %v11983_v56  ;;  %v12059_v43 = vld [vmem:[%s12517_s5 + $0x1688] sm:$0xff]  }
 0x2f0   : > { %10946 = vmatpush3.bf16.msra.mxu0 %v11984_v57  ;;  %v2402_v50 = vrot.slane %v2380_v45, %v12585_v42  ;;  %v2381_v52 = vcombine.high %v13391_v48, %v13391_v48  ;;  %v2410_v53 = vcombine.high %v2388_v46, %v2388_v46  ;;  %v12024_v57 = vld [vmem:[%s12517_s5 + $0x15c8] sm:$0xff]   ;;  %v12061_v45 = vld [vmem:[%s12517_s5 + $0x16d0] sm:$0xff]  }
 0x2f1   : > { %10975 = vmatprep.subr.bf16.mxu0 %v11987_v59  ;;  %v12025_v59 = vld [vmem:[%s12517_s5 + $0x1508] sm:$0xff]  }
 0x2f2   : > { %10968 = vmatpush3.bf16.msra.mxu1 %v11985_v60  ;;  %v2412_v56 = vcombine.high %v2402_v50, %v2402_v50  ;;  %v12026_v60 = vld [vmem:[%s12517_s5 + $0x1588] sm:$0xff]  }
 0x2f3   : > { %8720 = vmatmul.mubr.bf16.vlgmr.msra.gmra.mrb[76].mxu0 %v2346_v58  ;;  %10997 = vmatprep.subr.bf16.mxu1 %v11988_v55  ;;  %v2409_v58 = vrot.slane %v2381_v52, %v12585_v42  ;;  %v12068_v52 = vld [vmem:[%s12517_s5 + $0x1660] sm:$0xff]  }
 0x2f4   : > { %10976 = vmatpush3.bf16.msra.mxu0 %v11989_v61  ;;  %8799 = vmatprep.mubr.bf16.mxu0 %v2402_v50  ;;  %v12027_v61 = vld [vmem:[%s12517_s5 + $0x1550] sm:$0xff]   ;;  %v12066_v50 = vld [vmem:[%s12517_s5 + $0x1618] sm:$0xff]  }
 0x2f5   : > { %8760 = vmatmul.mubr.bf16.vlgmr.msra.gmra.mrb[76].mxu1 %v2362_v62  ;;  %10977 = vmatprep.subr.bf16.mxu0 %v11991_v63  ;;  %v2413_v55 = vcombine.high %v2409_v58, %v2409_v58  ;;  %v12028_v62 = vld [vmem:[%s12517_s5 + $0x15d0] sm:$0xff]  }
 0x2f6   : > { %10998 = vmatpush3.bf16.msra.mxu1 %v11990_v0  ;;  %8839 = vmatprep.mubr.bf16.mxu1 %v2412_v56  ;;  %v12029_v63 = vld [vmem:[%s12517_s5 + $0x1510] sm:$0xff]   ;;  %v12071_v56 = vld [vmem:[%s12517_s5 + $0x16a0] sm:$0xff]  }
 0x2f7   : > { %10999 = vmatprep.subr.bf16.mxu1 %v11992_v1  ;;  %v12030_v0 = vld [vmem:[%s12517_s5 + $0x1590] sm:$0xff]   ;;  %v12031_v1 = vld [vmem:[%s12517_s5 + $0x1558] sm:$0xff]  }
 0x2f8   : > { %10978 = vmatpush3.bf16.msra.mxu0 %v11993_v2  ;;  %v12032_v2 = vld [vmem:[%s12517_s5 + $0x15d8] sm:$0xff]  }
 0x2f9   : > { %10979 = vmatprep.subr.bf16.mxu0 %v11995_v3  ;;  %v12033_v3 = vld [vmem:[%s12517_s5 + $0x1518] sm:$0xff]  }
 0x2fa   : > { %11000 = vmatpush3.bf16.msra.mxu1 %v11994_v4  ;;  %v12034_v4 = vld [vmem:[%s12517_s5 + $0x1598] sm:$0xff]  }
 0x2fb   : > { %11001 = vmatprep.subr.bf16.mxu1 %v11996_v5  ;;  %v12035_v5 = vld [vmem:[%s12517_s5 + $0x1560] sm:$0xff]  }
 0x2fc   : > { %10980 = vmatpush3.bf16.msra.mxu0 %v11997_v6  ;;  %v12036_v6 = vld [vmem:[%s12517_s5 + $0x15e0] sm:$0xff]  }
 0x2fd   : > { %10981 = vmatprep.subr.bf16.mxu0 %v11999_v7  ;;  %v12037_v7 = vld [vmem:[%s12517_s5 + $0x1520] sm:$0xff]  }
 0x2fe   : > { %11002 = vmatpush3.bf16.msra.mxu1 %v11998_v8  ;;  %v12038_v8 = vld [vmem:[%s12517_s5 + $0x15a0] sm:$0xff]  }
 0x2ff   : > { %11003 = vmatprep.subr.bf16.mxu1 %v12000_v9  ;;  %v12039_v9 = vld [vmem:[%s12517_s5 + $0x1568] sm:$0xff]  }
 0x300   : > { %10982 = vmatpush3.bf16.msra.mxu0 %v12001_v10  ;;  %v12040_v10 = vld [vmem:[%s12517_s5 + $0x15e8] sm:$0xff]  }
 0x301   : > { %10983 = vmatprep.subr.bf16.mxu0 %v12003_v11  ;;  %v12041_v11 = vld [vmem:[%s12517_s5 + $0x1528] sm:$0xff]  }
 0x302   : > { %11004 = vmatpush3.bf16.msra.mxu1 %v12002_v12 }
 0x303   : > { %11005 = vmatprep.subr.bf16.mxu1 %v12004_v13  ;;  %v12042_v13 = vld [vmem:[%s12517_s5 + $0x15a8] sm:$0xff]  }
 0x304   : > { %10984 = vmatpush3.bf16.msra.mxu0 %v12005_v14 }
 0x305   : > { %10985 = vmatprep.subr.bf16.mxu0 %v12007_v15  ;;  %v12043_v15 = vld [vmem:[%s12517_s5 + $0x1570] sm:$0xff]  }
 0x306   : > { %v10683_v19 = vpop.f32.mrb[52].mxu0  ;;  %11006 = vmatpush3.bf16.msra.mxu1 %v12006_v16 }
 0x307   : > { %v10684_v21 = vpop.f32.mrb[53].mxu0  ;;  %11007 = vmatprep.subr.bf16.mxu1 %v12008_v17 }
 0x308   : > { %v10705_v23 = vpop.f32.mrb[52].mxu1  ;;  %v10685_v24 = vadd.f32 %v10684_v21, %v10683_v19  ;;  %v10686_v25 = vpop.f32.mrb[54].mxu0  ;;  %10986 = vmatpush3.bf16.msra.mxu0 %v12009_v18  ;;  %v12044_v19 = vld [vmem:[%s12517_s5 + $0x15f0] sm:$0xff]  }
 0x309   : > { %v10706_v28 = vpop.f32.mrb[53].mxu1  ;;  %v10687_v29 = vpop.f32.mrb[55].mxu0  ;;  %10987 = vmatprep.subr.bf16.mxu0 %v12011_v20  ;;  %v12045_v20 = vld [vmem:[%s12517_s5 + $0x1530] sm:$0xff]  }
 0x30a   : > { %v8242_v31 = vadd.f32 %v10685_v24, %v13343_v54  ;;  %v10707_v32 = vadd.f32 %v10706_v28, %v10705_v23  ;;  %v10708_v33 = vpop.f32.mrb[54].mxu1  ;;  %11008 = vmatpush3.bf16.msra.mxu1 %v12010_v22  ;;  %v12023_v54 = vld [vmem:[%s12517_s5 + $0x1548] sm:$0xff]   ;;  %v12047_v28 = vld [vmem:[%s12517_s5 + $0x1578] sm:$0xff]  }
 0x30b   : > { %v10709_v35 = vpop.f32.mrb[55].mxu1  ;;  %11009 = vmatprep.subr.bf16.mxu1 %v12012_v26  ;;  %v12046_v26 = vld [vmem:[%s12517_s5 + $0x15b0] sm:$0xff]   ;;  %v2395_v33 = vrot.slane %v13391_v48, %v12585_v42  ;;  %v12064_v48 = vld [vmem:[%s12517_s5 + $0x1658] sm:$0xff]  }
 0x30c   : > { %v13381_v37 = vadd.f32 %v10707_v32, %v8242_v31  ;;  %10988 = vmatpush3.bf16.msra.mxu0 %v12013_v27  ;;  %v12049_v31 = vld [vmem:[%s12517_s5 + $0x1538] sm:$0xff]   ;;  %v12053_v35 = vld [vmem:[%s12517_s5 + $0x16c0] sm:$0xff]  }
 0x30d   : > { %10989 = vmatprep.subr.bf16.mxu0 %v12015_v34  ;;  %v12050_v32 = vld [vmem:[%s12517_s5 + $0x15b8] sm:$0xff]   ;;  %v12052_v34 = vld [vmem:[%s12517_s5 + $0x1640] sm:$0xff]  }
 0x30e   : > { %11010 = vmatpush3.bf16.msra.mxu1 %v12014_v30  ;;  %v12048_v30 = vld [vmem:[%s12517_s5 + $0x15f8] sm:$0xff]  }
 0x30f   : > { %11011 = vmatprep.subr.bf16.mxu1 %v12016_v36  ;;  %v12054_v36 = vld [vmem:[%s12517_s5 + $0x1600] sm:$0xff]  }
 0x310   : > { %10990 = vmatpush3.bf16.msra.mxu0 %v12017_v38  ;;  %v2411_v38 = vcombine.high %v2395_v33, %v2395_v33 }
 0x311   : > { %11019 = vmatprep.subr.bf16.mxu0 %v12019_v41  ;;  %v12058_v41 = vld [vmem:[%s12517_s5 + $0x1608] sm:$0xff]  }
 0x312   : > { %11012 = vmatpush3.bf16.msra.mxu1 %v12018_v44  ;;  %v12060_v44 = vld [vmem:[%s12517_s5 + $0x1650] sm:$0xff]  }
 0x313   : > { %11041 = vmatprep.subr.bf16.mxu1 %v12020_v47  ;;  %8800 = vmatmul.mubr.bf16.vlgmr.msra.gmra.mrb[80].mxu0 %v2388_v46  ;;  %v12062_v46 = vld [vmem:[%s12517_s5 + $0x1610] sm:$0xff]  }
 0x314   : > { %11020 = vmatpush3.bf16.msra.mxu0 %v12021_v49  ;;  %8879 = vmatprep.mubr.bf16.mxu0 %v2409_v58  ;;  %v12063_v47 = vld [vmem:[%s12517_s5 + $0x1690] sm:$0xff]   ;;  %v12065_v49 = vld [vmem:[%s12517_s5 + $0x16d8] sm:$0xff]   ;;  %v12073_v58 = vld [vmem:[%s12517_s5 + $0x16e8] sm:$0xff]  }
 0x315   : > { %8840 = vmatmul.mubr.bf16.vlgmr.msra.gmra.mrb[80].mxu1 %v2410_v53  ;;  %11021 = vmatprep.subr.bf16.mxu0 %v12023_v54  ;;  %v12069_v53 = vld [vmem:[%s12517_s5 + $0x16e0] sm:$0xff]  }
 0x316   : > { %11042 = vmatpush3.bf16.msra.mxu1 %v12022_v51  ;;  %8919 = vmatprep.mubr.bf16.mxu1 %v2413_v55  ;;  %v12067_v51 = vld [vmem:[%s12517_s5 + $0x1698] sm:$0xff]   ;;  %v12070_v54 = vld [vmem:[%s12517_s5 + $0x1620] sm:$0xff]   ;;  %v12075_v55 = vld [vmem:[%s12517_s5 + $0x16a8] sm:$0xff]  }
 0x317   : > { %11043 = vmatprep.subr.bf16.mxu1 %v12024_v57  ;;  %v12072_v57 = vld [vmem:[%s12517_s5 + $0x1668] sm:$0xff]  }
 0x318   : > { %11022 = vmatpush3.bf16.msra.mxu0 %v12025_v59  ;;  %v12074_v59 = vld [vmem:[%s12517_s5 + $0x1628] sm:$0xff]  }
 0x319   : > { %11023 = vmatprep.subr.bf16.mxu0 %v12027_v61 }
 0x31a   : > { %11044 = vmatpush3.bf16.msra.mxu1 %v12026_v60 }
 0x31b   : > { %11045 = vmatprep.subr.bf16.mxu1 %v12028_v62  ;;  %v12076_v62 = vld [vmem:[%s12517_s5 + $0x1670] sm:$0xff]  }
 0x31c   : > { %11024 = vmatpush3.bf16.msra.mxu0 %v12029_v63 }
 0x31d   : > { %11025 = vmatprep.subr.bf16.mxu0 %v12031_v1 }
 0x31e   : > { %11046 = vmatpush3.bf16.msra.mxu1 %v12030_v0 }
 0x31f   : > { %11047 = vmatprep.subr.bf16.mxu1 %v12032_v2  ;;  %v12077_v2 = vld [vmem:[%s12517_s5 + $0x16f0] sm:$0xff]  }
 0x320   : > { %11026 = vmatpush3.bf16.msra.mxu0 %v12033_v3  ;;  %v12078_v3 = vld [vmem:[%s12517_s5 + $0x1630] sm:$0xff]  }
 0x321   : > { %11027 = vmatprep.subr.bf16.mxu0 %v12035_v5 }
 0x322   : > { %11048 = vmatpush3.bf16.msra.mxu1 %v12034_v4 }
 0x323   : > { %11049 = vmatprep.subr.bf16.mxu1 %v12036_v6 }
 0x324   : > { %11028 = vmatpush3.bf16.msra.mxu0 %v12037_v7 }
 0x325   : > { %11029 = vmatprep.subr.bf16.mxu0 %v12039_v9  ;;  %v12079_v9 = vld [vmem:[%s12517_s5 + $0x16b0] sm:$0xff]  }
 0x326   : > { %v10727_v12 = vpop.f32.mrb[56].mxu0  ;;  %11050 = vmatpush3.bf16.msra.mxu1 %v12038_v8 }
 0x327   : > { %v10728_v14 = vpop.f32.mrb[57].mxu0  ;;  %11051 = vmatprep.subr.bf16.mxu1 %v12040_v10 }
 0x328   : > { %v10749_v16 = vpop.f32.mrb[56].mxu1  ;;  %v10729_v17 = vadd.f32 %v10728_v14, %v10727_v12  ;;  %v10730_v18 = vpop.f32.mrb[58].mxu0  ;;  %11030 = vmatpush3.bf16.msra.mxu0 %v12041_v11  ;;  %v12080_v11 = vld [vmem:[%s12517_s5 + $0x1678] sm:$0xff]  }
 0x329   : > { %v10750_v21 = vpop.f32.mrb[57].mxu1  ;;  %v10731_v22 = vpop.f32.mrb[59].mxu0  ;;  %11031 = vmatprep.subr.bf16.mxu0 %v12043_v15  ;;  %v12082_v14 = vld [vmem:[%s12517_s5 + $0x1638] sm:$0xff]  }
 0x32a   : > { %v8322_v23 = vadd.f32 %v10729_v17, %v13381_v37  ;;  %v10751_v24 = vadd.f32 %v10750_v21, %v10749_v16  ;;  %v10752_v25 = vpop.f32.mrb[58].mxu1  ;;  %11052 = vmatpush3.bf16.msra.mxu1 %v12042_v13  ;;  %v12055_v37 = vld [vmem:[%s12517_s5 + $0x1680] sm:$0xff]   ;;  %v12081_v13 = vld [vmem:[%s12517_s5 + $0x16f8] sm:$0xff]  }
 0x32b   : > { %v10753_v27 = vpop.f32.mrb[59].mxu1  ;;  %11053 = vmatprep.subr.bf16.mxu1 %v12044_v19  ;;  %v326_v15 = vld [vmem:[%s12536_s8 + $0x58] sm:$0xff]  ;;  %v12084_v17 = vld [vmem:[%s12517_s5 + $0x1740] sm:$0xff]  }
 0x32c   : > { %v13425_v29 = vadd.f32 %v10751_v24, %v8322_v23  ;;  %11032 = vmatpush3.bf16.msra.mxu0 %v12045_v20  ;;  %v2421_v16 = vrot.slane %v326_v15, %v12585_v42  ;;  %v2414_v18 = vcombine.high %v326_v15, %v326_v15  ;;  %v12083_v19 = vld [vmem:[%s12517_s5 + $0x16b8] sm:$0xff]   ;;  %v12085_v22 = vld [vmem:[%s12517_s5 + $0x17c0] sm:$0xff]  }
 0x32d   : > { %11033 = vmatprep.subr.bf16.mxu0 %v12047_v28  ;;  %v12086_v25 = vld [vmem:[%s12517_s5 + $0x1700] sm:$0xff]   ;;  %v12088_v28 = vld [vmem:[%s12517_s5 + $0x1748] sm:$0xff]  }
 0x32e   : > { %11054 = vmatpush3.bf16.msra.mxu1 %v12046_v26  ;;  %v2429_v20 = vcombine.high %v2421_v16, %v2421_v16  ;;  %v2437_v21 = vrot.slane %v2421_v16, %v12585_v42  ;;  %v13473_v23 = vrot.slane %v2414_v18, %v12585_v42 }
 0x32f   : > { %11055 = vmatprep.subr.bf16.mxu1 %v12048_v30  ;;  %v12087_v30 = vld [vmem:[%s12517_s5 + $0x1780] sm:$0xff]  }
 0x330   : > { %11034 = vmatpush3.bf16.msra.mxu0 %v12049_v31  ;;  %v2451_v24 = vrot.slane %v2429_v20, %v12585_v42  ;;  %v2430_v26 = vcombine.high %v13473_v23, %v13473_v23  ;;  %v2459_v27 = vcombine.high %v2437_v21, %v2437_v21 }
 0x331   : > { %11063 = vmatprep.subr.bf16.mxu0 %v12052_v34 }
 0x332   : > { %11056 = vmatpush3.bf16.msra.mxu1 %v12050_v32  ;;  %v2458_v31 = vrot.slane %v2430_v26, %v12585_v42  ;;  %v12089_v32 = vld [vmem:[%s12517_s5 + $0x17c8] sm:$0xff]  }
 0x333   : > { %8880 = vmatmul.mubr.bf16.vlgmr.msra.gmra.mrb[84].mxu0 %v2395_v33  ;;  %11085 = vmatprep.subr.bf16.mxu1 %v12053_v35  ;;  %v12090_v33 = vld [vmem:[%s12517_s5 + $0x1708] sm:$0xff]   ;;  %v12092_v35 = vld [vmem:[%s12517_s5 + $0x1750] sm:$0xff]  }
 0x334   : > { %11064 = vmatpush3.bf16.msra.mxu0 %v12054_v36  ;;  %8959 = vmatprep.mubr.bf16.mxu0 %v2451_v24  ;;  %v2462_v34 = vcombine.high %v2458_v31, %v2458_v31  ;;  %v12091_v36 = vld [vmem:[%s12517_s5 + $0x1788] sm:$0xff]  }
 0x335   : > { %8920 = vmatmul.mubr.bf16.vlgmr.msra.gmra.mrb[84].mxu1 %v2411_v38  ;;  %11065 = vmatprep.subr.bf16.mxu0 %v12056_v39  ;;  %v12094_v38 = vld [vmem:[%s12517_s5 + $0x1710] sm:$0xff]   ;;  %v12096_v39 = vld [vmem:[%s12517_s5 + $0x1758] sm:$0xff]  }
 0x336   : > { %11086 = vmatpush3.bf16.msra.mxu1 %v12055_v37  ;;  %v12093_v37 = vld [vmem:[%s12517_s5 + $0x17d0] sm:$0xff]  }
 0x337   : > { %11087 = vmatprep.subr.bf16.mxu1 %v12057_v40  ;;  %v12095_v40 = vld [vmem:[%s12517_s5 + $0x1790] sm:$0xff]  }
 0x338   : > { %11066 = vmatpush3.bf16.msra.mxu0 %v12058_v41  ;;  %v12097_v41 = vld [vmem:[%s12517_s5 + $0x17d8] sm:$0xff]  }
 0x339   : > { %11067 = vmatprep.subr.bf16.mxu0 %v12060_v44  ;;  %v12100_v44 = vld [vmem:[%s12517_s5 + $0x1760] sm:$0xff]  }
 0x33a   : > { %11088 = vmatpush3.bf16.msra.mxu1 %v12059_v43  ;;  %v12098_v43 = vld [vmem:[%s12517_s5 + $0x1718] sm:$0xff]  }
 0x33b   : > { %11089 = vmatprep.subr.bf16.mxu1 %v12061_v45  ;;  %v12099_v45 = vld [vmem:[%s12517_s5 + $0x1798] sm:$0xff]  }
 0x33c   : > { %11068 = vmatpush3.bf16.msra.mxu0 %v12062_v46  ;;  %v12101_v46 = vld [vmem:[%s12517_s5 + $0x17e0] sm:$0xff]  }
 0x33d   : > { %11069 = vmatprep.subr.bf16.mxu0 %v12064_v48  ;;  %v12104_v48 = vld [vmem:[%s12517_s5 + $0x1768] sm:$0xff]  }
 0x33e   : > { %11090 = vmatpush3.bf16.msra.mxu1 %v12063_v47  ;;  %v12102_v47 = vld [vmem:[%s12517_s5 + $0x1720] sm:$0xff]  }
 0x33f   : > { %11091 = vmatprep.subr.bf16.mxu1 %v12065_v49  ;;  %v12103_v49 = vld [vmem:[%s12517_s5 + $0x17a0] sm:$0xff]  }
 0x340   : > { %11070 = vmatpush3.bf16.msra.mxu0 %v12066_v50 }
 0x341   : > { %11071 = vmatprep.subr.bf16.mxu0 %v12068_v52 }
 0x342   : > { %11092 = vmatpush3.bf16.msra.mxu1 %v12067_v51  ;;  %v12105_v51 = vld [vmem:[%s12517_s5 + $0x17e8] sm:$0xff]  }
 0x343   : > { %11093 = vmatprep.subr.bf16.mxu1 %v12069_v53  ;;  %v12106_v53 = vld [vmem:[%s12517_s5 + $0x1728] sm:$0xff]  }
 0x344   : > { %11072 = vmatpush3.bf16.msra.mxu0 %v12070_v54 }
 0x345   : > { %11073 = vmatprep.subr.bf16.mxu0 %v12072_v57 }
 0x346   : > { %v10771_v60 = vpop.f32.mrb[60].mxu0  ;;  %11094 = vmatpush3.bf16.msra.mxu1 %v12071_v56 }
 0x347   : > { %v10772_v61 = vpop.f32.mrb[61].mxu0  ;;  %11095 = vmatprep.subr.bf16.mxu1 %v12073_v58  ;;  %v12107_v58 = vld [vmem:[%s12517_s5 + $0x17a8] sm:$0xff]  }
 0x348   : > { %v10793_v63 = vpop.f32.mrb[60].mxu1  ;;  %v10773_v0 = vadd.f32 %v10772_v61, %v10771_v60  ;;  %v10774_v1 = vpop.f32.mrb[62].mxu0  ;;  %11074 = vmatpush3.bf16.msra.mxu0 %v12074_v59  ;;  %v12108_v59 = vld [vmem:[%s12517_s5 + $0x1770] sm:$0xff]  }
 0x349   : > { %v10794_v4 = vpop.f32.mrb[61].mxu1  ;;  %v10775_v5 = vpop.f32.mrb[63].mxu0  ;;  %11075 = vmatprep.subr.bf16.mxu0 %v12076_v62 }
 0x34a   : > { %v8402_v6 = vadd.f32 %v10773_v0, %v13425_v29  ;;  %v10795_v7 = vadd.f32 %v10794_v4, %v10793_v63  ;;  %v10796_v8 = vpop.f32.mrb[62].mxu1  ;;  %11096 = vmatpush3.bf16.msra.mxu1 %v12075_v55  ;;  %v2461_v29 = vcombine.high %v2451_v24, %v2451_v24  ;;  %v12109_v0 = vld [vmem:[%s12517_s5 + $0x17f0] sm:$0xff]   ;;  %v12112_v4 = vld [vmem:[%s12517_s5 + $0x1778] sm:$0xff]  }
 0x34b   : > { %v10797_v10 = vpop.f32.mrb[63].mxu1  ;;  %11097 = vmatprep.subr.bf16.mxu1 %v12077_v2  ;;  %v12110_v2 = vld [vmem:[%s12517_s5 + $0x1730] sm:$0xff]   ;;  %v2444_v8 = vrot.slane %v13473_v23, %v12585_v42 }
 0x34c   : > { %v13462_v12 = vadd.f32 %v10795_v7, %v8402_v6  ;;  %11076 = vmatpush3.bf16.msra.mxu0 %v12078_v3  ;;  %8999 = vmatprep.mubr.bf16.mxu1 %v2461_v29  ;;  %v12111_v5 = vld [vmem:[%s12517_s5 + $0x17b0] sm:$0xff]   ;;  %v12113_v6 = vld [vmem:[%s12517_s5 + $0x17f8] sm:$0xff]  }
 0x34d   : > { %11077 = vmatprep.subr.bf16.mxu0 %v12080_v11  ;;  %v12114_v7 = vld [vmem:[%s12517_s5 + $0x1738] sm:$0xff]   ;;  %v2460_v10 = vcombine.high %v2444_v8, %v2444_v8 }
 0x34e   : > { %11098 = vmatpush3.bf16.msra.mxu1 %v12079_v9  ;;  %v12115_v9 = vld [vmem:[%s12517_s5 + $0x17b8] sm:$0xff]  }
 0x34f   : > { %11099 = vmatprep.subr.bf16.mxu1 %v12081_v13 }
 0x350   : > { %11078 = vmatpush3.bf16.msra.mxu0 %v12082_v14 }
 0x351   : > { %11107 = vmatprep.subr.bf16.mxu0 %v12084_v17 }
 0x352   : > { %11100 = vmatpush3.bf16.msra.mxu1 %v12083_v19 }
 0x353   : > { %11129 = vmatprep.subr.bf16.mxu1 %v12085_v22  ;;  %8960 = vmatmul.mubr.bf16.vlgmr.msra.gmra.mrb[88].mxu0 %v2437_v21 }
 0x354   : > { %11108 = vmatpush3.bf16.msra.mxu0 %v12086_v25  ;;  %9039 = vmatprep.mubr.bf16.mxu0 %v2458_v31 }
 0x355   : > { %9000 = vmatmul.mubr.bf16.vlgmr.msra.gmra.mrb[88].mxu1 %v2459_v27  ;;  %11109 = vmatprep.subr.bf16.mxu0 %v12088_v28 }
 0x356   : > { %11130 = vmatpush3.bf16.msra.mxu1 %v12087_v30  ;;  %9079 = vmatprep.mubr.bf16.mxu1 %v2462_v34 }
 0x357   : > { %11131 = vmatprep.subr.bf16.mxu1 %v12089_v32 }
 0x358   : > { %11110 = vmatpush3.bf16.msra.mxu0 %v12090_v33 }
 0x359   : > { %11111 = vmatprep.subr.bf16.mxu0 %v12092_v35 }
 0x35a   : > { %11132 = vmatpush3.bf16.msra.mxu1 %v12091_v36 }
 0x35b   : > { %11133 = vmatprep.subr.bf16.mxu1 %v12093_v37 }
 0x35c   : > { %11112 = vmatpush3.bf16.msra.mxu0 %v12094_v38 }
 0x35d   : > { %11113 = vmatprep.subr.bf16.mxu0 %v12096_v39 }
 0x35e   : > { %11134 = vmatpush3.bf16.msra.mxu1 %v12095_v40 }
 0x35f   : > { %11135 = vmatprep.subr.bf16.mxu1 %v12097_v41 }
 0x360   : > { %11114 = vmatpush3.bf16.msra.mxu0 %v12098_v43 }
 0x361   : > { %11115 = vmatprep.subr.bf16.mxu0 %v12100_v44 }
 0x362   : > { %11136 = vmatpush3.bf16.msra.mxu1 %v12099_v45 }
 0x363   : > { %11137 = vmatprep.subr.bf16.mxu1 %v12101_v46 }
 0x364   : > { %11116 = vmatpush3.bf16.msra.mxu0 %v12102_v47 }
 0x365   : > { %11117 = vmatprep.subr.bf16.mxu0 %v12104_v48 }
 0x366   : > { %v10815_v50 = vpop.f32.mrb[64].mxu0  ;;  %11138 = vmatpush3.bf16.msra.mxu1 %v12103_v49 }
 0x367   : > { %v10816_v52 = vpop.f32.mrb[65].mxu0  ;;  %11139 = vmatprep.subr.bf16.mxu1 %v12105_v51 }
 0x368   : > { %v10837_v54 = vpop.f32.mrb[64].mxu1  ;;  %v10817_v56 = vadd.f32 %v10816_v52, %v10815_v50  ;;  %v10818_v57 = vpop.f32.mrb[66].mxu0  ;;  %11118 = vmatpush3.bf16.msra.mxu0 %v12106_v53 }
 0x369   : > { %v10838_v60 = vpop.f32.mrb[65].mxu1  ;;  %v10819_v55 = vpop.f32.mrb[67].mxu0  ;;  %11119 = vmatprep.subr.bf16.mxu0 %v12108_v59 }
 0x36a   : > { %v8482_v61 = vadd.f32 %v10817_v56, %v13462_v12  ;;  %v10839_v62 = vadd.f32 %v10838_v60, %v10837_v54  ;;  %v10840_v63 = vpop.f32.mrb[66].mxu1  ;;  %11140 = vmatpush3.bf16.msra.mxu1 %v12107_v58 }
 0x36b   : > { %v10841_v1 = vpop.f32.mrb[67].mxu1  ;;  %11141 = vmatprep.subr.bf16.mxu1 %v12109_v0 }
 0x36c   : > { %v8522_v3 = vadd.f32 %v10839_v62, %v8482_v61  ;;  %11120 = vmatpush3.bf16.msra.mxu0 %v12110_v2 }
 0x36d   : > { %11121 = vmatprep.subr.bf16.mxu0 %v12112_v4 }
 0x36e   : > { %11142 = vmatpush3.bf16.msra.mxu1 %v12111_v5 }
 0x36f   : > { %11143 = vmatprep.subr.bf16.mxu1 %v12113_v6 }
 0x370   : > { %11122 = vmatpush3.bf16.msra.mxu0 %v12114_v7 }
 0x372   : > { %11144 = vmatpush3.bf16.msra.mxu1 %v12115_v9 }
 0x373   : > { %9040 = vmatmul.mubr.bf16.vlgmr.msra.gmra.mrb[92].mxu0 %v2444_v8 }
 0x375   : > { %9080 = vmatmul.mubr.bf16.vlgmr.msra.gmra.mrb[92].mxu1 %v2460_v10 }
 0x386   : > { %v10859_v11 = vpop.f32.mrb[68].mxu0 }
 0x387   : > { %v10860_v12 = vpop.f32.mrb[69].mxu0 }
 0x388   : > { %v10881_v13 = vpop.f32.mrb[68].mxu1  ;;  %v10861_v14 = vadd.f32 %v10860_v12, %v10859_v11  ;;  %v10862_v15 = vpop.f32.mrb[70].mxu0 }
 0x389   : > { %v10882_v16 = vpop.f32.mrb[69].mxu1  ;;  %v10863_v17 = vpop.f32.mrb[71].mxu0 }
 0x38a   : > { %v8562_v18 = vadd.f32 %v10861_v14, %v8522_v3  ;;  %v10883_v19 = vadd.f32 %v10882_v16, %v10881_v13  ;;  %v10884_v20 = vpop.f32.mrb[70].mxu1 }
 0x38b   : > { %v10885_v21 = vpop.f32.mrb[71].mxu1 }
 0x38c   : > { %v8602_v42 = vadd.f32 %v10883_v19, %v8562_v18 }
 0x3a6   : > { %v10903_v22 = vpop.f32.mrb[72].mxu0 }
 0x3a7   : > { %v10904_v23 = vpop.f32.mrb[73].mxu0 }
 0x3a8   : > { %v10925_v24 = vpop.f32.mrb[72].mxu1  ;;  %v10905_v25 = vadd.f32 %v10904_v23, %v10903_v22  ;;  %v10906_v26 = vpop.f32.mrb[74].mxu0 }
 0x3a9   : > { %v10926_v27 = vpop.f32.mrb[73].mxu1  ;;  %v10907_v28 = vpop.f32.mrb[75].mxu0 }
 0x3aa   : > { %v8642_v29 = vadd.f32 %v10905_v25, %v8602_v42  ;;  %v10927_v30 = vadd.f32 %v10926_v27, %v10925_v24  ;;  %v10928_v31 = vpop.f32.mrb[74].mxu1  ;;  %v314_v28 = vld [vmem:[#allocation2] sm:$0x3] }
 0x3ab   : > { %v10929_v32 = vpop.f32.mrb[75].mxu1 }
 0x3ac   : > { %v8682_v33 = vadd.f32 %v10927_v30, %v8642_v29  ;;  %v9103_v32 = vld [vmem:[%s12541_s30] sm:$0xff] (!%p10090_p11) }
 0x3c6   : > { %v10947_v34 = vpop.f32.mrb[76].mxu0 }
 0x3c7   : > { %v10948_v35 = vpop.f32.mrb[77].mxu0 }
 0x3c8   : > { %v10969_v36 = vpop.f32.mrb[76].mxu1  ;;  %v10949_v37 = vadd.f32 %v10948_v35, %v10947_v34  ;;  %v10950_v38 = vpop.f32.mrb[78].mxu0  ;;  %v9105_v34 = vld [vmem:[%s12541_s30 + $0x10] sm:$0xff] (!%p10090_p11)  ;;  %v12280_v35 = vmov (!%p10090_p11), 0.0|0.0  }
 0x3c9   : > { %v10970_v39 = vpop.f32.mrb[77].mxu1  ;;  %v10951_v40 = vpop.f32.mrb[79].mxu0  ;;  %11203 = vmatprep.subr.bf16.mxu0 (!%p10090_p11), %v12280_v35  ;;  %v12282_v38 = vmov (!%p10090_p11), 0.0  }
 0x3ca   : > { %v8722_v41 = vadd.f32 %v10949_v37, %v8682_v33  ;;  %v10971_v43 = vadd.f32 %v10970_v39, %v10969_v36  ;;  %v10972_v44 = vpop.f32.mrb[78].mxu1  ;;  %v9104_v33 = vld [vmem:[%s12541_s30 + $0x8] sm:$0xff] (!%p10090_p11)  ;;  %v9106_v37 = vld [vmem:[%s12541_s30 + $0x18] sm:$0xff] (!%p10090_p11)  ;;  %11200 = vmatprep.mubr.msk.f32.mxu0 (!%p10090_p11), %vm12281_vm0, %v12282_v38  ;;  %v9107_v40 = vld [vmem:[%s12541_s30 + $0x20] sm:$0xff] (!%p10090_p11) }
 0x3cb   : > { %v10973_v45 = vpop.f32.mrb[79].mxu1  ;;  %v11204_v36 = vpack.c.bf16 (!%p10090_p11), %v9104_v33, %v9103_v32  ;;  %v11207_v39 = vpack.c.bf16 (!%p10090_p11), %v9106_v37, %v9105_v34  ;;  %v9109_v44 = vld [vmem:[%s12541_s30 + $0x30] sm:$0xff] (!%p10090_p11) }
 0x3cc   : > { %v8762_v46 = vadd.f32 %v10971_v43, %v8722_v41  ;;  %v9108_v41 = vld [vmem:[%s12541_s30 + $0x28] sm:$0xff] (!%p10090_p11)  ;;  %v9110_v45 = vld [vmem:[%s12541_s30 + $0x38] sm:$0xff] (!%p10090_p11) }
 0x3cd   : > { %11205 = vmatpush3.bf16.msra.mxu0 (!%p10090_p11), %v11204_v36  ;;  %v11210_v43 = vpack.c.bf16 (!%p10090_p11), %v9108_v41, %v9107_v40 }
 0x3ce   : > { %11206 = vmatprep.subr.bf16.mxu0 (!%p10090_p11), %v12280_v35 }
 0x3d1   : > { %11208 = vmatpush3.bf16.msra.mxu0 (!%p10090_p11), %v11207_v39 }
 0x3d2   : > { %11209 = vmatprep.subr.bf16.mxu0 (!%p10090_p11), %v12280_v35 }
 0x3d5   : > { %11211 = vmatpush3.bf16.msra.mxu0 (!%p10090_p11), %v11210_v43 }
 0x3d6   : > { %11212 = vmatprep.subr.bf16.mxu0 (!%p10090_p11), %v12280_v35 }
 0x3e6   : > { %v10991_v47 = vpop.f32.mrb[80].mxu0 }
 0x3e7   : > { %v10992_v48 = vpop.f32.mrb[81].mxu0 }
 0x3e8   : > { %v11013_v49 = vpop.f32.mrb[80].mxu1  ;;  %v10993_v50 = vadd.f32 %v10992_v48, %v10991_v47  ;;  %v10994_v51 = vpop.f32.mrb[82].mxu0  ;;  %v9111_v47 = vld [vmem:[%s12541_s30 + $0x40] sm:$0xff] (!%p10090_p11)  ;;  %v9112_v48 = vld [vmem:[%s12541_s30 + $0x48] sm:$0xff] (!%p10090_p11) }
 0x3e9   : > { %v11014_v52 = vpop.f32.mrb[81].mxu1  ;;  %v10995_v53 = vpop.f32.mrb[83].mxu0  ;;  %v9114_v51 = vld [vmem:[%s12541_s30 + $0x58] sm:$0xff] (!%p10090_p11) }
 0x3ea   : > { %v8802_v54 = vadd.f32 %v10993_v50, %v8762_v46  ;;  %v11015_v56 = vadd.f32 %v11014_v52, %v11013_v49  ;;  %v11016_v57 = vpop.f32.mrb[82].mxu1  ;;  %v11213_v46 = vpack.c.bf16 (!%p10090_p11), %v9110_v45, %v9109_v44  ;;  %v11216_v49 = vpack.c.bf16 (!%p10090_p11), %v9112_v48, %v9111_v47  ;;  %v9113_v50 = vld [vmem:[%s12541_s30 + $0x50] sm:$0xff] (!%p10090_p11)  ;;  %v9115_v53 = vld [vmem:[%s12541_s30 + $0x60] sm:$0xff] (!%p10090_p11) }
 0x3eb   : > { %v11017_v58 = vpop.f32.mrb[83].mxu1  ;;  %v11219_v52 = vpack.c.bf16 (!%p10090_p11), %v9114_v51, %v9113_v50 }
 0x3ec   : > { %v8842_v59 = vadd.f32 %v11015_v56, %v8802_v54  ;;  %11214 = vmatpush3.bf16.msra.mxu0 (!%p10090_p11), %v11213_v46  ;;  %v9116_v54 = vld [vmem:[%s12541_s30 + $0x68] sm:$0xff] (!%p10090_p11)  ;;  %v10091_v58 = vld [vmem:[%s12524_s1] ss:$0 sm:$0xff] (!%p10090_p11) }
 0x3ed   : > { %11215 = vmatprep.subr.bf16.mxu0 (!%p10090_p11), %v12280_v35  ;;  %v11222_v56 = vpack.c.bf16 (!%p10090_p11), %v9116_v54, %v9115_v53 }
 0x3f0   : > { %11217 = vmatpush3.bf16.msra.mxu0 (!%p10090_p11), %v11216_v49 }
 0x3f1   : > { %11218 = vmatprep.subr.bf16.mxu0 (!%p10090_p11), %v12280_v35 }
 0x3f4   : > { %11220 = vmatpush3.bf16.msra.mxu0 (!%p10090_p11), %v11219_v52 }
 0x3f5   : > { %11221 = vmatprep.subr.bf16.mxu0 (!%p10090_p11), %v12280_v35 }
 0x3f8   : > { %11223 = vmatpush3.bf16.msra.mxu0 (!%p10090_p11), %v11222_v56 }
 0x3f9   : > { %11224 = vmatprep.subr.bf16.mxu0 (!%p10090_p11), %v12280_v35 }
 0x406   : > { %v11035_v60 = vpop.f32.mrb[84].mxu0 }
 0x407   : > { %v11036_v55 = vpop.f32.mrb[85].mxu0 }
 0x408   : > { %v11057_v61 = vpop.f32.mrb[84].mxu1  ;;  %v11037_v62 = vadd.f32 %v11036_v55, %v11035_v60  ;;  %v11038_v63 = vpop.f32.mrb[86].mxu0  ;;  %v9118_v60 = vld [vmem:[%s12541_s30 + $0x78] sm:$0xff] (!%p10090_p11) }
 0x409   : > { %v11058_v0 = vpop.f32.mrb[85].mxu1  ;;  %v11039_v1 = vpop.f32.mrb[87].mxu0 }
 0x40a   : > { %v8882_v2 = vadd.f32 %v11037_v62, %v8842_v59  ;;  %v11059_v3 = vadd.f32 %v11058_v0, %v11057_v61  ;;  %v11060_v4 = vpop.f32.mrb[86].mxu1  ;;  %v9117_v59 = vld [vmem:[%s12541_s30 + $0x70] sm:$0xff] (!%p10090_p11) }
 0x40b   : > { %v11061_v5 = vpop.f32.mrb[87].mxu1  ;;  %v11225_v61 = vpack.c.bf16 (!%p10090_p11), %v9118_v60, %v9117_v59 }
 0x40c   : > { %v8922_v6 = vadd.f32 %v11059_v3, %v8882_v2 }
 0x40d   : > { %11226 = vmatpush3.bf16.msra.mxu0 (!%p10090_p11), %v11225_v61 }
 0x426   : > { %v11079_v7 = vpop.f32.mrb[88].mxu0 }
 0x427   : > { %v11080_v8 = vpop.f32.mrb[89].mxu0 }
 0x428   : > { %v11101_v9 = vpop.f32.mrb[88].mxu1  ;;  %v11081_v10 = vadd.f32 %v11080_v8, %v11079_v7  ;;  %v11082_v11 = vpop.f32.mrb[90].mxu0 }
 0x429   : > { %v11102_v12 = vpop.f32.mrb[89].mxu1  ;;  %v11083_v13 = vpop.f32.mrb[91].mxu0 }
 0x42a   : > { %v8962_v14 = vadd.f32 %v11081_v10, %v8922_v6  ;;  %v11103_v15 = vadd.f32 %v11102_v12, %v11101_v9  ;;  %v11104_v16 = vpop.f32.mrb[90].mxu1 }
 0x42b   : > { %v11105_v17 = vpop.f32.mrb[91].mxu1 }
 0x42c   : > { %v9002_v18 = vadd.f32 %v11103_v15, %v8962_v14 }
 0x446   : > { %v11123_v19 = vpop.f32.mrb[92].mxu0 }
 0x447   : > { %v11124_v20 = vpop.f32.mrb[93].mxu0 }
 0x448   : > { %v11145_v21 = vpop.f32.mrb[92].mxu1  ;;  %v11125_v42 = vadd.f32 %v11124_v20, %v11123_v19  ;;  %v11126_v22 = vpop.f32.mrb[94].mxu0 }
 0x449   : > { %v11146_v23 = vpop.f32.mrb[93].mxu1  ;;  %v11127_v24 = vpop.f32.mrb[95].mxu0 }
 0x44a   : > { %v9042_v25 = vadd.f32 %v11125_v42, %v9002_v18  ;;  %v11147_v26 = vadd.f32 %v11146_v23, %v11145_v21  ;;  %v11148_v27 = vpop.f32.mrb[94].mxu1  ;;  %9092 = sbr.rel (%p10090_p11) target bundleno = 1329 (0x531), region = 52 }
 0x44b   : > { %v11149_v29 = vpop.f32.mrb[95].mxu1 }
 0x44c   : > { %v9082_v30 = vadd.f32 %v11147_v26, %v9042_v25 }
 0x44e   : > { %v9087_v31 = vadd.f32 %v9082_v30, %v314_v28 }
 0x450   : > { %9088 = vst [vmem:[#allocation2] sm:$0x3] %v9087_v31 }
 0x457   : > { %v9093_v57 = vld [vmem:[#allocation2] sm:$0x3] }
 0x458   : > { %v9101_v55 = vadd.f32 %v10091_v58, %v9093_v57 }
 0x45a   : > { %v9102_v62 = vmax.f32 %v9101_v55, 0.0 }
 0x45c   : > { %11201 = vmatmul.mubr.f32.vlgmr.msra.gmra.mrb[0].mxu0 %v9102_v62 }
 0x52f   : > { %v9185_v63 = vpop.f32.mrb[0].mxu0 }
 0x530   : > { %9190 = vst.msk [vmem:[%s12547_s27] sm:$0x3] %vm9189_vm1, %v9185_v63  ;;  %v11202_v0 = vpop.f32.mrb[1].mxu0 }
 0x531 PF: > { %s20_s25 = sadd.s32 1, %s12271_s25   ;;  %s13592_s21 = smov %s12466_s15 }
 0x532   : > { %p17_p12 = scmp.ge.s32.totalorder %s20_s25, 6   ;;  %s13593_s5 = sld [smem:[#allocation9_spill]] }
 0x533   : > { %s13594_s6 = sld [smem:[#allocation10_spill]]  ;;  %s13595_s15 = smov %s12235_s16 }
 0x534   : > { %s13596_s16 = smov %s12239_s17  ;;  %s13597_s17 = smov %s13592_s21 }
 0x535   : > { %s13598_s18 = smov %s12247_s19  ;;  %s13599_s19 = smov %s12251_s20 }
 0x536   : > { %s13600_s20 = smov %s12471_s29  ;;  %s13601_s21 = smov %s12263_s23 }
 0x537   : > { %s13602_s22 = smov %s12267_s24  ;;  %19 = sbr.rel (!%p17_p12) target bundleno = 11 (0xb), region = 103 }
 0x538   : > { %s13603_s23 = smov %s13593_s5 }
 0x539   : > { %s13604_s24 = smov %s13594_s6 }
 0x53e   :  { %9210 = vsyncpa [#allocation4], 1 }
 0x53f   :  { %9212 = vsyncpa [#allocation4 + $0x1], 1 }
 0x540   :  { %9213 = vsyncpa [#allocation6], 1 }
 0x541   :  { %9215 = vsyncpa [#allocation6 + $0x1], 1 }

</bundles_post_ra>
